<compile_context>
chip_gen: v6e
topology: v6e:2x2x1
jax: 0.10.0
libtpu: 0.0.40
codegen_flags: <defaults>
</compile_context>

<pallas_src>
import math
import numpy as np
import jax
import jax.numpy as jnp
from jax.experimental import pallas as pl
from jax.experimental.pallas import tpu as pltpu

# ----------------------------- demo configuration ---------------------------
NUM_USERS = 10
NUM_ITEMS = 20
BATCH = 2
B_PAD = 8                 # batch padded to one full sublane group
EMB_DIM = 32              # embedding_dim
HIDDEN_DIM = 64           # hidden_dim
NUM_HEADS = 4
HEAD_DIM = EMB_DIM // NUM_HEADS
NUM_LAYERS = 2
TEXT_DIM = 48             # text_feature_dim
IMAGE_DIM = 64            # image_feature_dim
IMG_C, IMG_H, IMG_W = 3, 16, 16
IMG_FLAT = IMG_C * IMG_H * IMG_W
SEQ_LEN = 8               # text token length (unused by the math, API fidelity)
FFN_DIM = EMB_DIM * 2     # dim_feedforward of transformer layers / fusion ffn
N_TOKENS = 4              # user / item / text / image modality tokens
LANES = 128
S_TOT = N_TOKENS * B_PAD          # 32 modality-token rows (batch padded)
R_ROWS = NUM_HEADS * S_TOT        # 128 head-major rows for the fused MHA
SLAB_DTYPE = jnp.bfloat16
SLAB_ALIGN = 16                   # bf16 sublane tile height


def _align16(n):
    return (n + SLAB_ALIGN - 1) // SLAB_ALIGN * SLAB_ALIGN


# ------------------------- parameter slab layout -----------------------------
def _slab_entries():
    e = [
        # image path: img_proj folded into ie_w1 (no nonlinearity in between)
        ("w_img1", IMG_FLAT, HIDDEN_DIM),   ("b_img1", 1, HIDDEN_DIM),
        ("te_w1", TEXT_DIM, HIDDEN_DIM),    ("te_b1", 1, HIDDEN_DIM),
        # second encoder layers folded with the fusion modality projections
        ("w_txt2", HIDDEN_DIM, EMB_DIM),    ("b_txt2", 1, EMB_DIM),
        ("w_img2", HIDDEN_DIM, EMB_DIM),    ("b_img2", 1, EMB_DIM),
        ("w_user", EMB_DIM, EMB_DIM),       ("b_user", 1, EMB_DIM),
        ("w_item", EMB_DIM, EMB_DIM),       ("b_item", 1, EMB_DIM),
        # fusion MHA, q/k/v stored separately (q pre-scaled by 1/sqrt(hd))
        ("wq", EMB_DIM, EMB_DIM), ("bq", 1, EMB_DIM),
        ("wk", EMB_DIM, EMB_DIM), ("bk", 1, EMB_DIM),
        ("wv", EMB_DIM, EMB_DIM), ("bv", 1, EMB_DIM),
        ("wo", EMB_DIM, EMB_DIM), ("bo", 1, EMB_DIM),
        ("fu_ln_g", 1, EMB_DIM), ("fu_ln_b", 1, EMB_DIM),
        ("fu_ffn_w1", EMB_DIM, FFN_DIM), ("fu_ffn_b1", 1, FFN_DIM),
        ("fu_ffn_w2", FFN_DIM, EMB_DIM), ("fu_ffn_b2", 1, EMB_DIM),
        ("pe0", 1, EMB_DIM),
        # precomputed masks for the lane-masked multi-head attention
        ("head_mask", R_ROWS, EMB_DIM),
        ("attn_bias", R_ROWS, R_ROWS),
    ]
    for l in range(NUM_LAYERS):
        e += [
            (f"tl{l}_attn_w", EMB_DIM, EMB_DIM), (f"tl{l}_attn_b", 1, EMB_DIM),
            (f"tl{l}_n1_g", 1, EMB_DIM), (f"tl{l}_n1_b", 1, EMB_DIM),
            (f"tl{l}_lin1_w", EMB_DIM, FFN_DIM), (f"tl{l}_lin1_b", 1, FFN_DIM),
            (f"tl{l}_lin2_w", FFN_DIM, EMB_DIM), (f"tl{l}_lin2_b", 1, EMB_DIM),
            (f"tl{l}_n2_g", 1, EMB_DIM), (f"tl{l}_n2_b", 1, EMB_DIM),
        ]
    e += [
        ("pr_w1", EMB_DIM, HIDDEN_DIM), ("pr_b1", 1, HIDDEN_DIM),
        ("pr_w2", HIDDEN_DIM, HIDDEN_DIM // 2), ("pr_b2", 1, HIDDEN_DIM // 2),
        ("pr_w3", HIDDEN_DIM // 2, 1), ("pr_b3", 1, 1),
    ]
    return e


SLAB_ENTRIES = _slab_entries()


def _build_layout():
    layout, off = {}, 0
    for name, rows, cols in SLAB_ENTRIES:
        layout[name] = (off, rows, cols)
        off += _align16(rows)          # 16-row (bf16 sublane-tile) aligned blocks
    return layout, off


SLAB_LAYOUT, SLAB_ROWS = _build_layout()


# --------------------------------- kernel ------------------------------------
def recommender_kernel(user_ref, item_ref, text_ref, img_ref, slab_ref, out_ref):
    f32 = jnp.float32

    def P(name, full_lanes=False):
        off, rows, cols = SLAB_LAYOUT[name]
        ncols = LANES if full_lanes else cols
        return slab_ref[pl.ds(off, rows), pl.ds(0, ncols)].astype(f32)

    def linear(x, wname, bname, full_lanes=False):
        w = P(wname, full_lanes)
        b = P(bname, full_lanes)
        return jnp.dot(x, w, preferred_element_type=f32) + b

    def layer_norm(x, gname, bname, eps=1e-5):
        g, b = P(gname), P(bname)
        mu = jnp.mean(x, axis=-1, keepdims=True)
        var = jnp.mean((x - mu) * (x - mu), axis=-1, keepdims=True)
        return (x - mu) * jax.lax.rsqrt(var + eps) * g + b

    relu = jax.nn.relu

    user_emb = user_ref[...]          # [B_PAD, E]
    item_emb = item_ref[...]          # [B_PAD, E]
    text_rand = text_ref[...]         # [B_PAD, TEXT_DIM]
    image_flat = img_ref[...]         # [B_PAD, IMG_FLAT]

    # --- modality tokens (text/image encoder tails folded into the fusion
    #     projections host-side; all results start at lane 0) -----------------
    user_tok = linear(user_emb, "w_user", "b_user")                       # [B,E]
    item_tok = linear(item_emb, "w_item", "b_item")                       # [B,E]
    text_tok = linear(relu(linear(text_rand, "te_w1", "te_b1")),
                      "w_txt2", "b_txt2")                                 # [B,E]
    img_tok = linear(relu(linear(image_flat, "w_img1", "b_img1")),
                     "w_img2", "b_img2")                                  # [B,E]
    # row order st = s*B_PAD + b (s = modality index); 8-aligned sublane concat
    tokens = jnp.concatenate([user_tok, item_tok, text_tok, img_tok], axis=0)

    # --- fusion multi-head attention: all heads via lane masks ---------------
    # rows r = h*S_TOT + st; head h uses lanes [h*HEAD_DIM, (h+1)*HEAD_DIM)
    tok4 = jnp.concatenate([tokens, tokens, tokens, tokens], axis=0)      # [R,E]
    hm = P("head_mask")                                                   # [R,E]
    q = linear(tok4, "wq", "bq") * hm      # 1/sqrt(hd) folded into wq/bq
    k = linear(tok4, "wk", "bk")           # no mask needed on K
    v = linear(tok4, "wv", "bv") * hm
    scores = jax.lax.dot_general(q, k, (((1,), (1,)), ((), ())),
                                 preferred_element_type=f32)              # [R,R]
    scores = scores + P("attn_bias")       # 0 / -1e30 same-head & same-batch
    scores = scores - jnp.max(scores, axis=-1, keepdims=True)
    p = jnp.exp(scores)
    p = p * pl.reciprocal(jnp.sum(p, axis=-1, keepdims=True), approx=True)
    ctx = jnp.dot(p, v, preferred_element_type=f32)                       # [R,E]
    # each head's output lives in its own disjoint lane group -> reassembly is
    # a sum of four sublane-aligned row blocks (no lane concat)
    attn = (ctx[0 * S_TOT:1 * S_TOT] + ctx[1 * S_TOT:2 * S_TOT]
            + ctx[2 * S_TOT:3 * S_TOT] + ctx[3 * S_TOT:4 * S_TOT])        # [S,E]
    attn = linear(attn, "wo", "bo")

    x = layer_norm(tokens + attn, "fu_ln_g", "fu_ln_b")
    ff = linear(relu(linear(x, "fu_ffn_w1", "fu_ffn_b1")), "fu_ffn_w2", "fu_ffn_b2")
    x = layer_norm(x + ff, "fu_ln_g", "fu_ln_b")   # same LayerNorm reused (matches reference)

    # mean over the 4 modality tokens -> fused features [B_PAD, E]
    fused = (x[0 * B_PAD:1 * B_PAD] + x[1 * B_PAD:2 * B_PAD]
             + x[2 * B_PAD:3 * B_PAD] + x[3 * B_PAD:4 * B_PAD]) * 0.25

    # --- TransformerEncoder (seq len 1) --------------------------------------
    y = fused + P("pe0")
    for l in range(NUM_LAYERS):
        # S == 1: softmax over a single key is the identity, so self-attention
        # collapses to one affine map folded host-side (Wv@Wo, bv@Wo+bo).
        sa = linear(y, f"tl{l}_attn_w", f"tl{l}_attn_b")
        y = layer_norm(y + sa, f"tl{l}_n1_g", f"tl{l}_n1_b")
        ff = linear(relu(linear(y, f"tl{l}_lin1_w", f"tl{l}_lin1_b")),
                    f"tl{l}_lin2_w", f"tl{l}_lin2_b")
        y = layer_norm(y + ff, f"tl{l}_n2_g", f"tl{l}_n2_b")

    # --- predictor; final layer padded to 128 lanes -> unmasked full store ---
    h1 = relu(linear(y, "pr_w1", "pr_b1"))
    h2 = relu(linear(h1, "pr_w2", "pr_b2"))
    out_ref[...] = linear(h2, "pr_w3", "pr_b3", full_lanes=True)  # [B_PAD,128]


# ------------------------------ wrapper ---------------------------------------
def forward(model, user_ids, item_ids, text_input_ids, text_attention_mask,
            images, text_rand):
    del text_input_ids, text_attention_mask   # ignored by the reference module too
    user_emb = model["user_embedding"][user_ids]        # embedding gather (glue)
    item_emb = model["item_embedding"][item_ids]
    image_flat = images.reshape(images.shape[0], -1)    # NCHW row-major flatten
    B = user_ids.shape[0]
    assert B <= B_PAD

    def pad_b(a):   # zero-pad the batch axis to a full sublane group
        return jnp.pad(a.astype(jnp.float32), ((0, B_PAD - B), (0, 0)))

    out = pl.pallas_call(
        recommender_kernel,
        out_shape=jax.ShapeDtypeStruct((B_PAD, LANES), jnp.float32),
        in_specs=[pl.BlockSpec(memory_space=pltpu.MemorySpace.VMEM)] * 5,
        out_specs=pl.BlockSpec(memory_space=pltpu.MemorySpace.VMEM),
    )(pad_b(user_emb), pad_b(item_emb), pad_b(text_rand), pad_b(image_flat),
      model["slab"])
    return out[:B, 0]                                    # predictions.squeeze(-1)


# ------------------------------ init / packing -------------------------------
def _xavier_uniform(key, fan_in, fan_out):
    limit = math.sqrt(6.0 / (fan_in + fan_out))
    return jax.random.uniform(key, (fan_in, fan_out), jnp.float32, -limit, limit)


def _bf16_round(x):
    # round once so the bf16 slab and the f32 reference share identical weights
    return x.astype(jnp.bfloat16).astype(jnp.float32)


def init_model(key):
    key, ku, ki = jax.random.split(key, 3)
    user_embedding = 0.01 * jax.random.normal(ku, (NUM_USERS, EMB_DIM), jnp.float32)
    item_embedding = 0.01 * jax.random.normal(ki, (NUM_ITEMS, EMB_DIM), jnp.float32)

    linears = [
        ("img_proj", IMG_FLAT, IMAGE_DIM),
        ("te_1", TEXT_DIM, HIDDEN_DIM), ("te_2", HIDDEN_DIM, TEXT_DIM),
        ("ie_1", IMAGE_DIM, HIDDEN_DIM), ("ie_2", HIDDEN_DIM, IMAGE_DIM),
        ("fu_user", EMB_DIM, EMB_DIM), ("fu_item", EMB_DIM, EMB_DIM),
        ("fu_text", TEXT_DIM, EMB_DIM), ("fu_img", IMAGE_DIM, EMB_DIM),
        ("fu_attn_in", EMB_DIM, 3 * EMB_DIM), ("fu_attn_out", EMB_DIM, EMB_DIM),
        ("fu_ffn_1", EMB_DIM, FFN_DIM), ("fu_ffn_2", FFN_DIM, EMB_DIM),
        ("pr_1", EMB_DIM, HIDDEN_DIM), ("pr_2", HIDDEN_DIM, HIDDEN_DIM // 2),
        ("pr_3", HIDDEN_DIM // 2, 1),
    ]
    for l in range(NUM_LAYERS):
        linears += [
            (f"tl{l}_in", EMB_DIM, 3 * EMB_DIM), (f"tl{l}_out", EMB_DIM, EMB_DIM),
            (f"tl{l}_lin1", EMB_DIM, FFN_DIM), (f"tl{l}_lin2", FFN_DIM, EMB_DIM),
        ]
    keys = jax.random.split(key, len(linears))
    raw = {}
    for k, (name, fi, fo) in zip(keys, linears):
        raw[name + "_w"] = _bf16_round(_xavier_uniform(k, fi, fo))
        raw[name + "_b"] = jnp.zeros((1, fo), jnp.float32)   # nn.init.constant_(bias, 0)

    ones_e = jnp.ones((1, EMB_DIM), jnp.float32)
    zeros_e = jnp.zeros((1, EMB_DIM), jnp.float32)
    hi = jax.lax.Precision.HIGHEST

    def mm(a, b):
        return jnp.dot(a, b, precision=hi)

    E = EMB_DIM
    sp = {}
    # modality token construction (folded chains; eval mode, no dropout between)
    sp["w_user"], sp["b_user"] = raw["fu_user_w"], raw["fu_user_b"]
    sp["w_item"], sp["b_item"] = raw["fu_item_w"], raw["fu_item_b"]
    sp["te_w1"], sp["te_b1"] = raw["te_1_w"], raw["te_1_b"]
    sp["w_txt2"] = mm(raw["te_2_w"], raw["fu_text_w"])
    sp["b_txt2"] = mm(raw["te_2_b"], raw["fu_text_w"]) + raw["fu_text_b"]
    sp["w_img1"] = mm(raw["img_proj_w"], raw["ie_1_w"])
    sp["b_img1"] = mm(raw["img_proj_b"], raw["ie_1_w"]) + raw["ie_1_b"]
    sp["w_img2"] = mm(raw["ie_2_w"], raw["fu_img_w"])
    sp["b_img2"] = mm(raw["ie_2_b"], raw["fu_img_w"]) + raw["fu_img_b"]

    # fusion MHA weights (q pre-scaled)
    scale = 1.0 / math.sqrt(HEAD_DIM)
    wi, bi = raw["fu_attn_in_w"], raw["fu_attn_in_b"]
    sp["wq"], sp["bq"] = wi[:, 0:E] * scale, bi[:, 0:E] * scale
    sp["wk"], sp["bk"] = wi[:, E:2 * E], bi[:, E:2 * E]
    sp["wv"], sp["bv"] = wi[:, 2 * E:3 * E], bi[:, 2 * E:3 * E]
    sp["wo"], sp["bo"] = raw["fu_attn_out_w"], raw["fu_attn_out_b"]
    sp["fu_ln_g"], sp["fu_ln_b"] = ones_e, zeros_e
    sp["fu_ffn_w1"], sp["fu_ffn_b1"] = raw["fu_ffn_1_w"], raw["fu_ffn_1_b"]
    sp["fu_ffn_w2"], sp["fu_ffn_b2"] = raw["fu_ffn_2_w"], raw["fu_ffn_2_b"]
    # positional encoding at position 0: sin(0)=0 (even dims), cos(0)=1 (odd)
    sp["pe0"] = jnp.zeros((1, EMB_DIM), jnp.float32).at[0, 1::2].set(1.0)

    # precomputed masks for the lane-masked MHA (rows r = h*S_TOT + s*B_PAD + b)
    rows = np.arange(R_ROWS)
    head_of_row = rows // S_TOT
    lane_head = np.arange(EMB_DIM) // HEAD_DIM
    head_mask = (lane_head[None, :] == head_of_row[:, None]).astype(np.float32)
    same_head = head_of_row[:, None] == head_of_row[None, :]
    same_batch = (rows % B_PAD)[:, None] == (rows % B_PAD)[None, :]
    attn_bias = np.where(same_head & same_batch, 0.0, -1e30).astype(np.float32)
    sp["head_mask"] = jnp.asarray(head_mask)
    sp["attn_bias"] = jnp.asarray(attn_bias)

    # encoder layers: fold S==1 self-attention (softmax==identity) host-side
    for l in range(NUM_LAYERS):
        w_in, b_in = raw[f"tl{l}_in_w"], raw[f"tl{l}_in_b"]
        w_out, b_out = raw[f"tl{l}_out_w"], raw[f"tl{l}_out_b"]
        wv_l = w_in[:, 2 * E:3 * E]
        bv_l = b_in[:, 2 * E:3 * E]
        sp[f"tl{l}_attn_w"] = mm(wv_l, w_out)
        sp[f"tl{l}_attn_b"] = mm(bv_l, w_out) + b_out
        sp[f"tl{l}_n1_g"], sp[f"tl{l}_n1_b"] = ones_e, zeros_e
        sp[f"tl{l}_lin1_w"], sp[f"tl{l}_lin1_b"] = raw[f"tl{l}_lin1_w"], raw[f"tl{l}_lin1_b"]
        sp[f"tl{l}_lin2_w"], sp[f"tl{l}_lin2_b"] = raw[f"tl{l}_lin2_w"], raw[f"tl{l}_lin2_b"]
        sp[f"tl{l}_n2_g"], sp[f"tl{l}_n2_b"] = ones_e, zeros_e

    sp["pr_w1"], sp["pr_b1"] = raw["pr_1_w"], raw["pr_1_b"]
    sp["pr_w2"], sp["pr_b2"] = raw["pr_2_w"], raw["pr_2_b"]
    sp["pr_w3"], sp["pr_b3"] = raw["pr_3_w"], raw["pr_3_b"]

    # pack everything into one lane-padded bf16 [SLAB_ROWS, 128] slab
    slab = jnp.zeros((SLAB_ROWS, LANES), SLAB_DTYPE)
    for name, rows_, cols_ in SLAB_ENTRIES:
        off, r_, c_ = SLAB_LAYOUT[name]
        arr = sp[name]
        assert arr.shape == (rows_, cols_), (name, arr.shape, (rows_, cols_))
        slab = slab.at[off:off + rows_, 0:cols_].set(arr.astype(SLAB_DTYPE))

    model = {"user_embedding": user_embedding,
             "item_embedding": item_embedding,
             "slab": slab}
    return model, raw


# ------------------------- pure-JAX reference (host) --------------------------
def reference_forward(raw, user_embedding, item_embedding, user_ids, item_ids,
                      images, text_rand):
    hi = jax.lax.Precision.HIGHEST

    def lin(x, name):
        return jnp.dot(x, raw[name + "_w"], precision=hi) + raw[name + "_b"]

    def ln(x, eps=1e-5):
        mu = x.mean(-1, keepdims=True)
        var = ((x - mu) ** 2).mean(-1, keepdims=True)
        return (x - mu) / jnp.sqrt(var + eps)      # gamma=1, beta=0 at init

    relu = jax.nn.relu
    user_emb = user_embedding[user_ids]
    item_emb = item_embedding[item_ids]
    text_feat = lin(relu(lin(text_rand, "te_1")), "te_2")
    img = lin(images.reshape(images.shape[0], -1), "img_proj")
    image_feat = lin(relu(lin(img, "ie_1")), "ie_2")

    feats = jnp.stack([lin(user_emb, "fu_user"), lin(item_emb, "fu_item"),
                       lin(text_feat, "fu_text"), lin(image_feat, "fu_img")], axis=1)

    def mha(x, wi, bi, wo, bo):          # x: [B, S, E]
        qkv = jnp.dot(x, wi, precision=hi) + bi
        q = qkv[..., :EMB_DIM] / math.sqrt(HEAD_DIM)
        k = qkv[..., EMB_DIM:2 * EMB_DIM]
        v = qkv[..., 2 * EMB_DIM:]
        outs = []
        for h in range(NUM_HEADS):
            sl = slice(h * HEAD_DIM, (h + 1) * HEAD_DIM)
            s = jnp.einsum('bqd,bkd->bqk', q[..., sl], k[..., sl], precision=hi)
            p = jax.nn.softmax(s, axis=-1)
            outs.append(jnp.einsum('bqk,bkd->bqd', p, v[..., sl], precision=hi))
        return jnp.dot(jnp.concatenate(outs, axis=-1), wo, precision=hi) + bo

    attn = mha(feats, raw["fu_attn_in_w"], raw["fu_attn_in_b"],
               raw["fu_attn_out_w"], raw["fu_attn_out_b"])
    x = ln(feats + attn)
    ff = lin(relu(lin(x, "fu_ffn_1")), "fu_ffn_2")
    x = ln(x + ff)
    fused = x.mean(axis=1)

    pe0 = jnp.zeros((EMB_DIM,), jnp.float32).at[1::2].set(1.0)
    y = fused + pe0
    for l in range(NUM_LAYERS):
        sa = mha(y[:, None, :], raw[f"tl{l}_in_w"], raw[f"tl{l}_in_b"],
                 raw[f"tl{l}_out_w"], raw[f"tl{l}_out_b"])[:, 0, :]
        y = ln(y + sa)
        ff = lin(relu(lin(y, f"tl{l}_lin1")), f"tl{l}_lin2")
        y = ln(y + ff)
    h1 = relu(lin(y, "pr_1"))
    h2 = relu(lin(h1, "pr_2"))
    return lin(h2, "pr_3")[:, 0]


# ----------------------------------- main -------------------------------------
if __name__ == "__main__":
    root = jax.random.PRNGKey(0)
    pkey, dkey = jax.random.split(root)
    model, raw = init_model(pkey)

    k1, k2, k3, k4, k5 = jax.random.split(dkey, 5)
    user_ids = jax.random.randint(k1, (BATCH,), 0, NUM_USERS)
    item_ids = jax.random.randint(k2, (BATCH,), 0, NUM_ITEMS)
    text_input_ids = jax.random.randint(k3, (BATCH, SEQ_LEN), 0, 1000)
    text_attention_mask = jnp.ones((BATCH, SEQ_LEN), jnp.int32)
    images = jax.random.normal(k4, (BATCH, IMG_C, IMG_H, IMG_W), jnp.float32)
    # TODO(synk): the reference draws torch.randn text features inside forward
    # (ignoring the tokens); that RNG draw is reproduced as an explicit input.
    text_rand = jax.random.normal(k5, (BATCH, TEXT_DIM), jnp.float32)

    preds = forward(model, user_ids, item_ids, text_input_ids,
                    text_attention_mask, images, text_rand)
    preds = jax.block_until_ready(preds)

    ref = reference_forward(raw, model["user_embedding"], model["item_embedding"],
                            user_ids, item_ids, images, text_rand)

    assert preds.shape == (BATCH,) and preds.dtype == jnp.float32
    assert bool(jnp.all(jnp.isfinite(preds)))
    assert bool(jnp.allclose(preds, ref, rtol=2e-2, atol=2e-2)), (preds, ref)
    print("KERNEL_OK")
</pallas_src>

<mosaic_0001>
module attributes {stable_mosaic.version = 11 : i64} {
  func.func @recommender_kernel(%arg0: memref<8x32xf32, #tpu.memory_space<vmem>>, %arg1: memref<8x32xf32, #tpu.memory_space<vmem>>, %arg2: memref<8x48xf32, #tpu.memory_space<vmem>>, %arg3: memref<8x768xf32, #tpu.memory_space<vmem>>, %arg4: memref<2384x128xbf16, #tpu.memory_space<vmem>>, %arg5: memref<8x128xf32, #tpu.memory_space<vmem>>) attributes {dimension_semantics = [], scalar_prefetch = 0 : i64, scratch_operands = 0 : i64, tpu.core_type = #tpu.core_type<tc>} {
    %c0 = arith.constant 0 : index
    %c0_0 = arith.constant 0 : index
    %0 = vector.load %arg0[%c0, %c0_0] : memref<8x32xf32, #tpu.memory_space<vmem>>, vector<8x32xf32>
    %c0_1 = arith.constant 0 : index
    %c0_2 = arith.constant 0 : index
    %1 = vector.load %arg1[%c0_1, %c0_2] : memref<8x32xf32, #tpu.memory_space<vmem>>, vector<8x32xf32>
    %c0_3 = arith.constant 0 : index
    %c0_4 = arith.constant 0 : index
    %2 = vector.load %arg2[%c0_3, %c0_4] : memref<8x48xf32, #tpu.memory_space<vmem>>, vector<8x48xf32>
    %c0_5 = arith.constant 0 : index
    %c0_6 = arith.constant 0 : index
    %3 = vector.load %arg3[%c0_5, %c0_6] : memref<8x768xf32, #tpu.memory_space<vmem>>, vector<8x768xf32>
    %c1008 = arith.constant 1008 : index
    %c0_7 = arith.constant 0 : index
    %4 = vector.load %arg4[%c1008, %c0_7] : memref<2384x128xbf16, #tpu.memory_space<vmem>>, vector<32x32xbf16>
    %5 = arith.extf %4 : vector<32x32xbf16> to vector<32x32xf32>
    %c1040 = arith.constant 1040 : index
    %c0_8 = arith.constant 0 : index
    %6 = vector.load %arg4[%c1040, %c0_8] : memref<2384x128xbf16, #tpu.memory_space<vmem>>, vector<1x32xbf16>
    %7 = arith.extf %6 : vector<1x32xbf16> to vector<1x32xf32>
    %cst = arith.constant dense<0.000000e+00> : vector<8x32xf32>
    %8 = tpu.matmul %0, %5, %cst {dimension_numbers = #tpu.dot_dimension_numbers<[1], [0], [0], [1], [0, 0, 1, 1], [], []>} : vector<8x32xf32>, vector<32x32xf32>, vector<8x32xf32> -> vector<8x32xf32>
    %9 = vector.broadcast %7 : vector<1x32xf32> to vector<8x32xf32>
    %10 = arith.addf %8, %9 : vector<8x32xf32>
    %c1056 = arith.constant 1056 : index
    %c0_9 = arith.constant 0 : index
    %11 = vector.load %arg4[%c1056, %c0_9] : memref<2384x128xbf16, #tpu.memory_space<vmem>>, vector<32x32xbf16>
    %12 = arith.extf %11 : vector<32x32xbf16> to vector<32x32xf32>
    %c1088 = arith.constant 1088 : index
    %c0_10 = arith.constant 0 : index
    %13 = vector.load %arg4[%c1088, %c0_10] : memref<2384x128xbf16, #tpu.memory_space<vmem>>, vector<1x32xbf16>
    %14 = arith.extf %13 : vector<1x32xbf16> to vector<1x32xf32>
    %cst_11 = arith.constant dense<0.000000e+00> : vector<8x32xf32>
    %15 = tpu.matmul %1, %12, %cst_11 {dimension_numbers = #tpu.dot_dimension_numbers<[1], [0], [0], [1], [0, 0, 1, 1], [], []>} : vector<8x32xf32>, vector<32x32xf32>, vector<8x32xf32> -> vector<8x32xf32>
    %16 = vector.broadcast %14 : vector<1x32xf32> to vector<8x32xf32>
    %17 = arith.addf %15, %16 : vector<8x32xf32>
    %c784 = arith.constant 784 : index
    %c0_12 = arith.constant 0 : index
    %18 = vector.load %arg4[%c784, %c0_12] : memref<2384x128xbf16, #tpu.memory_space<vmem>>, vector<48x64xbf16>
    %19 = arith.extf %18 : vector<48x64xbf16> to vector<48x64xf32>
    %c832 = arith.constant 832 : index
    %c0_13 = arith.constant 0 : index
    %20 = vector.load %arg4[%c832, %c0_13] : memref<2384x128xbf16, #tpu.memory_space<vmem>>, vector<1x64xbf16>
    %21 = arith.extf %20 : vector<1x64xbf16> to vector<1x64xf32>
    %cst_14 = arith.constant dense<0.000000e+00> : vector<8x64xf32>
    %22 = tpu.matmul %2, %19, %cst_14 {dimension_numbers = #tpu.dot_dimension_numbers<[1], [0], [0], [1], [0, 0, 1, 1], [], []>} : vector<8x48xf32>, vector<48x64xf32>, vector<8x64xf32> -> vector<8x64xf32>
    %23 = vector.broadcast %21 : vector<1x64xf32> to vector<8x64xf32>
    %24 = arith.addf %22, %23 : vector<8x64xf32>
    %cst_15 = arith.constant 0.000000e+00 : f32
    %25 = vector.broadcast %cst_15 : f32 to vector<8x64xf32>
    %26 = arith.maximumf %24, %25 : vector<8x64xf32>
    %c848 = arith.constant 848 : index
    %c0_16 = arith.constant 0 : index
    %27 = vector.load %arg4[%c848, %c0_16] : memref<2384x128xbf16, #tpu.memory_space<vmem>>, vector<64x32xbf16>
    %28 = arith.extf %27 : vector<64x32xbf16> to vector<64x32xf32>
    %c912 = arith.constant 912 : index
    %c0_17 = arith.constant 0 : index
    %29 = vector.load %arg4[%c912, %c0_17] : memref<2384x128xbf16, #tpu.memory_space<vmem>>, vector<1x32xbf16>
    %30 = arith.extf %29 : vector<1x32xbf16> to vector<1x32xf32>
    %cst_18 = arith.constant dense<0.000000e+00> : vector<8x32xf32>
    %31 = tpu.matmul %26, %28, %cst_18 {dimension_numbers = #tpu.dot_dimension_numbers<[1], [0], [0], [1], [0, 0, 1, 1], [], []>} : vector<8x64xf32>, vector<64x32xf32>, vector<8x32xf32> -> vector<8x32xf32>
    %32 = vector.broadcast %30 : vector<1x32xf32> to vector<8x32xf32>
    %33 = arith.addf %31, %32 : vector<8x32xf32>
    %c0_19 = arith.constant 0 : index
    %c0_20 = arith.constant 0 : index
    %34 = vector.load %arg4[%c0_19, %c0_20] : memref<2384x128xbf16, #tpu.memory_space<vmem>>, vector<768x64xbf16>
    %35 = arith.extf %34 : vector<768x64xbf16> to vector<768x64xf32>
    %c768 = arith.constant 768 : index
    %c0_21 = arith.constant 0 : index
    %36 = vector.load %arg4[%c768, %c0_21] : memref<2384x128xbf16, #tpu.memory_space<vmem>>, vector<1x64xbf16>
    %37 = arith.extf %36 : vector<1x64xbf16> to vector<1x64xf32>
    %cst_22 = arith.constant dense<0.000000e+00> : vector<8x64xf32>
    %38 = tpu.matmul %3, %35, %cst_22 {dimension_numbers = #tpu.dot_dimension_numbers<[1], [0], [0], [1], [0, 0, 1, 1], [], []>} : vector<8x768xf32>, vector<768x64xf32>, vector<8x64xf32> -> vector<8x64xf32>
    %39 = vector.broadcast %37 : vector<1x64xf32> to vector<8x64xf32>
    %40 = arith.addf %38, %39 : vector<8x64xf32>
    %cst_23 = arith.constant 0.000000e+00 : f32
    %41 = vector.broadcast %cst_23 : f32 to vector<8x64xf32>
    %42 = arith.maximumf %40, %41 : vector<8x64xf32>
    %c928 = arith.constant 928 : index
    %c0_24 = arith.constant 0 : index
    %43 = vector.load %arg4[%c928, %c0_24] : memref<2384x128xbf16, #tpu.memory_space<vmem>>, vector<64x32xbf16>
    %44 = arith.extf %43 : vector<64x32xbf16> to vector<64x32xf32>
    %c992 = arith.constant 992 : index
    %c0_25 = arith.constant 0 : index
    %45 = vector.load %arg4[%c992, %c0_25] : memref<2384x128xbf16, #tpu.memory_space<vmem>>, vector<1x32xbf16>
    %46 = arith.extf %45 : vector<1x32xbf16> to vector<1x32xf32>
    %cst_26 = arith.constant dense<0.000000e+00> : vector<8x32xf32>
    %47 = tpu.matmul %42, %44, %cst_26 {dimension_numbers = #tpu.dot_dimension_numbers<[1], [0], [0], [1], [0, 0, 1, 1], [], []>} : vector<8x64xf32>, vector<64x32xf32>, vector<8x32xf32> -> vector<8x32xf32>
    %48 = vector.broadcast %46 : vector<1x32xf32> to vector<8x32xf32>
    %49 = arith.addf %47, %48 : vector<8x32xf32>
    %50 = tpu.concatenate %10, %17, %33, %49 in 0 : vector<8x32xf32>, vector<8x32xf32>, vector<8x32xf32>, vector<8x32xf32> -> vector<32x32xf32>
    %51 = tpu.concatenate %50, %50, %50, %50 in 0 : vector<32x32xf32>, vector<32x32xf32>, vector<32x32xf32>, vector<32x32xf32> -> vector<128x32xf32>
    %c1472 = arith.constant 1472 : index
    %c0_27 = arith.constant 0 : index
    %52 = vector.load %arg4[%c1472, %c0_27] : memref<2384x128xbf16, #tpu.memory_space<vmem>>, vector<128x32xbf16>
    %53 = arith.extf %52 : vector<128x32xbf16> to vector<128x32xf32>
    %c1104 = arith.constant 1104 : index
    %c0_28 = arith.constant 0 : index
    %54 = vector.load %arg4[%c1104, %c0_28] : memref<2384x128xbf16, #tpu.memory_space<vmem>>, vector<32x32xbf16>
    %55 = arith.extf %54 : vector<32x32xbf16> to vector<32x32xf32>
    %c1136 = arith.constant 1136 : index
    %c0_29 = arith.constant 0 : index
    %56 = vector.load %arg4[%c1136, %c0_29] : memref<2384x128xbf16, #tpu.memory_space<vmem>>, vector<1x32xbf16>
    %57 = arith.extf %56 : vector<1x32xbf16> to vector<1x32xf32>
    %cst_30 = arith.constant dense<0.000000e+00> : vector<128x32xf32>
    %58 = tpu.matmul %51, %55, %cst_30 {dimension_numbers = #tpu.dot_dimension_numbers<[1], [0], [0], [1], [0, 0, 1, 1], [], []>} : vector<128x32xf32>, vector<32x32xf32>, vector<128x32xf32> -> vector<128x32xf32>
    %59 = vector.broadcast %57 : vector<1x32xf32> to vector<128x32xf32>
    %60 = arith.addf %58, %59 : vector<128x32xf32>
    %61 = arith.mulf %60, %53 : vector<128x32xf32>
    %c1152 = arith.constant 1152 : index
    %c0_31 = arith.constant 0 : index
    %62 = vector.load %arg4[%c1152, %c0_31] : memref<2384x128xbf16, #tpu.memory_space<vmem>>, vector<32x32xbf16>
    %63 = arith.extf %62 : vector<32x32xbf16> to vector<32x32xf32>
    %c1184 = arith.constant 1184 : index
    %c0_32 = arith.constant 0 : index
    %64 = vector.load %arg4[%c1184, %c0_32] : memref<2384x128xbf16, #tpu.memory_space<vmem>>, vector<1x32xbf16>
    %65 = arith.extf %64 : vector<1x32xbf16> to vector<1x32xf32>
    %cst_33 = arith.constant dense<0.000000e+00> : vector<128x32xf32>
    %66 = tpu.matmul %51, %63, %cst_33 {dimension_numbers = #tpu.dot_dimension_numbers<[1], [0], [0], [1], [0, 0, 1, 1], [], []>} : vector<128x32xf32>, vector<32x32xf32>, vector<128x32xf32> -> vector<128x32xf32>
    %67 = vector.broadcast %65 : vector<1x32xf32> to vector<128x32xf32>
    %68 = arith.addf %66, %67 : vector<128x32xf32>
    %c1200 = arith.constant 1200 : index
    %c0_34 = arith.constant 0 : index
    %69 = vector.load %arg4[%c1200, %c0_34] : memref<2384x128xbf16, #tpu.memory_space<vmem>>, vector<32x32xbf16>
    %70 = arith.extf %69 : vector<32x32xbf16> to vector<32x32xf32>
    %c1232 = arith.constant 1232 : index
    %c0_35 = arith.constant 0 : index
    %71 = vector.load %arg4[%c1232, %c0_35] : memref<2384x128xbf16, #tpu.memory_space<vmem>>, vector<1x32xbf16>
    %72 = arith.extf %71 : vector<1x32xbf16> to vector<1x32xf32>
    %cst_36 = arith.constant dense<0.000000e+00> : vector<128x32xf32>
    %73 = tpu.matmul %51, %70, %cst_36 {dimension_numbers = #tpu.dot_dimension_numbers<[1], [0], [0], [1], [0, 0, 1, 1], [], []>} : vector<128x32xf32>, vector<32x32xf32>, vector<128x32xf32> -> vector<128x32xf32>
    %74 = vector.broadcast %72 : vector<1x32xf32> to vector<128x32xf32>
    %75 = arith.addf %73, %74 : vector<128x32xf32>
    %76 = arith.mulf %75, %53 : vector<128x32xf32>
    %cst_37 = arith.constant dense<0.000000e+00> : vector<128x128xf32>
    %77 = tpu.matmul %61, %68, %cst_37 {dimension_numbers = #tpu.dot_dimension_numbers<[1], [1], [0], [0], [0, 0, 1, 0], [], []>} : vector<128x32xf32>, vector<128x32xf32>, vector<128x128xf32> -> vector<128x128xf32>
    %c1600 = arith.constant 1600 : index
    %c0_38 = arith.constant 0 : index
    %78 = vector.load %arg4[%c1600, %c0_38] : memref<2384x128xbf16, #tpu.memory_space<vmem>>, vector<128x128xbf16>
    %79 = arith.extf %78 : vector<128x128xbf16> to vector<128x128xf32>
    %80 = arith.addf %77, %79 : vector<128x128xf32>
    %cst_39 = arith.constant dense<0xFF800000> : vector<128xf32>
    %81 = vector.multi_reduction <maximumf>, %80, %cst_39 [1] : vector<128x128xf32> to vector<128xf32>
    %82 = vector.shape_cast %81 : vector<128xf32> to vector<128x1xf32>
    %83 = vector.broadcast %82 : vector<128x1xf32> to vector<128x128xf32>
    %84 = arith.subf %80, %83 : vector<128x128xf32>
    %85 = math.exp %84 : vector<128x128xf32>
    %cst_40 = arith.constant dense<0.000000e+00> : vector<128xf32>
    %86 = vector.multi_reduction <add>, %85, %cst_40 [1] : vector<128x128xf32> to vector<128xf32>
    %87 = vector.shape_cast %86 : vector<128xf32> to vector<128x1xf32>
    %88 = tpu.reciprocal %87 {approx = true} : vector<128x1xf32> -> vector<128x1xf32>
    %89 = vector.broadcast %88 : vector<128x1xf32> to vector<128x128xf32>
    %90 = arith.mulf %85, %89 : vector<128x128xf32>
    %cst_41 = arith.constant dense<0.000000e+00> : vector<128x32xf32>
    %91 = tpu.matmul %90, %76, %cst_41 {dimension_numbers = #tpu.dot_dimension_numbers<[1], [0], [0], [1], [0, 0, 1, 1], [], []>} : vector<128x128xf32>, vector<128x32xf32>, vector<128x32xf32> -> vector<128x32xf32>
    %92 = vector.extract_strided_slice %91 {offsets = [0, 0], sizes = [32, 32], strides = [1, 1]} : vector<128x32xf32> to vector<32x32xf32>
    %93 = vector.extract_strided_slice %91 {offsets = [32, 0], sizes = [32, 32], strides = [1, 1]} : vector<128x32xf32> to vector<32x32xf32>
    %94 = arith.addf %92, %93 : vector<32x32xf32>
    %95 = vector.extract_strided_slice %91 {offsets = [64, 0], sizes = [32, 32], strides = [1, 1]} : vector<128x32xf32> to vector<32x32xf32>
    %96 = arith.addf %94, %95 : vector<32x32xf32>
    %97 = vector.extract_strided_slice %91 {offsets = [96, 0], sizes = [32, 32], strides = [1, 1]} : vector<128x32xf32> to vector<32x32xf32>
    %98 = arith.addf %96, %97 : vector<32x32xf32>
    %c1248 = arith.constant 1248 : index
    %c0_42 = arith.constant 0 : index
    %99 = vector.load %arg4[%c1248, %c0_42] : memref<2384x128xbf16, #tpu.memory_space<vmem>>, vector<32x32xbf16>
    %100 = arith.extf %99 : vector<32x32xbf16> to vector<32x32xf32>
    %c1280 = arith.constant 1280 : index
    %c0_43 = arith.constant 0 : index
    %101 = vector.load %arg4[%c1280, %c0_43] : memref<2384x128xbf16, #tpu.memory_space<vmem>>, vector<1x32xbf16>
    %102 = arith.extf %101 : vector<1x32xbf16> to vector<1x32xf32>
    %cst_44 = arith.constant dense<0.000000e+00> : vector<32x32xf32>
    %103 = tpu.matmul %98, %100, %cst_44 {dimension_numbers = #tpu.dot_dimension_numbers<[1], [0], [0], [1], [0, 0, 1, 1], [], []>} : vector<32x32xf32>, vector<32x32xf32>, vector<32x32xf32> -> vector<32x32xf32>
    %104 = vector.broadcast %102 : vector<1x32xf32> to vector<32x32xf32>
    %105 = arith.addf %103, %104 : vector<32x32xf32>
    %106 = arith.addf %50, %105 : vector<32x32xf32>
    %c1296 = arith.constant 1296 : index
    %c0_45 = arith.constant 0 : index
    %107 = vector.load %arg4[%c1296, %c0_45] : memref<2384x128xbf16, #tpu.memory_space<vmem>>, vector<1x32xbf16>
    %108 = arith.extf %107 : vector<1x32xbf16> to vector<1x32xf32>
    %c1312 = arith.constant 1312 : index
    %c0_46 = arith.constant 0 : index
    %109 = vector.load %arg4[%c1312, %c0_46] : memref<2384x128xbf16, #tpu.memory_space<vmem>>, vector<1x32xbf16>
    %110 = arith.extf %109 : vector<1x32xbf16> to vector<1x32xf32>
    %cst_47 = arith.constant dense<0.000000e+00> : vector<32xf32>
    %111 = vector.multi_reduction <add>, %106, %cst_47 [1] : vector<32x32xf32> to vector<32xf32>
    %112 = vector.shape_cast %111 : vector<32xf32> to vector<32x1xf32>
    %cst_48 = arith.constant 3.200000e+01 : f32
    %113 = vector.broadcast %cst_48 : f32 to vector<32x1xf32>
    %114 = arith.divf %112, %113 : vector<32x1xf32>
    %115 = vector.broadcast %114 : vector<32x1xf32> to vector<32x32xf32>
    %116 = arith.subf %106, %115 : vector<32x32xf32>
    %117 = vector.broadcast %114 : vector<32x1xf32> to vector<32x32xf32>
    %118 = arith.subf %106, %117 : vector<32x32xf32>
    %119 = arith.mulf %116, %118 : vector<32x32xf32>
    %cst_49 = arith.constant dense<0.000000e+00> : vector<32xf32>
    %120 = vector.multi_reduction <add>, %119, %cst_49 [1] : vector<32x32xf32> to vector<32xf32>
    %121 = vector.shape_cast %120 : vector<32xf32> to vector<32x1xf32>
    %cst_50 = arith.constant 3.200000e+01 : f32
    %122 = vector.broadcast %cst_50 : f32 to vector<32x1xf32>
    %123 = arith.divf %121, %122 : vector<32x1xf32>
    %124 = vector.broadcast %114 : vector<32x1xf32> to vector<32x32xf32>
    %125 = arith.subf %106, %124 : vector<32x32xf32>
    %cst_51 = arith.constant 9.99999974E-6 : f32
    %126 = vector.broadcast %cst_51 : f32 to vector<32x1xf32>
    %127 = arith.addf %123, %126 : vector<32x1xf32>
    %128 = math.rsqrt %127 : vector<32x1xf32>
    %129 = vector.broadcast %128 : vector<32x1xf32> to vector<32x32xf32>
    %130 = arith.mulf %125, %129 : vector<32x32xf32>
    %131 = vector.broadcast %108 : vector<1x32xf32> to vector<32x32xf32>
    %132 = arith.mulf %130, %131 : vector<32x32xf32>
    %133 = vector.broadcast %110 : vector<1x32xf32> to vector<32x32xf32>
    %134 = arith.addf %132, %133 : vector<32x32xf32>
    %c1328 = arith.constant 1328 : index
    %c0_52 = arith.constant 0 : index
    %135 = vector.load %arg4[%c1328, %c0_52] : memref<2384x128xbf16, #tpu.memory_space<vmem>>, vector<32x64xbf16>
    %136 = arith.extf %135 : vector<32x64xbf16> to vector<32x64xf32>
    %c1360 = arith.constant 1360 : index
    %c0_53 = arith.constant 0 : index
    %137 = vector.load %arg4[%c1360, %c0_53] : memref<2384x128xbf16, #tpu.memory_space<vmem>>, vector<1x64xbf16>
    %138 = arith.extf %137 : vector<1x64xbf16> to vector<1x64xf32>
    %cst_54 = arith.constant dense<0.000000e+00> : vector<32x64xf32>
    %139 = tpu.matmul %134, %136, %cst_54 {dimension_numbers = #tpu.dot_dimension_numbers<[1], [0], [0], [1], [0, 0, 1, 1], [], []>} : vector<32x32xf32>, vector<32x64xf32>, vector<32x64xf32> -> vector<32x64xf32>
    %140 = vector.broadcast %138 : vector<1x64xf32> to vector<32x64xf32>
    %141 = arith.addf %139, %140 : vector<32x64xf32>
    %cst_55 = arith.constant 0.000000e+00 : f32
    %142 = vector.broadcast %cst_55 : f32 to vector<32x64xf32>
    %143 = arith.maximumf %141, %142 : vector<32x64xf32>
    %c1376 = arith.constant 1376 : index
    %c0_56 = arith.constant 0 : index
    %144 = vector.load %arg4[%c1376, %c0_56] : memref<2384x128xbf16, #tpu.memory_space<vmem>>, vector<64x32xbf16>
    %145 = arith.extf %144 : vector<64x32xbf16> to vector<64x32xf32>
    %c1440 = arith.constant 1440 : index
    %c0_57 = arith.constant 0 : index
    %146 = vector.load %arg4[%c1440, %c0_57] : memref<2384x128xbf16, #tpu.memory_space<vmem>>, vector<1x32xbf16>
    %147 = arith.extf %146 : vector<1x32xbf16> to vector<1x32xf32>
    %cst_58 = arith.constant dense<0.000000e+00> : vector<32x32xf32>
    %148 = tpu.matmul %143, %145, %cst_58 {dimension_numbers = #tpu.dot_dimension_numbers<[1], [0], [0], [1], [0, 0, 1, 1], [], []>} : vector<32x64xf32>, vector<64x32xf32>, vector<32x32xf32> -> vector<32x32xf32>
    %149 = vector.broadcast %147 : vector<1x32xf32> to vector<32x32xf32>
    %150 = arith.addf %148, %149 : vector<32x32xf32>
    %151 = arith.addf %134, %150 : vector<32x32xf32>
    %c1296_59 = arith.constant 1296 : index
    %c0_60 = arith.constant 0 : index
    %152 = vector.load %arg4[%c1296_59, %c0_60] : memref<2384x128xbf16, #tpu.memory_space<vmem>>, vector<1x32xbf16>
    %153 = arith.extf %152 : vector<1x32xbf16> to vector<1x32xf32>
    %c1312_61 = arith.constant 1312 : index
    %c0_62 = arith.constant 0 : index
    %154 = vector.load %arg4[%c1312_61, %c0_62] : memref<2384x128xbf16, #tpu.memory_space<vmem>>, vector<1x32xbf16>
    %155 = arith.extf %154 : vector<1x32xbf16> to vector<1x32xf32>
    %cst_63 = arith.constant dense<0.000000e+00> : vector<32xf32>
    %156 = vector.multi_reduction <add>, %151, %cst_63 [1] : vector<32x32xf32> to vector<32xf32>
    %157 = vector.shape_cast %156 : vector<32xf32> to vector<32x1xf32>
    %cst_64 = arith.constant 3.200000e+01 : f32
    %158 = vector.broadcast %cst_64 : f32 to vector<32x1xf32>
    %159 = arith.divf %157, %158 : vector<32x1xf32>
    %160 = vector.broadcast %159 : vector<32x1xf32> to vector<32x32xf32>
    %161 = arith.subf %151, %160 : vector<32x32xf32>
    %162 = vector.broadcast %159 : vector<32x1xf32> to vector<32x32xf32>
    %163 = arith.subf %151, %162 : vector<32x32xf32>
    %164 = arith.mulf %161, %163 : vector<32x32xf32>
    %cst_65 = arith.constant dense<0.000000e+00> : vector<32xf32>
    %165 = vector.multi_reduction <add>, %164, %cst_65 [1] : vector<32x32xf32> to vector<32xf32>
    %166 = vector.shape_cast %165 : vector<32xf32> to vector<32x1xf32>
    %cst_66 = arith.constant 3.200000e+01 : f32
    %167 = vector.broadcast %cst_66 : f32 to vector<32x1xf32>
    %168 = arith.divf %166, %167 : vector<32x1xf32>
    %169 = vector.broadcast %159 : vector<32x1xf32> to vector<32x32xf32>
    %170 = arith.subf %151, %169 : vector<32x32xf32>
    %cst_67 = arith.constant 9.99999974E-6 : f32
    %171 = vector.broadcast %cst_67 : f32 to vector<32x1xf32>
    %172 = arith.addf %168, %171 : vector<32x1xf32>
    %173 = math.rsqrt %172 : vector<32x1xf32>
    %174 = vector.broadcast %173 : vector<32x1xf32> to vector<32x32xf32>
    %175 = arith.mulf %170, %174 : vector<32x32xf32>
    %176 = vector.broadcast %153 : vector<1x32xf32> to vector<32x32xf32>
    %177 = arith.mulf %175, %176 : vector<32x32xf32>
    %178 = vector.broadcast %155 : vector<1x32xf32> to vector<32x32xf32>
    %179 = arith.addf %177, %178 : vector<32x32xf32>
    %180 = vector.extract_strided_slice %179 {offsets = [0, 0], sizes = [8, 32], strides = [1, 1]} : vector<32x32xf32> to vector<8x32xf32>
    %181 = vector.extract_strided_slice %179 {offsets = [8, 0], sizes = [8, 32], strides = [1, 1]} : vector<32x32xf32> to vector<8x32xf32>
    %182 = arith.addf %180, %181 : vector<8x32xf32>
    %183 = vector.extract_strided_slice %179 {offsets = [16, 0], sizes = [8, 32], strides = [1, 1]} : vector<32x32xf32> to vector<8x32xf32>
    %184 = arith.addf %182, %183 : vector<8x32xf32>
    %185 = vector.extract_strided_slice %179 {offsets = [24, 0], sizes = [8, 32], strides = [1, 1]} : vector<32x32xf32> to vector<8x32xf32>
    %186 = arith.addf %184, %185 : vector<8x32xf32>
    %cst_68 = arith.constant 2.500000e-01 : f32
    %187 = vector.broadcast %cst_68 : f32 to vector<8x32xf32>
    %188 = arith.mulf %186, %187 : vector<8x32xf32>
    %c1456 = arith.constant 1456 : index
    %c0_69 = arith.constant 0 : index
    %189 = vector.load %arg4[%c1456, %c0_69] : memref<2384x128xbf16, #tpu.memory_space<vmem>>, vector<1x32xbf16>
    %190 = arith.extf %189 : vector<1x32xbf16> to vector<1x32xf32>
    %191 = vector.broadcast %190 : vector<1x32xf32> to vector<8x32xf32>
    %192 = arith.addf %188, %191 : vector<8x32xf32>
    %c1728 = arith.constant 1728 : index
    %c0_70 = arith.constant 0 : index
    %193 = vector.load %arg4[%c1728, %c0_70] : memref<2384x128xbf16, #tpu.memory_space<vmem>>, vector<32x32xbf16>
    %194 = arith.extf %193 : vector<32x32xbf16> to vector<32x32xf32>
    %c1760 = arith.constant 1760 : index
    %c0_71 = arith.constant 0 : index
    %195 = vector.load %arg4[%c1760, %c0_71] : memref<2384x128xbf16, #tpu.memory_space<vmem>>, vector<1x32xbf16>
    %196 = arith.extf %195 : vector<1x32xbf16> to vector<1x32xf32>
    %cst_72 = arith.constant dense<0.000000e+00> : vector<8x32xf32>
    %197 = tpu.matmul %192, %194, %cst_72 {dimension_numbers = #tpu.dot_dimension_numbers<[1], [0], [0], [1], [0, 0, 1, 1], [], []>} : vector<8x32xf32>, vector<32x32xf32>, vector<8x32xf32> -> vector<8x32xf32>
    %198 = vector.broadcast %196 : vector<1x32xf32> to vector<8x32xf32>
    %199 = arith.addf %197, %198 : vector<8x32xf32>
    %200 = arith.addf %192, %199 : vector<8x32xf32>
    %c1776 = arith.constant 1776 : index
    %c0_73 = arith.constant 0 : index
    %201 = vector.load %arg4[%c1776, %c0_73] : memref<2384x128xbf16, #tpu.memory_space<vmem>>, vector<1x32xbf16>
    %202 = arith.extf %201 : vector<1x32xbf16> to vector<1x32xf32>
    %c1792 = arith.constant 1792 : index
    %c0_74 = arith.constant 0 : index
    %203 = vector.load %arg4[%c1792, %c0_74] : memref<2384x128xbf16, #tpu.memory_space<vmem>>, vector<1x32xbf16>
    %204 = arith.extf %203 : vector<1x32xbf16> to vector<1x32xf32>
    %cst_75 = arith.constant dense<0.000000e+00> : vector<8xf32>
    %205 = vector.multi_reduction <add>, %200, %cst_75 [1] : vector<8x32xf32> to vector<8xf32>
    %206 = vector.shape_cast %205 : vector<8xf32> to vector<8x1xf32>
    %cst_76 = arith.constant 3.200000e+01 : f32
    %207 = vector.broadcast %cst_76 : f32 to vector<8x1xf32>
    %208 = arith.divf %206, %207 : vector<8x1xf32>
    %209 = vector.broadcast %208 : vector<8x1xf32> to vector<8x32xf32>
    %210 = arith.subf %200, %209 : vector<8x32xf32>
    %211 = vector.broadcast %208 : vector<8x1xf32> to vector<8x32xf32>
    %212 = arith.subf %200, %211 : vector<8x32xf32>
    %213 = arith.mulf %210, %212 : vector<8x32xf32>
    %cst_77 = arith.constant dense<0.000000e+00> : vector<8xf32>
    %214 = vector.multi_reduction <add>, %213, %cst_77 [1] : vector<8x32xf32> to vector<8xf32>
    %215 = vector.shape_cast %214 : vector<8xf32> to vector<8x1xf32>
    %cst_78 = arith.constant 3.200000e+01 : f32
    %216 = vector.broadcast %cst_78 : f32 to vector<8x1xf32>
    %217 = arith.divf %215, %216 : vector<8x1xf32>
    %218 = vector.broadcast %208 : vector<8x1xf32> to vector<8x32xf32>
    %219 = arith.subf %200, %218 : vector<8x32xf32>
    %cst_79 = arith.constant 9.99999974E-6 : f32
    %220 = vector.broadcast %cst_79 : f32 to vector<8x1xf32>
    %221 = arith.addf %217, %220 : vector<8x1xf32>
    %222 = math.rsqrt %221 : vector<8x1xf32>
    %223 = vector.broadcast %222 : vector<8x1xf32> to vector<8x32xf32>
    %224 = arith.mulf %219, %223 : vector<8x32xf32>
    %225 = vector.broadcast %202 : vector<1x32xf32> to vector<8x32xf32>
    %226 = arith.mulf %224, %225 : vector<8x32xf32>
    %227 = vector.broadcast %204 : vector<1x32xf32> to vector<8x32xf32>
    %228 = arith.addf %226, %227 : vector<8x32xf32>
    %c1808 = arith.constant 1808 : index
    %c0_80 = arith.constant 0 : index
    %229 = vector.load %arg4[%c1808, %c0_80] : memref<2384x128xbf16, #tpu.memory_space<vmem>>, vector<32x64xbf16>
    %230 = arith.extf %229 : vector<32x64xbf16> to vector<32x64xf32>
    %c1840 = arith.constant 1840 : index
    %c0_81 = arith.constant 0 : index
    %231 = vector.load %arg4[%c1840, %c0_81] : memref<2384x128xbf16, #tpu.memory_space<vmem>>, vector<1x64xbf16>
    %232 = arith.extf %231 : vector<1x64xbf16> to vector<1x64xf32>
    %cst_82 = arith.constant dense<0.000000e+00> : vector<8x64xf32>
    %233 = tpu.matmul %228, %230, %cst_82 {dimension_numbers = #tpu.dot_dimension_numbers<[1], [0], [0], [1], [0, 0, 1, 1], [], []>} : vector<8x32xf32>, vector<32x64xf32>, vector<8x64xf32> -> vector<8x64xf32>
    %234 = vector.broadcast %232 : vector<1x64xf32> to vector<8x64xf32>
    %235 = arith.addf %233, %234 : vector<8x64xf32>
    %cst_83 = arith.constant 0.000000e+00 : f32
    %236 = vector.broadcast %cst_83 : f32 to vector<8x64xf32>
    %237 = arith.maximumf %235, %236 : vector<8x64xf32>
    %c1856 = arith.constant 1856 : index
    %c0_84 = arith.constant 0 : index
    %238 = vector.load %arg4[%c1856, %c0_84] : memref<2384x128xbf16, #tpu.memory_space<vmem>>, vector<64x32xbf16>
    %239 = arith.extf %238 : vector<64x32xbf16> to vector<64x32xf32>
    %c1920 = arith.constant 1920 : index
    %c0_85 = arith.constant 0 : index
    %240 = vector.load %arg4[%c1920, %c0_85] : memref<2384x128xbf16, #tpu.memory_space<vmem>>, vector<1x32xbf16>
    %241 = arith.extf %240 : vector<1x32xbf16> to vector<1x32xf32>
    %cst_86 = arith.constant dense<0.000000e+00> : vector<8x32xf32>
    %242 = tpu.matmul %237, %239, %cst_86 {dimension_numbers = #tpu.dot_dimension_numbers<[1], [0], [0], [1], [0, 0, 1, 1], [], []>} : vector<8x64xf32>, vector<64x32xf32>, vector<8x32xf32> -> vector<8x32xf32>
    %243 = vector.broadcast %241 : vector<1x32xf32> to vector<8x32xf32>
    %244 = arith.addf %242, %243 : vector<8x32xf32>
    %245 = arith.addf %228, %244 : vector<8x32xf32>
    %c1936 = arith.constant 1936 : index
    %c0_87 = arith.constant 0 : index
    %246 = vector.load %arg4[%c1936, %c0_87] : memref<2384x128xbf16, #tpu.memory_space<vmem>>, vector<1x32xbf16>
    %247 = arith.extf %246 : vector<1x32xbf16> to vector<1x32xf32>
    %c1952 = arith.constant 1952 : index
    %c0_88 = arith.constant 0 : index
    %248 = vector.load %arg4[%c1952, %c0_88] : memref<2384x128xbf16, #tpu.memory_space<vmem>>, vector<1x32xbf16>
    %249 = arith.extf %248 : vector<1x32xbf16> to vector<1x32xf32>
    %cst_89 = arith.constant dense<0.000000e+00> : vector<8xf32>
    %250 = vector.multi_reduction <add>, %245, %cst_89 [1] : vector<8x32xf32> to vector<8xf32>
    %251 = vector.shape_cast %250 : vector<8xf32> to vector<8x1xf32>
    %cst_90 = arith.constant 3.200000e+01 : f32
    %252 = vector.broadcast %cst_90 : f32 to vector<8x1xf32>
    %253 = arith.divf %251, %252 : vector<8x1xf32>
    %254 = vector.broadcast %253 : vector<8x1xf32> to vector<8x32xf32>
    %255 = arith.subf %245, %254 : vector<8x32xf32>
    %256 = vector.broadcast %253 : vector<8x1xf32> to vector<8x32xf32>
    %257 = arith.subf %245, %256 : vector<8x32xf32>
    %258 = arith.mulf %255, %257 : vector<8x32xf32>
    %cst_91 = arith.constant dense<0.000000e+00> : vector<8xf32>
    %259 = vector.multi_reduction <add>, %258, %cst_91 [1] : vector<8x32xf32> to vector<8xf32>
    %260 = vector.shape_cast %259 : vector<8xf32> to vector<8x1xf32>
    %cst_92 = arith.constant 3.200000e+01 : f32
    %261 = vector.broadcast %cst_92 : f32 to vector<8x1xf32>
    %262 = arith.divf %260, %261 : vector<8x1xf32>
    %263 = vector.broadcast %253 : vector<8x1xf32> to vector<8x32xf32>
    %264 = arith.subf %245, %263 : vector<8x32xf32>
    %cst_93 = arith.constant 9.99999974E-6 : f32
    %265 = vector.broadcast %cst_93 : f32 to vector<8x1xf32>
    %266 = arith.addf %262, %265 : vector<8x1xf32>
    %267 = math.rsqrt %266 : vector<8x1xf32>
    %268 = vector.broadcast %267 : vector<8x1xf32> to vector<8x32xf32>
    %269 = arith.mulf %264, %268 : vector<8x32xf32>
    %270 = vector.broadcast %247 : vector<1x32xf32> to vector<8x32xf32>
    %271 = arith.mulf %269, %270 : vector<8x32xf32>
    %272 = vector.broadcast %249 : vector<1x32xf32> to vector<8x32xf32>
    %273 = arith.addf %271, %272 : vector<8x32xf32>
    %c1968 = arith.constant 1968 : index
    %c0_94 = arith.constant 0 : index
    %274 = vector.load %arg4[%c1968, %c0_94] : memref<2384x128xbf16, #tpu.memory_space<vmem>>, vector<32x32xbf16>
    %275 = arith.extf %274 : vector<32x32xbf16> to vector<32x32xf32>
    %c2000 = arith.constant 2000 : index
    %c0_95 = arith.constant 0 : index
    %276 = vector.load %arg4[%c2000, %c0_95] : memref<2384x128xbf16, #tpu.memory_space<vmem>>, vector<1x32xbf16>
    %277 = arith.extf %276 : vector<1x32xbf16> to vector<1x32xf32>
    %cst_96 = arith.constant dense<0.000000e+00> : vector<8x32xf32>
    %278 = tpu.matmul %273, %275, %cst_96 {dimension_numbers = #tpu.dot_dimension_numbers<[1], [0], [0], [1], [0, 0, 1, 1], [], []>} : vector<8x32xf32>, vector<32x32xf32>, vector<8x32xf32> -> vector<8x32xf32>
    %279 = vector.broadcast %277 : vector<1x32xf32> to vector<8x32xf32>
    %280 = arith.addf %278, %279 : vector<8x32xf32>
    %281 = arith.addf %273, %280 : vector<8x32xf32>
    %c2016 = arith.constant 2016 : index
    %c0_97 = arith.constant 0 : index
    %282 = vector.load %arg4[%c2016, %c0_97] : memref<2384x128xbf16, #tpu.memory_space<vmem>>, vector<1x32xbf16>
    %283 = arith.extf %282 : vector<1x32xbf16> to vector<1x32xf32>
    %c2032 = arith.constant 2032 : index
    %c0_98 = arith.constant 0 : index
    %284 = vector.load %arg4[%c2032, %c0_98] : memref<2384x128xbf16, #tpu.memory_space<vmem>>, vector<1x32xbf16>
    %285 = arith.extf %284 : vector<1x32xbf16> to vector<1x32xf32>
    %cst_99 = arith.constant dense<0.000000e+00> : vector<8xf32>
    %286 = vector.multi_reduction <add>, %281, %cst_99 [1] : vector<8x32xf32> to vector<8xf32>
    %287 = vector.shape_cast %286 : vector<8xf32> to vector<8x1xf32>
    %cst_100 = arith.constant 3.200000e+01 : f32
    %288 = vector.broadcast %cst_100 : f32 to vector<8x1xf32>
    %289 = arith.divf %287, %288 : vector<8x1xf32>
    %290 = vector.broadcast %289 : vector<8x1xf32> to vector<8x32xf32>
    %291 = arith.subf %281, %290 : vector<8x32xf32>
    %292 = vector.broadcast %289 : vector<8x1xf32> to vector<8x32xf32>
    %293 = arith.subf %281, %292 : vector<8x32xf32>
    %294 = arith.mulf %291, %293 : vector<8x32xf32>
    %cst_101 = arith.constant dense<0.000000e+00> : vector<8xf32>
    %295 = vector.multi_reduction <add>, %294, %cst_101 [1] : vector<8x32xf32> to vector<8xf32>
    %296 = vector.shape_cast %295 : vector<8xf32> to vector<8x1xf32>
    %cst_102 = arith.constant 3.200000e+01 : f32
    %297 = vector.broadcast %cst_102 : f32 to vector<8x1xf32>
    %298 = arith.divf %296, %297 : vector<8x1xf32>
    %299 = vector.broadcast %289 : vector<8x1xf32> to vector<8x32xf32>
    %300 = arith.subf %281, %299 : vector<8x32xf32>
    %cst_103 = arith.constant 9.99999974E-6 : f32
    %301 = vector.broadcast %cst_103 : f32 to vector<8x1xf32>
    %302 = arith.addf %298, %301 : vector<8x1xf32>
    %303 = math.rsqrt %302 : vector<8x1xf32>
    %304 = vector.broadcast %303 : vector<8x1xf32> to vector<8x32xf32>
    %305 = arith.mulf %300, %304 : vector<8x32xf32>
    %306 = vector.broadcast %283 : vector<1x32xf32> to vector<8x32xf32>
    %307 = arith.mulf %305, %306 : vector<8x32xf32>
    %308 = vector.broadcast %285 : vector<1x32xf32> to vector<8x32xf32>
    %309 = arith.addf %307, %308 : vector<8x32xf32>
    %c2048 = arith.constant 2048 : index
    %c0_104 = arith.constant 0 : index
    %310 = vector.load %arg4[%c2048, %c0_104] : memref<2384x128xbf16, #tpu.memory_space<vmem>>, vector<32x64xbf16>
    %311 = arith.extf %310 : vector<32x64xbf16> to vector<32x64xf32>
    %c2080 = arith.constant 2080 : index
    %c0_105 = arith.constant 0 : index
    %312 = vector.load %arg4[%c2080, %c0_105] : memref<2384x128xbf16, #tpu.memory_space<vmem>>, vector<1x64xbf16>
    %313 = arith.extf %312 : vector<1x64xbf16> to vector<1x64xf32>
    %cst_106 = arith.constant dense<0.000000e+00> : vector<8x64xf32>
    %314 = tpu.matmul %309, %311, %cst_106 {dimension_numbers = #tpu.dot_dimension_numbers<[1], [0], [0], [1], [0, 0, 1, 1], [], []>} : vector<8x32xf32>, vector<32x64xf32>, vector<8x64xf32> -> vector<8x64xf32>
    %315 = vector.broadcast %313 : vector<1x64xf32> to vector<8x64xf32>
    %316 = arith.addf %314, %315 : vector<8x64xf32>
    %cst_107 = arith.constant 0.000000e+00 : f32
    %317 = vector.broadcast %cst_107 : f32 to vector<8x64xf32>
    %318 = arith.maximumf %316, %317 : vector<8x64xf32>
    %c2096 = arith.constant 2096 : index
    %c0_108 = arith.constant 0 : index
    %319 = vector.load %arg4[%c2096, %c0_108] : memref<2384x128xbf16, #tpu.memory_space<vmem>>, vector<64x32xbf16>
    %320 = arith.extf %319 : vector<64x32xbf16> to vector<64x32xf32>
    %c2160 = arith.constant 2160 : index
    %c0_109 = arith.constant 0 : index
    %321 = vector.load %arg4[%c2160, %c0_109] : memref<2384x128xbf16, #tpu.memory_space<vmem>>, vector<1x32xbf16>
    %322 = arith.extf %321 : vector<1x32xbf16> to vector<1x32xf32>
    %cst_110 = arith.constant dense<0.000000e+00> : vector<8x32xf32>
    %323 = tpu.matmul %318, %320, %cst_110 {dimension_numbers = #tpu.dot_dimension_numbers<[1], [0], [0], [1], [0, 0, 1, 1], [], []>} : vector<8x64xf32>, vector<64x32xf32>, vector<8x32xf32> -> vector<8x32xf32>
    %324 = vector.broadcast %322 : vector<1x32xf32> to vector<8x32xf32>
    %325 = arith.addf %323, %324 : vector<8x32xf32>
    %326 = arith.addf %309, %325 : vector<8x32xf32>
    %c2176 = arith.constant 2176 : index
    %c0_111 = arith.constant 0 : index
    %327 = vector.load %arg4[%c2176, %c0_111] : memref<2384x128xbf16, #tpu.memory_space<vmem>>, vector<1x32xbf16>
    %328 = arith.extf %327 : vector<1x32xbf16> to vector<1x32xf32>
    %c2192 = arith.constant 2192 : index
    %c0_112 = arith.constant 0 : index
    %329 = vector.load %arg4[%c2192, %c0_112] : memref<2384x128xbf16, #tpu.memory_space<vmem>>, vector<1x32xbf16>
    %330 = arith.extf %329 : vector<1x32xbf16> to vector<1x32xf32>
    %cst_113 = arith.constant dense<0.000000e+00> : vector<8xf32>
    %331 = vector.multi_reduction <add>, %326, %cst_113 [1] : vector<8x32xf32> to vector<8xf32>
    %332 = vector.shape_cast %331 : vector<8xf32> to vector<8x1xf32>
    %cst_114 = arith.constant 3.200000e+01 : f32
    %333 = vector.broadcast %cst_114 : f32 to vector<8x1xf32>
    %334 = arith.divf %332, %333 : vector<8x1xf32>
    %335 = vector.broadcast %334 : vector<8x1xf32> to vector<8x32xf32>
    %336 = arith.subf %326, %335 : vector<8x32xf32>
    %337 = vector.broadcast %334 : vector<8x1xf32> to vector<8x32xf32>
    %338 = arith.subf %326, %337 : vector<8x32xf32>
    %339 = arith.mulf %336, %338 : vector<8x32xf32>
    %cst_115 = arith.constant dense<0.000000e+00> : vector<8xf32>
    %340 = vector.multi_reduction <add>, %339, %cst_115 [1] : vector<8x32xf32> to vector<8xf32>
    %341 = vector.shape_cast %340 : vector<8xf32> to vector<8x1xf32>
    %cst_116 = arith.constant 3.200000e+01 : f32
    %342 = vector.broadcast %cst_116 : f32 to vector<8x1xf32>
    %343 = arith.divf %341, %342 : vector<8x1xf32>
    %344 = vector.broadcast %334 : vector<8x1xf32> to vector<8x32xf32>
    %345 = arith.subf %326, %344 : vector<8x32xf32>
    %cst_117 = arith.constant 9.99999974E-6 : f32
    %346 = vector.broadcast %cst_117 : f32 to vector<8x1xf32>
    %347 = arith.addf %343, %346 : vector<8x1xf32>
    %348 = math.rsqrt %347 : vector<8x1xf32>
    %349 = vector.broadcast %348 : vector<8x1xf32> to vector<8x32xf32>
    %350 = arith.mulf %345, %349 : vector<8x32xf32>
    %351 = vector.broadcast %328 : vector<1x32xf32> to vector<8x32xf32>
    %352 = arith.mulf %350, %351 : vector<8x32xf32>
    %353 = vector.broadcast %330 : vector<1x32xf32> to vector<8x32xf32>
    %354 = arith.addf %352, %353 : vector<8x32xf32>
    %c2208 = arith.constant 2208 : index
    %c0_118 = arith.constant 0 : index
    %355 = vector.load %arg4[%c2208, %c0_118] : memref<2384x128xbf16, #tpu.memory_space<vmem>>, vector<32x64xbf16>
    %356 = arith.extf %355 : vector<32x64xbf16> to vector<32x64xf32>
    %c2240 = arith.constant 2240 : index
    %c0_119 = arith.constant 0 : index
    %357 = vector.load %arg4[%c2240, %c0_119] : memref<2384x128xbf16, #tpu.memory_space<vmem>>, vector<1x64xbf16>
    %358 = arith.extf %357 : vector<1x64xbf16> to vector<1x64xf32>
    %cst_120 = arith.constant dense<0.000000e+00> : vector<8x64xf32>
    %359 = tpu.matmul %354, %356, %cst_120 {dimension_numbers = #tpu.dot_dimension_numbers<[1], [0], [0], [1], [0, 0, 1, 1], [], []>} : vector<8x32xf32>, vector<32x64xf32>, vector<8x64xf32> -> vector<8x64xf32>
    %360 = vector.broadcast %358 : vector<1x64xf32> to vector<8x64xf32>
    %361 = arith.addf %359, %360 : vector<8x64xf32>
    %cst_121 = arith.constant 0.000000e+00 : f32
    %362 = vector.broadcast %cst_121 : f32 to vector<8x64xf32>
    %363 = arith.maximumf %361, %362 : vector<8x64xf32>
    %c2256 = arith.constant 2256 : index
    %c0_122 = arith.constant 0 : index
    %364 = vector.load %arg4[%c2256, %c0_122] : memref<2384x128xbf16, #tpu.memory_space<vmem>>, vector<64x32xbf16>
    %365 = arith.extf %364 : vector<64x32xbf16> to vector<64x32xf32>
    %c2320 = arith.constant 2320 : index
    %c0_123 = arith.constant 0 : index
    %366 = vector.load %arg4[%c2320, %c0_123] : memref<2384x128xbf16, #tpu.memory_space<vmem>>, vector<1x32xbf16>
    %367 = arith.extf %366 : vector<1x32xbf16> to vector<1x32xf32>
    %cst_124 = arith.constant dense<0.000000e+00> : vector<8x32xf32>
    %368 = tpu.matmul %363, %365, %cst_124 {dimension_numbers = #tpu.dot_dimension_numbers<[1], [0], [0], [1], [0, 0, 1, 1], [], []>} : vector<8x64xf32>, vector<64x32xf32>, vector<8x32xf32> -> vector<8x32xf32>
    %369 = vector.broadcast %367 : vector<1x32xf32> to vector<8x32xf32>
    %370 = arith.addf %368, %369 : vector<8x32xf32>
    %cst_125 = arith.constant 0.000000e+00 : f32
    %371 = vector.broadcast %cst_125 : f32 to vector<8x32xf32>
    %372 = arith.maximumf %370, %371 : vector<8x32xf32>
    %c2336 = arith.constant 2336 : index
    %c0_126 = arith.constant 0 : index
    %373 = vector.load %arg4[%c2336, %c0_126] : memref<2384x128xbf16, #tpu.memory_space<vmem>>, vector<32x128xbf16>
    %374 = arith.extf %373 : vector<32x128xbf16> to vector<32x128xf32>
    %c2368 = arith.constant 2368 : index
    %c0_127 = arith.constant 0 : index
    %375 = vector.load %arg4[%c2368, %c0_127] : memref<2384x128xbf16, #tpu.memory_space<vmem>>, vector<1x128xbf16>
    %376 = arith.extf %375 : vector<1x128xbf16> to vector<1x128xf32>
    %cst_128 = arith.constant dense<0.000000e+00> : vector<8x128xf32>
    %377 = tpu.matmul %372, %374, %cst_128 {dimension_numbers = #tpu.dot_dimension_numbers<[1], [0], [0], [1], [0, 0, 1, 1], [], []>} : vector<8x32xf32>, vector<32x128xf32>, vector<8x128xf32> -> vector<8x128xf32>
    %378 = vector.broadcast %376 : vector<1x128xf32> to vector<8x128xf32>
    %379 = arith.addf %377, %378 : vector<8x128xf32>
    %c0_129 = arith.constant 0 : index
    %c0_130 = arith.constant 0 : index
    %380 = vector.load %arg5[%c0_129, %c0_130] : memref<8x128xf32, #tpu.memory_space<vmem>>, vector<8x128xf32>
    tpu.vector_store %arg5[%c0_129, %c0_130], %379 {strides = array<i32>} : memref<8x128xf32, #tpu.memory_space<vmem>>, vector<8x128xf32>,
    return
  }
}

</mosaic_0001>

<bundles_post_ra>
// kernel: tpu_custom_call.1
= control target key start
LH: loop header
LB: loop body
LE: loop exit
PB: predicated region body
PF: predicated region fallthrough
CT: control target
= control target key end

     0   :  { %10 = vsyncpa [#allocation3], 0  ;;  %s6035_s0 = inlined_call_operand.hbm [shape: f32[8,32], index: 0, kind: input, shape index: {}]   ;;  %s6036_s1 = inlined_call_operand.hbm [shape: f32[8,32], index: 1, kind: input, shape index: {}]   ;;  %s6037_s2 = inlined_call_operand.hbm [shape: f32[8,48], index: 2, kind: input, shape index: {}]   ;;  %s6038_s3 = inlined_call_operand.hbm [shape: f32[8,768], index: 3, kind: input, shape index: {}]   ;;  %s6039_s4 = inlined_call_operand.hbm [shape: bf16[2384,128], index: 4, kind: input, shape index: {}]   ;;  %s6040_s5 = inlined_call_operand.hbm [shape: f32[8,128], index: 5, kind: output, shape index: {}]  }
   0x1   :  { %11 = vsyncpa [#allocation6], 0 }
   0x2   :  { %12 = vsyncpa [#allocation9], 0 }
   0x3   :  { %13 = vsyncpa [#allocation4], 0  ;;  %s5244_s18 = smov [#allocation5]   ;;  %s5245_s20 = smov [#allocation8]  }
   0x4   :  { %s30_s19 = sshll.u32 %s5244_s18, 4  ;;  %s50_s21 = sshll.u32 %s5245_s20, 4  ;;  %s31_s19 = int_to_ptr.vmem [resolvable:$true] %s30_s19  ;;  %s51_s21 = int_to_ptr.vmem [resolvable:$true] %s50_s21 }
   0x5   :  { %s5124_s22 = scalar_lea.vmem %s31_s19, 128  ;;  %p5129_p1 = scmp.lt.s32.totalorder %s31_s19, %s31_s19 }
   0x6   :  { %p5125_p0 = scmp.ne.s32.totalorder %s31_s19, %s5124_s22  ;;  %p5130_p2 = scmp.lt.s32.totalorder %s5124_s22, %s5124_s22 }
   0x8   :  { %p5131_p3 = por %p5130_p2, %p5129_p1 }
   0xa   :  { %p5132_p4 = pnand %p5131_p3, %p5125_p0 }
   0xc   :  { %5135 = shalt.err (!%p5132_p4)
}
   0xd   :  { %33 = dma.hbm_to_vmem [thread:$0]  %s6036_s1, 128, %s31_s19, [#allocation6]  }
   0xe   :  { %s5144_s25 = scalar_lea.vmem %s51_s21, 768  ;;  %p5149_p6 = scmp.lt.s32.totalorder %s51_s21, %s51_s21 }
   0xf   :  { %p5145_p5 = scmp.ne.s32.totalorder %s51_s21, %s5144_s25  ;;  %p5150_p7 = scmp.lt.s32.totalorder %s5144_s25, %s5144_s25 }
  0x11   :  { %p5151_p8 = por %p5150_p7, %p5149_p6 }
  0x13   :  { %p5152_p9 = pnand %p5151_p8, %p5145_p5 }
  0x15   :  { %5155 = shalt.err (!%p5152_p9)
}
  0x16   :  { %53 = dma.hbm_to_vmem [thread:$0]  %s6038_s3, 768, %s51_s21, [#allocation9]  }
  0x17   :  { %s5246_s28 = smov [#allocation2]   ;;  %s5247_s30 = smov [#allocation7]  }
  0x18   :  { %s20_s29 = sshll.u32 %s5246_s28, 4  ;;  %s40_s6 = sshll.u32 %s5247_s30, 4  ;;  %s21_s29 = int_to_ptr.vmem [resolvable:$true] %s20_s29  ;;  %s41_s6 = int_to_ptr.vmem [resolvable:$true] %s40_s6 }
  0x19   :  { %s5164_s7 = scalar_lea.vmem %s21_s29, 128  ;;  %p5169_p11 = scmp.lt.s32.totalorder %s21_s29, %s21_s29 }
  0x1a   :  { %p5165_p10 = scmp.ne.s32.totalorder %s21_s29, %s5164_s7  ;;  %p5170_p12 = scmp.lt.s32.totalorder %s5164_s7, %s5164_s7 }
  0x1c   :  { %p5171_p13 = por %p5170_p12, %p5169_p11 }
  0x1e   :  { %p5172_p0 = pnand %p5171_p13, %p5165_p10 }
  0x20   :  { %5175 = shalt.err (!%p5172_p0)
}
  0x21   :  { %23 = dma.hbm_to_vmem [thread:$0]  %s6035_s0, 128, %s21_s29, [#allocation3]  }
  0x22   :  { %s5184_s9 = scalar_lea.vmem %s41_s6, 128  ;;  %p5189_p2 = scmp.lt.s32.totalorder %s41_s6, %s41_s6 }
  0x23   :  { %p5185_p1 = scmp.ne.s32.totalorder %s41_s6, %s5184_s9  ;;  %p5190_p3 = scmp.lt.s32.totalorder %s5184_s9, %s5184_s9 }
  0x25   :  { %p5191_p4 = por %p5190_p3, %p5189_p2 }
  0x27   :  { %p5192_p5 = pnand %p5191_p4, %p5185_p1 }
  0x29   :  { %5195 = shalt.err (!%p5192_p5)
}
  0x2a   :  { %43 = dma.hbm_to_vmem [thread:$0]  %s6037_s2, 128, %s41_s6, [#allocation6]  }
  0x2b   :  { %s5248_s11 = smov [#allocation10]  }
  0x2c   :  { %s59_s12 = sshll.u32 %s5248_s11, 4  ;;  %s60_s12 = int_to_ptr.vmem [resolvable:$true] %s59_s12 }
  0x2d   :  { %s5204_s13 = scalar_lea.vmem %s60_s12, 19072  ;;  %p5209_p7 = scmp.lt.s32.totalorder %s60_s12, %s60_s12 }
  0x2e   :  { %p5205_p6 = scmp.ne.s32.totalorder %s60_s12, %s5204_s13  ;;  %p5210_p8 = scmp.lt.s32.totalorder %s5204_s13, %s5204_s13 }
  0x30   :  { %p5211_p9 = por %p5210_p8, %p5209_p7 }
  0x32   :  { %p5212_p10 = pnand %p5211_p9, %p5205_p6 }
  0x34   :  { %5215 = shalt.err (!%p5212_p10)
}
  0x35   :  { %s5249_s0 = smov 64   ;;  %s5250_s14 = smov 4  }
  0x36   :  { %65 = dma.hbm_to_vmem [thread:$0]  %s6039_s4, 19072, %s60_s12, [#allocation9], %s5249_s0, %s5249_s0, %s5250_s14  }
  0x37   :  { %5236 = dma.done.wait [#allocation3], 128  }
  0x38   :  { %5237 = vsyncadd [#allocation3], 4294967168 }
  0x39   :  { %5238 = dma.done.wait [#allocation6], 256  }
  0x3a   :  { %5239 = vsyncadd [#allocation6], 4294967040 }
  0x3b   :  { %5240 = dma.done.wait [#allocation9], 19840  }
  0x3c   :  { %5241 = vsyncadd [#allocation9], 4294947456  ;;  %v5251_v0 = vmov 0.0   ;;  %vm5252_vm0 = vmmov 0   ;;  %v4098_v1 = vld [vmem:[#allocation10 + $0x200] sm:$0xff]   ;;  %v4097_v2 = vld [vmem:[#allocation10 + $0x1f8] sm:$0xff]  }
  0x3d   :  { %4562 = vmatprep.subr.mxu0 %v5251_v0  ;;  %4570 = vmatprep.mubr.msk.f32.mxu0 %vm5252_vm0, %v5251_v0  ;;  %v3635_v3 = vunpack.c.l.bf16 %v4098_v1  ;;  %v3636_v4 = vunpack.c.h.bf16 %v4098_v1  ;;  %v3632_v5 = vunpack.c.h.bf16 %v4097_v2  ;;  %v4103_v6 = vld [vmem:[#allocation10 + $0x198] sm:$0xff]   ;;  %v3631_v7 = vunpack.c.l.bf16 %v4097_v2  ;;  %v4102_v10 = vld [vmem:[#allocation10 + $0x190] sm:$0xff]   ;;  %v4101_v13 = vld [vmem:[#allocation10 + $0x188] sm:$0xff]   ;;  %s5253_s2 = smov [#allocation11]  }
  0x3e   :  { %4573 = vmatprep.subr.mxu1 %v5251_v0  ;;  %4581 = vmatprep.mubr.msk.f32.mxu1 %vm5252_vm0, %v5251_v0  ;;  %v81_v8 = vld [vmem:[#allocation2] sm:$0xff]  ;;  %vm104_vm1 = vcmask 261120   ;;  %v3656_v9 = vunpack.c.h.bf16 %v4103_v6  ;;  %v3655_v11 = vunpack.c.l.bf16 %v4103_v6  ;;  %v3652_v12 = vunpack.c.h.bf16 %v4102_v10  ;;  %v4099_v23 = vld [vmem:[#allocation10 + $0x210] sm:$0xff]   ;;  %v83_v24 = vld [vmem:[#allocation7] sm:$0xff]  ;;  %s3512_s4 = sshll.u32 %s5253_s2, 4  ;;  %s3513_s4 = int_to_ptr.vmem [resolvable:$true] %s3512_s4 }
  0x3f   :  { %4563 = vmatpush3.msra.mxu0 %v3636_v4  ;;  %v3651_v14 = vunpack.c.l.bf16 %v4102_v10  ;;  %v4100_v15 = vld [vmem:[#allocation10 + $0x218] sm:$0xff]   ;;  %v3648_v16 = vunpack.c.h.bf16 %v4101_v13  ;;  %v3647_v19 = vunpack.c.l.bf16 %v4101_v13  ;;  %vm283_vm2 = vcmask 392192   ;;  %v4121_v26 = vld [vmem:[#allocation10 + $0x70] sm:$0xff]   ;;  %v4120_v34 = vld [vmem:[#allocation10 + $0x68] sm:$0xff]   ;;  %s5216_s17 = scalar_lea.vmem %s3513_s4, 128  ;;  %p5221_p12 = scmp.lt.s32.totalorder %s3513_s4, %s3513_s4 }
  0x40   :  { %4564 = vmatprep.subr.mxu0 %v5251_v0  ;;  %v4122_v17 = vld [vmem:[#allocation10 + $0x78] sm:$0xff]   ;;  %v3643_v20 = vunpack.c.l.bf16 %v4100_v15  ;;  %v3644_v21 = vunpack.c.h.bf16 %v4100_v15  ;;  %v4113_v28 = vld [vmem:[#allocation10 + $0x30] sm:$0xff]   ;;  %v3640_v31 = vunpack.c.h.bf16 %v4099_v23  ;;  %v3732_v32 = vunpack.c.h.bf16 %v4121_v26  ;;  %v4112_v37 = vld [vmem:[#allocation10 + $0x28] sm:$0xff]   ;;  %p5217_p11 = scmp.ne.s32.totalorder %s3513_s4, %s5216_s17  ;;  %p5222_p13 = scmp.lt.s32.totalorder %s5216_s17, %s5216_s17 }
  0x41   :  { %4565 = vmatpush3.msra.mxu0 %v3635_v3  ;;  %v4114_v18 = vld [vmem:[#allocation10 + $0x38] sm:$0xff]   ;;  %v3736_v22 = vunpack.c.h.bf16 %v4122_v17  ;;  %v3735_v27 = vunpack.c.l.bf16 %v4122_v17  ;;  %v3700_v33 = vunpack.c.h.bf16 %v4113_v28  ;;  %v3639_v35 = vunpack.c.l.bf16 %v4099_v23  ;;  %v82_v39 = vld [vmem:[#allocation5] sm:$0xff]  ;;  %v4117_v54 = vld [vmem:[#allocation10 + $0x50] sm:$0xff]  }
  0x42   :  { %4566 = vmatprep.subr.mxu0 %v5251_v0  ;;  %v3704_v25 = vunpack.c.h.bf16 %v4114_v18  ;;  %4574 = vmatpush3.msra.mxu1 %v3644_v21  ;;  %v85_v29 = vld [vmem:[#allocation8 + $0x8] sm:$0xff]  ;;  %v3703_v30 = vunpack.c.l.bf16 %v4114_v18  ;;  %v3731_v36 = vunpack.c.l.bf16 %v4121_v26  ;;  %v3699_v38 = vunpack.c.l.bf16 %v4113_v28  ;;  %v4119_v42 = vld [vmem:[#allocation10 + $0x60] sm:$0xff]   ;;  %v4109_v56 = vld [vmem:[#allocation10 + $0x10] sm:$0xff]   ;;  %p5223_p0 = por %p5222_p13, %p5221_p12 }
  0x43   :  { %4567 = vmatpush3.msra.mxu0 %v3632_v5  ;;  %4575 = vmatprep.subr.mxu1 %v5251_v0  ;;  %v3728_v40 = vunpack.c.h.bf16 %v4120_v34  ;;  %v3696_v41 = vunpack.c.h.bf16 %v4112_v37  ;;  %v3727_v43 = vunpack.c.l.bf16 %v4120_v34  ;;  %v4111_v44 = vld [vmem:[#allocation10 + $0x20] sm:$0xff]   ;;  %v3695_v45 = vunpack.c.l.bf16 %v4112_v37  ;;  %v4118_v48 = vld [vmem:[#allocation10 + $0x58] sm:$0xff]   ;;  %v4116_v60 = vld [vmem:[#allocation10 + $0x48] sm:$0xff]  }
  0x44   :  { %4568 = vmatprep.subr.mxu0 %v5251_v0  ;;  %4576 = vmatpush3.msra.mxu1 %v3643_v20  ;;  %v3724_v46 = vunpack.c.h.bf16 %v4119_v42  ;;  %v3692_v47 = vunpack.c.h.bf16 %v4111_v44  ;;  %v3723_v49 = vunpack.c.l.bf16 %v4119_v42  ;;  %v4110_v50 = vld [vmem:[#allocation10 + $0x18] sm:$0xff]   ;;  %v3691_v51 = vunpack.c.l.bf16 %v4111_v44  ;;  %v4108_v62 = vld [vmem:[#allocation10 + $0x8] sm:$0xff]   ;;  %v4115_v3 = vld [vmem:[#allocation10 + $0x40] sm:$0xff]   ;;  %p5224_p1 = pnand %p5223_p0, %p5217_p11 }
  0x45   :  { %4569 = vmatpush3.msra.mxu0 %v3631_v7  ;;  %4577 = vmatprep.subr.mxu1 %v5251_v0  ;;  %v3720_v52 = vunpack.c.h.bf16 %v4118_v48  ;;  %v3688_v53 = vunpack.c.h.bf16 %v4110_v50  ;;  %v3719_v55 = vunpack.c.l.bf16 %v4118_v48  ;;  %v3687_v57 = vunpack.c.l.bf16 %v4110_v50  ;;  %v3674_v5 = vld [vmem:[#allocation10] sm:$0xff]   ;;  %v4145_v18 = vld [vmem:[#allocation10 + $0x130] sm:$0xff]   ;;  %v4150_v34 = vld [vmem:[#allocation10 + $0x158] sm:$0xff]  }
  0x46   :  { %4571 = vmatmul.mubr.msk.f32.vlgmr.msra.gmra.mxu0 %vm104_vm1, %v81_v8  ;;  %4584 = vmatprep.subr.mxu0 %v5251_v0  ;;  %v3716_v58 = vunpack.c.h.bf16 %v4117_v54  ;;  %v3684_v59 = vunpack.c.h.bf16 %v4109_v56  ;;  %v3715_v61 = vunpack.c.l.bf16 %v4117_v54  ;;  %v3683_v63 = vunpack.c.l.bf16 %v4109_v56  ;;  %v4151_v28 = vld [vmem:[#allocation10 + $0x160] sm:$0xff]   ;;  %v4141_v42 = vld [vmem:[#allocation10 + $0x110] sm:$0xff]   ;;  %v4140_v48 = vld [vmem:[#allocation10 + $0x108] sm:$0xff]  }
  0x47   :  { %4585 = vmatpush3.msra.mxu0 %v3656_v9  ;;  %4596 = vmatprep.mubr.msk.f32.mxu0 %vm5252_vm0, %v5251_v0  ;;  %v3712_v1 = vunpack.c.h.bf16 %v4116_v60  ;;  %v3680_v2 = vunpack.c.h.bf16 %v4108_v62  ;;  %v3711_v4 = vunpack.c.l.bf16 %v4116_v60  ;;  %v3679_v6 = vunpack.c.l.bf16 %v4108_v62  ;;  %v4154_v9 = vld [vmem:[#allocation10 + $0x178] sm:$0xff]   ;;  %v4147_v54 = vld [vmem:[#allocation10 + $0x140] sm:$0xff]   ;;  %v4105_v62 = vld [vmem:[#allocation10 + $0x1b0] sm:$0xff]  }
  0x48   :  { %4586 = vmatprep.subr.mxu0 %v5251_v0  ;;  %4578 = vmatpush3.msra.mxu1 %v3640_v31  ;;  %v3708_v7 = vunpack.c.h.bf16 %v4115_v3  ;;  %v3676_v8 = vunpack.c.h.bf16 %v3674_v5  ;;  %v3707_v10 = vunpack.c.l.bf16 %v4115_v3  ;;  %v3864_v13 = vunpack.c.h.bf16 %v4154_v9 }
  0x49   :  { %4587 = vmatpush3.msra.mxu0 %v3655_v11  ;;  %4579 = vmatprep.subr.mxu1 %v5251_v0  ;;  %v4146_v11 = vld [vmem:[#allocation10 + $0x138] sm:$0xff]   ;;  %v3863_v17 = vunpack.c.l.bf16 %v4154_v9  ;;  %v3828_v21 = vunpack.c.h.bf16 %v4145_v18  ;;  %v3811_v50 = vunpack.c.l.bf16 %v4141_v42  ;;  %v3807_v60 = vunpack.c.l.bf16 %v4140_v48 }
  0x4a   :  { %4588 = vmatprep.subr.mxu0 %v5251_v0  ;;  %4580 = vmatpush3.msra.mxu1 %v3639_v35  ;;  %v3832_v15 = vunpack.c.h.bf16 %v4146_v11  ;;  %v3851_v35 = vunpack.c.l.bf16 %v4151_v28  ;;  %v3835_v3 = vunpack.c.l.bf16 %v4147_v54  ;;  %vm380_vm3 = vcmask 523264  }
  0x4b   :  { %4589 = vmatpush3.msra.mxu0 %v3652_v12  ;;  %4582 = vmatmul.mubr.msk.f32.vlgmr.msra.gmra.mxu1 %vm104_vm1, %v82_v39  ;;  %v3675_v12 = vunpack.c.l.bf16 %v3674_v5 }
  0x4c   :  { %4590 = vmatprep.subr.mxu0 %v5251_v0  ;;  %4599 = vmatprep.subr.mxu1 %v5251_v0 }
  0x4d   :  { %4591 = vmatpush3.msra.mxu0 %v3651_v14  ;;  %4615 = vmatprep.mubr.msk.f32.mxu1 %vm5252_vm0, %v5251_v0  ;;  %v84_v14 = vld [vmem:[#allocation8] sm:$0xff] }
  0x4e   :  { %4592 = vmatprep.subr.mxu0 %v5251_v0 }
  0x4f   :  { %4593 = vmatpush3.msra.mxu0 %v3648_v16  ;;  %v4153_v16 = vld [vmem:[#allocation10 + $0x170] sm:$0xff]  }
  0x50   :  { %4594 = vmatprep.subr.mxu0 %v5251_v0  ;;  %v3860_v20 = vunpack.c.h.bf16 %v4153_v16  ;;  %v3859_v23 = vunpack.c.l.bf16 %v4153_v16 }
  0x51   :  { %4595 = vmatpush3.msra.mxu0 %v3647_v19  ;;  %v3831_v19 = vunpack.c.l.bf16 %v4146_v11  ;;  %v4138_v11 = vld [vmem:[#allocation10 + $0xf8] sm:$0xff]  }
  0x52   :  { %4597 = vmatmul.mubr.msk.f32.vlgmr.msra.gmra.mxu0 %vm283_vm2, %v83_v24  ;;  %4239 = vmatprep.subr.mxu0 %v3736_v22  ;;  %v4152_v22 = vld [vmem:[#allocation10 + $0x168] sm:$0xff]  }
  0x53   :  { %4240 = vmatpush3.msra.mxu0 %v3704_v25  ;;  %716 = vmatprep.mubr.f32.mxu0 %v85_v29  ;;  %v4144_v24 = vld [vmem:[#allocation10 + $0x128] sm:$0xff]   ;;  %v3827_v25 = vunpack.c.l.bf16 %v4145_v18  ;;  %v3856_v26 = vunpack.c.h.bf16 %v4152_v22  ;;  %v3855_v29 = vunpack.c.l.bf16 %v4152_v22 }
  0x54   :  { %4241 = vmatprep.subr.mxu0 %v3735_v27  ;;  %v3824_v27 = vunpack.c.h.bf16 %v4144_v24  ;;  %v3823_v31 = vunpack.c.l.bf16 %v4144_v24 }
  0x55   :  { %4242 = vmatpush3.msra.mxu0 %v3703_v30  ;;  %v4143_v30 = vld [vmem:[#allocation10 + $0x120] sm:$0xff]  }
  0x56   :  { %4243 = vmatprep.subr.mxu0 %v3732_v32  ;;  %v3852_v32 = vunpack.c.h.bf16 %v4151_v28  ;;  %v3819_v37 = vunpack.c.l.bf16 %v4143_v30  ;;  %v277_v28 = vld [vmem:[#allocation10 + $0x1a0] sm:$0x1] }
  0x57   :  { %4244 = vmatpush3.msra.mxu0 %v3700_v33  ;;  %v3820_v33 = vunpack.c.h.bf16 %v4143_v30  ;;  %v186_v30 = vld [vmem:[#allocation10 + $0x220] sm:$0x1] }
  0x58   :  { %4245 = vmatprep.subr.mxu0 %v3731_v36  ;;  %v4142_v36 = vld [vmem:[#allocation10 + $0x118] sm:$0xff]  }
  0x59   :  { %4246 = vmatpush3.msra.mxu0 %v3699_v38  ;;  %v3848_v38 = vunpack.c.h.bf16 %v4150_v34  ;;  %v3816_v39 = vunpack.c.h.bf16 %v4142_v36 }
  0x5a   :  { %4247 = vmatprep.subr.mxu0 %v3728_v40  ;;  %v4149_v40 = vld [vmem:[#allocation10 + $0x150] sm:$0xff]  }
  0x5b   :  { %4248 = vmatpush3.msra.mxu0 %v3696_v41  ;;  %v3847_v41 = vunpack.c.l.bf16 %v4150_v34  ;;  %v3844_v44 = vunpack.c.h.bf16 %v4149_v40 }
  0x5c   :  { %4249 = vmatprep.subr.mxu0 %v3727_v43  ;;  %v3815_v43 = vunpack.c.l.bf16 %v4142_v36 }
  0x5d   :  { %4250 = vmatpush3.msra.mxu0 %v3695_v45  ;;  %v3812_v45 = vunpack.c.h.bf16 %v4141_v42  ;;  %v87_v42 = vld [vmem:[#allocation8 + $0x18] sm:$0xff] }
  0x5e   :  { %4251 = vmatprep.subr.mxu0 %v3724_v46  ;;  %v4148_v46 = vld [vmem:[#allocation10 + $0x148] sm:$0xff]  }
  0x5f   :  { %4252 = vmatpush3.msra.mxu0 %v3692_v47  ;;  %v3843_v47 = vunpack.c.l.bf16 %v4149_v40  ;;  %v3799_v40 = vunpack.c.l.bf16 %v4138_v11 }
  0x60   :  { %4253 = vmatprep.subr.mxu0 %v3723_v49  ;;  %v4107_v49 = vld [vmem:[#allocation10 + $0x1c0] sm:$0xff]  }
  0x61   :  { %4254 = vmatpush3.msra.mxu0 %v3691_v51  ;;  %v3672_v51 = vunpack.c.h.bf16 %v4107_v49  ;;  %v3671_v56 = vunpack.c.l.bf16 %v4107_v49 }
  0x62   :  { %4255 = vmatprep.subr.mxu0 %v3720_v52  ;;  %v3840_v52 = vunpack.c.h.bf16 %v4148_v46 }
  0x63   :  { %4256 = vmatpush3.msra.mxu0 %v3688_v53  ;;  %v3808_v53 = vunpack.c.h.bf16 %v4140_v48  ;;  %4600 = vmatpush3.msra.mxu1 %v3672_v51 }
  0x64   :  { %4257 = vmatprep.subr.mxu0 %v3719_v55  ;;  %v89_v55 = vld [vmem:[#allocation8 + $0x28] sm:$0xff]  ;;  %4601 = vmatprep.subr.mxu1 %v5251_v0 }
  0x65   :  { %4258 = vmatpush3.msra.mxu0 %v3687_v57  ;;  %v3839_v57 = vunpack.c.l.bf16 %v4148_v46  ;;  %4602 = vmatpush3.msra.mxu1 %v3671_v56  ;;  %v4135_v56 = vld [vmem:[#allocation10 + $0xe0] sm:$0xff]  }
  0x66   :  { %4259 = vmatprep.subr.mxu0 %v3716_v58  ;;  %v4139_v58 = vld [vmem:[#allocation10 + $0x100] sm:$0xff]   ;;  %4603 = vmatprep.subr.mxu1 %v5251_v0 }
  0x67   :  { %4260 = vmatpush3.msra.mxu0 %v3684_v59  ;;  %v4106_v59 = vld [vmem:[#allocation10 + $0x1b8] sm:$0xff]   ;;  %v3803_v5 = vunpack.c.l.bf16 %v4139_v58 }
  0x68   :  { %4261 = vmatprep.subr.mxu0 %v3715_v61  ;;  %v3668_v61 = vunpack.c.h.bf16 %v4106_v59 }
  0x69   :  { %4262 = vmatpush3.msra.mxu0 %v3683_v63  ;;  %v3836_v63 = vunpack.c.h.bf16 %v4147_v54 }
  0x6a   :  { %4263 = vmatprep.subr.mxu0 %v3712_v1  ;;  %v3667_v1 = vunpack.c.l.bf16 %v4106_v59  ;;  %4604 = vmatpush3.msra.mxu1 %v3668_v61 }
  0x6b   :  { %4264 = vmatpush3.msra.mxu0 %v3680_v2  ;;  %v3804_v2 = vunpack.c.h.bf16 %v4139_v58  ;;  %4605 = vmatprep.subr.mxu1 %v5251_v0  ;;  %v4127_v58 = vld [vmem:[#allocation10 + $0xa0] sm:$0xff]  }
  0x6c   :  { %4265 = vmatprep.subr.mxu0 %v3711_v4  ;;  %v3664_v4 = vunpack.c.h.bf16 %v4105_v62  ;;  %4606 = vmatpush3.msra.mxu1 %v3667_v1  ;;  %v3756_v61 = vunpack.c.h.bf16 %v4127_v58  ;;  %v4126_v1 = vld [vmem:[#allocation10 + $0x98] sm:$0xff]  }
  0x6d   :  { %4266 = vmatpush3.msra.mxu0 %v3679_v6  ;;  %v3663_v6 = vunpack.c.l.bf16 %v4105_v62  ;;  %4607 = vmatprep.subr.mxu1 %v5251_v0  ;;  %v4134_v62 = vld [vmem:[#allocation10 + $0xd8] sm:$0xff]  }
  0x6e   :  { %4267 = vmatprep.subr.mxu0 %v3708_v7  ;;  %v88_v7 = vld [vmem:[#allocation8 + $0x20] sm:$0xff]  ;;  %4608 = vmatpush3.msra.mxu1 %v3664_v4  ;;  %v3752_v4 = vunpack.c.h.bf16 %v4126_v1 }
  0x6f   :  { %4268 = vmatpush3.msra.mxu0 %v3676_v8  ;;  %v4104_v8 = vld [vmem:[#allocation10 + $0x1a8] sm:$0xff]   ;;  %4609 = vmatprep.subr.mxu1 %v5251_v0 }
  0x70   :  { %4269 = vmatprep.subr.mxu0 %v3707_v10  ;;  %v3660_v9 = vunpack.c.h.bf16 %v4104_v8  ;;  %4610 = vmatpush3.msra.mxu1 %v3663_v6  ;;  %v3659_v10 = vunpack.c.l.bf16 %v4104_v8  ;;  %v3783_v6 = vunpack.c.l.bf16 %v4134_v62  ;;  %v3751_v8 = vunpack.c.l.bf16 %v4126_v1  ;;  %v4167_v1 = vld [vmem:[#allocation10 + $0x228] sm:$0xff]  }
  0x71   :  { %4270 = vmatpush3.msra.mxu0 %v3675_v12  ;;  %4611 = vmatprep.subr.mxu1 %v5251_v0  ;;  %v3800_v12 = vunpack.c.h.bf16 %v4138_v11  ;;  %v4132_v11 = vld [vmem:[#allocation10 + $0xc8] sm:$0xff]  }
  0x72   :  { %4309 = vmatprep.subr.mxu0 %v3864_v13  ;;  %717 = vmatmul.mubr.f32.vlgmr.msra.gmra.mxu0 %v84_v14  ;;  %v4170_v13 = vld [vmem:[#allocation10 + $0x248] sm:$0xff]   ;;  %v4169_v14 = vld [vmem:[#allocation10 + $0x240] sm:$0xff]  }
  0x73   :  { %4310 = vmatpush3.msra.mxu0 %v3832_v15  ;;  %856 = vmatprep.mubr.f32.mxu0 %v89_v55  ;;  %v3928_v15 = vunpack.c.h.bf16 %v4170_v13  ;;  %v3927_v16 = vunpack.c.l.bf16 %v4170_v13  ;;  %v3923_v18 = vunpack.c.l.bf16 %v4169_v14  ;;  %v4124_v13 = vld [vmem:[#allocation10 + $0x88] sm:$0xff]  }
  0x74   :  { %4311 = vmatprep.subr.mxu0 %v3863_v17  ;;  %4612 = vmatpush3.msra.mxu1 %v3660_v9  ;;  %v3924_v17 = vunpack.c.h.bf16 %v4169_v14 }
  0x75   :  { %4312 = vmatpush3.msra.mxu0 %v3831_v19  ;;  %4613 = vmatprep.subr.mxu1 %v5251_v0  ;;  %v100_v19 = vlaneseq }
  0x76   :  { %4313 = vmatprep.subr.mxu0 %v3860_v20  ;;  %4614 = vmatpush3.msra.mxu1 %v3659_v10 }
  0x77   :  { %4314 = vmatpush3.msra.mxu0 %v3828_v21  ;;  %4274 = vmatprep.subr.mxu1 %v3800_v12  ;;  %v101_v20 = vshrl.u32 %v100_v19, 7  ;;  %v98_v21 = vld [vmem:[#allocation10 + $0x208] sm:$0x1]  ;;  %v4123_v19 = vld [vmem:[#allocation10 + $0x80] sm:$0xff]  }
  0x78   :  { %4315 = vmatprep.subr.mxu0 %v3859_v23  ;;  %v99_v22 = vunpack.c.l.bf16 %v98_v21 }
  0x79   :  { %4316 = vmatpush3.msra.mxu0 %v3827_v25  ;;  %v5331_v23 = vsub.s32 0, %v101_v20  ;;  %v3743_v20 = vunpack.c.l.bf16 %v4124_v13 }
  0x7a   :  { %4317 = vmatprep.subr.mxu0 %v3856_v26 }
  0x7b   :  { %4318 = vmatpush3.msra.mxu0 %v3824_v27  ;;  %v103_v24 = vrot.slane %v99_v22, %v5331_v23  ;;  %v3740_v22 = vunpack.c.h.bf16 %v4123_v19 }
  0x7c   :  { %4319 = vmatprep.subr.mxu0 %v3855_v29  ;;  %v278_v29 = vunpack.c.l.bf16 %v277_v28  ;;  %v4158_v28 = vld [vmem:[#allocation10 + $0x1e8] sm:$0xff]  }
  0x7d   :  { %4320 = vmatpush3.msra.mxu0 %v3823_v31 }
  0x7e   :  { %4321 = vmatprep.subr.mxu0 %v3852_v32  ;;  %v282_v31 = vrot.slane %v278_v29, %v5331_v23  ;;  %v4130_v32 = vld [vmem:[#allocation10 + $0xb8] sm:$0xff]   ;;  %v4157_v29 = vld [vmem:[#allocation10 + $0x1e0] sm:$0xff]  }
  0x7f   :  { %4322 = vmatpush3.msra.mxu0 %v3820_v33  ;;  %v187_v33 = vunpack.c.l.bf16 %v186_v30  ;;  %v3880_v30 = vunpack.c.h.bf16 %v4158_v28 }
  0x80   :  { %4323 = vmatprep.subr.mxu0 %v3851_v35 }
  0x81   :  { %4324 = vmatpush3.msra.mxu0 %v3819_v37  ;;  %v3768_v37 = vunpack.c.h.bf16 %v4130_v32 }
  0x82   :  { %4325 = vmatprep.subr.mxu0 %v3848_v38  ;;  %v4137_v38 = vld [vmem:[#allocation10 + $0xf0] sm:$0xff]  }
  0x83   :  { %4326 = vmatpush3.msra.mxu0 %v3816_v39  ;;  %v3795_v49 = vunpack.c.l.bf16 %v4137_v38 }
  0x84   :  { %4327 = vmatprep.subr.mxu0 %v3847_v41  ;;  %v4129_v41 = vld [vmem:[#allocation10 + $0xb0] sm:$0xff]  }
  0x85   :  { %4328 = vmatpush3.msra.mxu0 %v3815_v43  ;;  %v191_v43 = vrot.slane %v187_v33, %v5331_v23  ;;  %v3764_v46 = vunpack.c.h.bf16 %v4129_v41  ;;  %v3875_v33 = vunpack.c.l.bf16 %v4157_v29 }
  0x86   :  { %4329 = vmatprep.subr.mxu0 %v3844_v44  ;;  %v3767_v44 = vunpack.c.l.bf16 %v4130_v32  ;;  %v3876_v32 = vunpack.c.h.bf16 %v4157_v29 }
  0x87   :  { %4330 = vmatpush3.msra.mxu0 %v3812_v45  ;;  %v3796_v45 = vunpack.c.h.bf16 %v4137_v38 }
  0x88   :  { %4331 = vmatprep.subr.mxu0 %v3843_v47  ;;  %v4136_v47 = vld [vmem:[#allocation10 + $0xe8] sm:$0xff]  }
  0x89   :  { %4332 = vmatpush3.msra.mxu0 %v3811_v50  ;;  %v4128_v50 = vld [vmem:[#allocation10 + $0xa8] sm:$0xff]   ;;  %v3792_v54 = vunpack.c.h.bf16 %v4136_v47 }
  0x8a   :  { %4333 = vmatprep.subr.mxu0 %v3840_v52  ;;  %v3763_v52 = vunpack.c.l.bf16 %v4129_v41  ;;  %v3760_v55 = vunpack.c.h.bf16 %v4128_v50  ;;  %v3759_v59 = vunpack.c.l.bf16 %v4128_v50 }
  0x8b   :  { %4334 = vmatpush3.msra.mxu0 %v3808_v53 }
  0x8c   :  { %4335 = vmatprep.subr.mxu0 %v3839_v57  ;;  %v3791_v57 = vunpack.c.l.bf16 %v4136_v47 }
  0x8d   :  { %4336 = vmatpush3.msra.mxu0 %v3807_v60  ;;  %v3788_v60 = vunpack.c.h.bf16 %v4135_v56 }
  0x8e   :  { %4337 = vmatprep.subr.mxu0 %v3836_v63  ;;  %v3787_v63 = vunpack.c.l.bf16 %v4135_v56 }
  0x8f   :  { %4338 = vmatpush3.msra.mxu0 %v3804_v2  ;;  %v3755_v2 = vunpack.c.l.bf16 %v4127_v58 }
  0x90   :  { %4339 = vmatprep.subr.mxu0 %v3835_v3  ;;  %v3784_v3 = vunpack.c.h.bf16 %v4134_v62 }
  0x91   :  { %4340 = vmatpush3.msra.mxu0 %v3803_v5  ;;  %v4133_v5 = vld [vmem:[#allocation10 + $0xd0] sm:$0xff]  }
  0x92   :  { %857 = vmatmul.mubr.f32.vlgmr.msra.gmra.mxu0 %v88_v7  ;;  %4669 = vmatprep.subr.mxu0 %v3928_v15  ;;  %v4125_v7 = vld [vmem:[#allocation10 + $0x90] sm:$0xff]   ;;  %v3780_v9 = vunpack.c.h.bf16 %v4133_v5  ;;  %v3779_v12 = vunpack.c.l.bf16 %v4133_v5  ;;  %v3915_v5 = vunpack.c.l.bf16 %v4167_v1 }
  0x93   :  { %4670 = vmatpush3.msra.mxu0 %v3928_v15  ;;  %v3748_v10 = vunpack.c.h.bf16 %v4125_v7  ;;  %v3747_v14 = vunpack.c.l.bf16 %v4125_v7  ;;  %v3776_v15 = vunpack.c.h.bf16 %v4132_v11 }
  0x94   :  { %4671 = vmatprep.subr.mxu0 %v3927_v16 }
  0x95   :  { %4672 = vmatpush3.msra.mxu0 %v3927_v16  ;;  %v3744_v16 = vunpack.c.h.bf16 %v4124_v13 }
  0x96   :  { %4673 = vmatprep.subr.mxu0 %v3924_v17 }
  0x97   :  { %4674 = vmatpush3.msra.mxu0 %v3924_v17  ;;  %v4131_v17 = vld [vmem:[#allocation10 + $0xc0] sm:$0xff]  }
  0x98   :  { %4675 = vmatprep.subr.mxu0 %v3923_v18  ;;  %v3772_v21 = vunpack.c.h.bf16 %v4131_v17 }
  0x99   :  { %4676 = vmatpush3.msra.mxu0 %v3923_v18  ;;  %v3775_v18 = vunpack.c.l.bf16 %v4132_v11 }
 0x106   :  { %v174_v25 = vpop.f32.mrf.mxu0 }
 0x107   :  { %v5334_v26 = vadd.f32 %v174_v25, %v103_v24  ;;  %v3771_v24 = vunpack.c.l.bf16 %v4131_v17  ;;  %v3739_v25 = vunpack.c.l.bf16 %v4123_v19 }
 0x108   :  { %v4572_v27 = vpop.f32.mrf.mxu0 }
 0x109   :  { %4677 = vmatprep.mubr.msk.f32.mxu0 %vm104_vm1, %v5334_v26  ;;  %v86_v27 = vld [vmem:[#allocation8 + $0x10] sm:$0xff] }
 0x10b   :  { %v261_v48 = vpop.f32.mrf.mxu1 }
 0x10c   :  { %v5341_v51 = vadd.f32 %v261_v48, %v191_v43 }
 0x10d   :  { %v4583_v53 = vpop.f32.mrf.mxu1 }
 0x10e   :  { %4678 = vmatmul.mubr.msk.f32.vlgmr.msra.gmra.mxu0 %vm104_vm1, %v5341_v51 }
 0x112   :  { %v353_v34 = vpop.f32.mrf.mxu0 }
 0x113   :  { %v354_v35 = vadd.f32 %v353_v34, %v282_v31  ;;  %v3879_v31 = vunpack.c.l.bf16 %v4158_v28  ;;  %v4156_v34 = vld [vmem:[#allocation10 + $0x1d8] sm:$0xff]  }
 0x114   :  { %v4598_v36 = vpop.f32.mrf.mxu0 }
 0x115   :  { %v357_v39 = vmax.f32 %v354_v35, 0.0  ;;  %v3872_v35 = vunpack.c.h.bf16 %v4156_v34  ;;  %v3871_v36 = vunpack.c.l.bf16 %v4156_v34 }
 0x117   :  { %4616 = vmatmul.mubr.msk.f32.vlgmr.msra.gmra.mxu1 %vm380_vm3, %v357_v39 }
 0x118   :  { %4275 = vmatpush3.msra.mxu1 %v3768_v37  ;;  %786 = vmatprep.mubr.f32.mxu1 %v87_v42  ;;  %v4155_v37 = vld [vmem:[#allocation10 + $0x1d0] sm:$0xff]   ;;  %v374_v42 = vld [vmem:[#allocation10 + $0x1c8] sm:$0x1] }
 0x119   :  { %4276 = vmatprep.subr.mxu1 %v3799_v40  ;;  %v3868_v38 = vunpack.c.h.bf16 %v4155_v37  ;;  %v3867_v39 = vunpack.c.l.bf16 %v4155_v37  ;;  %v4168_v40 = vld [vmem:[#allocation10 + $0x230] sm:$0xff]   ;;  %v375_v43 = vunpack.c.l.bf16 %v374_v42 }
 0x11a   :  { %4277 = vmatpush3.msra.mxu1 %v3767_v44  ;;  %v3920_v41 = vunpack.c.h.bf16 %v4168_v40 }
 0x11b   :  { %4278 = vmatprep.subr.mxu1 %v3796_v45  ;;  %v379_v44 = vrot.slane %v375_v43, %v5331_v23 }
 0x11c   :  { %4279 = vmatpush3.msra.mxu1 %v3764_v46 }
 0x11d   :  { %4280 = vmatprep.subr.mxu1 %v3795_v49  ;;  %v646_v49 = vld [vmem:[#allocation10 + $0x180] sm:$0x1] }
 0x11e   :  { %4281 = vmatpush3.msra.mxu1 %v3763_v52  ;;  %v647_v50 = vunpack.c.l.bf16 %v646_v49 }
 0x11f   :  { %4282 = vmatprep.subr.mxu1 %v3792_v54 }
 0x120   :  { %4283 = vmatpush3.msra.mxu1 %v3760_v55  ;;  %v651_v54 = vrot.slane %v647_v50, %v5331_v23 }
 0x121   :  { %4284 = vmatprep.subr.mxu1 %v3791_v57 }
 0x122   :  { %4285 = vmatpush3.msra.mxu1 %v3759_v59 }
 0x123   :  { %4286 = vmatprep.subr.mxu1 %v3788_v60 }
 0x124   :  { %4287 = vmatpush3.msra.mxu1 %v3756_v61 }
 0x125   :  { %4288 = vmatprep.subr.mxu1 %v3787_v63 }
 0x126   :  { %4289 = vmatpush3.msra.mxu1 %v3755_v2 }
 0x127   :  { %4290 = vmatprep.subr.mxu1 %v3784_v3  ;;  %v3919_v3 = vunpack.c.l.bf16 %v4168_v40 }
 0x128   :  { %4291 = vmatpush3.msra.mxu1 %v3752_v4  ;;  %v3916_v4 = vunpack.c.h.bf16 %v4167_v1 }
 0x129   :  { %4292 = vmatprep.subr.mxu1 %v3783_v6  ;;  %v4172_v6 = vld [vmem:[#allocation10 + $0x260] sm:$0xff]  }
 0x12a   :  { %4293 = vmatpush3.msra.mxu1 %v3751_v8  ;;  %v3936_v7 = vunpack.c.h.bf16 %v4172_v6  ;;  %v3935_v8 = vunpack.c.l.bf16 %v4172_v6 }
 0x12b   :  { %4294 = vmatprep.subr.mxu1 %v3780_v9  ;;  %v4171_v9 = vld [vmem:[#allocation10 + $0x258] sm:$0xff]  }
 0x12c   :  { %4295 = vmatpush3.msra.mxu1 %v3748_v10  ;;  %v3932_v10 = vunpack.c.h.bf16 %v4171_v9  ;;  %v3931_v11 = vunpack.c.l.bf16 %v4171_v9 }
 0x12d   :  { %4296 = vmatprep.subr.mxu1 %v3779_v12  ;;  %v879_v12 = vld [vmem:[#allocation10 + $0x1f0] sm:$0x1] }
 0x12e   :  { %4297 = vmatpush3.msra.mxu1 %v3747_v14  ;;  %v880_v13 = vunpack.c.l.bf16 %v879_v12 }
 0x12f   :  { %4298 = vmatprep.subr.mxu1 %v3776_v15  ;;  %v998_v15 = vld [vmem:[#allocation10 + $0x238] sm:$0x1] }
 0x130   :  { %4299 = vmatpush3.msra.mxu1 %v3744_v16  ;;  %v884_v14 = vrot.slane %v880_v13, %v5331_v23 }
 0x131   :  { %4300 = vmatprep.subr.mxu1 %v3775_v18  ;;  %v999_v18 = vunpack.c.l.bf16 %v998_v15 }
 0x132   :  { %4301 = vmatpush3.msra.mxu1 %v3743_v20  ;;  %v4271_v48 = vpop.f32.mrf.mxu0  ;;  %v5379_v20 = vld [vmem:[#allocation10 + $0x2e0] sm:$0xff]  }
 0x133   :  { %4302 = vmatprep.subr.mxu1 %v3772_v21  ;;  %v5382_v21 = vrot.slane %v999_v18, %v5331_v23  ;;  %v3883_v29 = vunpack.c.l.bf16 %v5379_v20 }
 0x134   :  { %4303 = vmatpush3.msra.mxu1 %v3740_v22  ;;  %v4272_v52 = vpop.f32.mrf.mxu0  ;;  %v3884_v22 = vunpack.c.h.bf16 %v5379_v20 }
 0x135   :  { %4304 = vmatprep.subr.mxu1 %v3771_v24  ;;  %v4273_v55 = vadd.f32 %v4272_v52, %v4271_v48  ;;  %v1185_v52 = vld [vmem:[#allocation10 + $0x250] sm:$0x1] }
 0x136   :  { %4305 = vmatpush3.msra.mxu1 %v3739_v25 }
 0x137   :  { %787 = vmatmul.mubr.f32.vlgmr.msra.gmra.mxu1 %v86_v27  ;;  %4618 = vmatprep.subr.mxu1 %v5251_v0  ;;  %v719_v59 = vadd.f32 %v4273_v55, %v651_v54 }
 0x138   :  { %4634 = vmatprep.mubr.msk.f32.mxu1 %vm5252_vm0, %v5251_v0  ;;  %4619 = vmatpush3.msra.mxu1 %v3880_v30 }
 0x139   :  { %4620 = vmatprep.subr.mxu1 %v5251_v0 }
 0x13a   :  { %4621 = vmatpush3.msra.mxu1 %v3879_v31 }
 0x13b   :  { %4622 = vmatprep.subr.mxu1 %v5251_v0 }
 0x13c   :  { %4623 = vmatpush3.msra.mxu1 %v3876_v32 }
 0x13d   :  { %4624 = vmatprep.subr.mxu1 %v5251_v0 }
 0x13e   :  { %4625 = vmatpush3.msra.mxu1 %v3875_v33 }
 0x13f   :  { %4626 = vmatprep.subr.mxu1 %v5251_v0 }
 0x140   :  { %4627 = vmatpush3.msra.mxu1 %v3872_v35 }
 0x141   :  { %4628 = vmatprep.subr.mxu1 %v5251_v0 }
 0x142   :  { %4629 = vmatpush3.msra.mxu1 %v3871_v36 }
 0x143   :  { %4630 = vmatprep.subr.mxu1 %v5251_v0 }
 0x144   :  { %4631 = vmatpush3.msra.mxu1 %v3868_v38 }
 0x145   :  { %4632 = vmatprep.subr.mxu1 %v5251_v0 }
 0x146   :  { %4633 = vmatpush3.msra.mxu1 %v3867_v39 }
 0x147   :  { %4637 = vmatprep.subr.mxu1 %v3920_v41 }
 0x152   :  { %v4341_v53 = vpop.f32.mrf.mxu0 }
 0x154   :  { %v4342_v58 = vpop.f32.mrf.mxu0 }
 0x155   :  { %v4343_v62 = vadd.f32 %v4342_v58, %v4341_v53 }
 0x1ce   :  { %v5471_v32 = vpop.f32.mrf.mxu0 }
 0x1d0   :  { %v5473_v33 = vpop.f32.mrf.mxu0 }
 0x1d7   :  { %v450_v45 = vpop.f32.mrf.mxu1 }
 0x1d8   :  { %v5356_v46 = vadd.f32 %v450_v45, %v379_v44 }
 0x1d9   :  { %v4617_v47 = vpop.f32.mrf.mxu1 }
 0x1da   :  { %4680 = vmatprep.mubr.msk.f32.mxu0 %vm104_vm1, %v5356_v46 }
 0x1f7   :  { %v4306_v56 = vpop.f32.mrf.mxu1 }
 0x1f9   :  { %v4307_v57 = vpop.f32.mrf.mxu1 }
 0x1fa   :  { %v4308_v60 = vadd.f32 %v4307_v57, %v4306_v56  ;;  %v1186_v57 = vunpack.c.l.bf16 %v1185_v52 }
 0x1fc   :  { %v789_v61 = vadd.f32 %v4308_v60, %v719_v59 }
 0x1fe   :  { %v859_v63 = vadd.f32 %v4343_v62, %v789_v61  ;;  %v5510_v62 = vrot.slane %v1186_v57, %v5331_v23 }
 0x200   :  { %v862_v2 = vmax.f32 %v859_v63, 0.0 }
 0x202   :  { %4635 = vmatmul.mubr.msk.f32.vlgmr.msra.gmra.mxu1 %vm380_vm3, %v862_v2 }
 0x203   :  { %4638 = vmatpush3.msra.mxu1 %v3920_v41  ;;  %4645 = vmatprep.mubr.msk.f32.mxu1 %vm104_vm1, %v5334_v26 }
 0x204   :  { %4639 = vmatprep.subr.mxu1 %v3919_v3 }
 0x205   :  { %4640 = vmatpush3.msra.mxu1 %v3919_v3 }
 0x206   :  { %4641 = vmatprep.subr.mxu1 %v3916_v4 }
 0x207   :  { %4642 = vmatpush3.msra.mxu1 %v3916_v4 }
 0x208   :  { %4643 = vmatprep.subr.mxu1 %v3915_v5 }
 0x209   :  { %4644 = vmatpush3.msra.mxu1 %v3915_v5 }
 0x20a   :  { %4646 = vmatmul.mubr.msk.f32.vlgmr.msra.gmra.mxu1 %vm104_vm1, %v5341_v51  ;;  %4701 = vmatprep.subr.mxu1 %v3936_v7 }
 0x20b   :  { %4648 = vmatprep.mubr.msk.f32.mxu1 %vm104_vm1, %v5356_v46  ;;  %4702 = vmatpush3.msra.mxu1 %v3936_v7 }
 0x20c   :  { %4703 = vmatprep.subr.mxu1 %v3935_v8 }
 0x20d   :  { %4704 = vmatpush3.msra.mxu1 %v3935_v8 }
 0x20e   :  { %4705 = vmatprep.subr.mxu1 %v3932_v10 }
 0x20f   :  { %4706 = vmatpush3.msra.mxu1 %v3932_v10 }
 0x210   :  { %4707 = vmatprep.subr.mxu1 %v3931_v11 }
 0x211   :  { %4708 = vmatpush3.msra.mxu1 %v3931_v11 }
 0x2c2   :  { %v954_v16 = vpop.f32.mrf.mxu1 }
 0x2c3   :  { %v5369_v17 = vadd.f32 %v954_v16, %v884_v14 }
 0x2c4   :  { %v4636_v19 = vpop.f32.mrf.mxu1 }
 0x2c5   :  { %4649 = vmatmul.mubr.msk.f32.gmra.mxu1 %vm104_vm1, %v5369_v17  ;;  %4681 = vmatmul.mubr.msk.f32.gmra.mxu0 %vm104_vm1, %v5369_v17 }
 0x2c6   :  { %4651 = vmatprep.mubr.msk.f32.mxu1 %vm104_vm1, %v5334_v26  ;;  %4683 = vmatprep.mubr.msk.f32.mxu0 %vm104_vm1, %v5334_v26 }
 0x2c9   :  { %4652 = vmatmul.mubr.msk.f32.gmra.mxu1 %vm104_vm1, %v5341_v51  ;;  %4684 = vmatmul.mubr.msk.f32.gmra.mxu0 %vm104_vm1, %v5341_v51 }
 0x2ca   :  { %v4647_v24 = vpop.f32.mrf.mxu1  ;;  %4654 = vmatprep.mubr.msk.f32.mxu1 %vm104_vm1, %v5356_v46  ;;  %4686 = vmatprep.mubr.msk.f32.mxu0 %vm104_vm1, %v5356_v46 }
 0x2cb   :  { %v1088_v25 = vadd.f32 %v4647_v24, %v5382_v21 }
 0x2cc   :  { %v1082_v28 = vpop.f32.mrf.mxu1 }
 0x2cd   :  { %v5396_v27 = vmul.f32 %v3884_v22, %v1088_v25  ;;  %4655 = vmatmul.mubr.msk.f32.gmra.mxu1 %vm104_vm1, %v5369_v17  ;;  %4687 = vmatmul.mubr.msk.f32.gmra.mxu0 %vm104_vm1, %v5369_v17  ;;  %v1083_v30 = vadd.f32 %v1082_v28, %v5382_v21  ;;  %v1344_v28 = vld [vmem:[#allocation10 + $0x268] sm:$0x1] }
 0x2ce   :  { %4657 = vmatprep.mubr.msk.f32.mxu1 %vm104_vm1, %v5334_v26  ;;  %4689 = vmatprep.mubr.msk.f32.mxu0 %vm104_vm1, %v5334_v26 }
 0x2cf   :  { %v1161_v31 = vmul.f32 %v3883_v29, %v1083_v30 }
 0x2d1   :  { %4658 = vmatmul.mubr.msk.f32.gmra.mxu1 %vm104_vm1, %v5341_v51  ;;  %4690 = vmatmul.mubr.msk.f32.gmra.mxu0 %vm104_vm1, %v5341_v51 }
 0x2d2   :  { %4660 = vmatprep.mubr.msk.f32.mxu1 %vm104_vm1, %v5356_v46  ;;  %4692 = vmatprep.mubr.msk.f32.mxu0 %vm104_vm1, %v5356_v46 }
 0x2d5   :  { %4661 = vmatmul.mubr.msk.f32.gmra.mxu1 %vm104_vm1, %v5369_v17  ;;  %4693 = vmatmul.mubr.msk.f32.gmra.mxu0 %vm104_vm1, %v5369_v17 }
 0x2d6   :  { %4663 = vmatprep.mubr.msk.f32.mxu1 %vm104_vm1, %v5334_v26  ;;  %4695 = vmatprep.mubr.msk.f32.mxu0 %vm104_vm1, %v5334_v26 }
 0x2d9   :  { %4664 = vmatmul.mubr.msk.f32.gmra.mxu1 %vm104_vm1, %v5341_v51  ;;  %4696 = vmatmul.mubr.msk.f32.gmra.mxu0 %vm104_vm1, %v5341_v51 }
 0x2da   :  { %4666 = vmatprep.mubr.msk.f32.mxu1 %vm104_vm1, %v5356_v46  ;;  %4698 = vmatprep.mubr.msk.f32.mxu0 %vm104_vm1, %v5356_v46 }
 0x2dd   :  { %4667 = vmatmul.mubr.msk.f32.gmra.mxu1 %vm104_vm1, %v5369_v17  ;;  %4699 = vmatmul.mubr.msk.f32.gmra.mxu0 %vm104_vm1, %v5369_v17 }
 0x2de   :  { %4709 = vmatprep.mubr.msk.f32.mxu1 %vm104_vm1, %v5334_v26  ;;  %4765 = vmatprep.mubr.msk.f32.mxu0 %vm104_vm1, %v1161_v31 }
 0x2e1   :  { %4710 = vmatmul.mubr.msk.f32.vlgmr.msra.gmra.mxu1 %vm104_vm1, %v5341_v51 }
 0x2e2   :  { %4712 = vmatprep.mubr.msk.f32.mxu1 %vm104_vm1, %v5356_v46 }
 0x2e5   :  { %4713 = vmatmul.mubr.msk.f32.gmra.mxu1 %vm104_vm1, %v5369_v17 }
 0x2e6   :  { %4715 = vmatprep.mubr.msk.f32.mxu1 %vm104_vm1, %v5334_v26 }
 0x2e9   :  { %4716 = vmatmul.mubr.msk.f32.gmra.mxu1 %vm104_vm1, %v5341_v51 }
 0x2ea   :  { %4718 = vmatprep.mubr.msk.f32.mxu1 %vm104_vm1, %v5356_v46 }
 0x2ed   :  { %4719 = vmatmul.mubr.msk.f32.gmra.mxu1 %vm104_vm1, %v5369_v17 }
 0x2ee   :  { %4721 = vmatprep.mubr.msk.f32.mxu1 %vm104_vm1, %v5334_v26 }
 0x2f1   :  { %4722 = vmatmul.mubr.msk.f32.gmra.mxu1 %vm104_vm1, %v5341_v51 }
 0x2f2   :  { %4724 = vmatprep.mubr.msk.f32.mxu1 %vm104_vm1, %v5356_v46 }
 0x2f5   :  { %4725 = vmatmul.mubr.msk.f32.gmra.mxu1 %vm104_vm1, %v5369_v17 }
 0x2f6   :  { %4727 = vmatprep.mubr.msk.f32.mxu1 %vm104_vm1, %v5334_v26 }
 0x2f9   :  { %4728 = vmatmul.mubr.msk.f32.gmra.mxu1 %vm104_vm1, %v5341_v51 }
 0x2fa   :  { %4730 = vmatprep.mubr.msk.f32.mxu1 %vm104_vm1, %v5356_v46 }
 0x2fd   :  { %4731 = vmatmul.mubr.msk.f32.gmra.mxu1 %vm104_vm1, %v5369_v17 }
 0x385   :  { %v5475_v34 = vpop.f32.mrf.mxu1  ;;  %v5477_v35 = vpop.f32.mrf.mxu0 }
 0x387   :  { %v5479_v36 = vpop.f32.mrf.mxu1  ;;  %v5481_v37 = vpop.f32.mrf.mxu0 }
 0x389   :  { %v5483_v38 = vpop.f32.mrf.mxu1  ;;  %v5485_v39 = vpop.f32.mrf.mxu0 }
 0x38b   :  { %v5487_v40 = vpop.f32.mrf.mxu1  ;;  %v5489_v41 = vpop.f32.mrf.mxu0 }
 0x38d   :  { %v5491_v42 = vpop.f32.mrf.mxu1  ;;  %v4688_v43 = vpop.f32.mrf.mxu0 }
 0x38f   :  { %v5493_v44 = vpop.f32.mrf.mxu1  ;;  %v5495_v45 = vpop.f32.mrf.mxu0 }
 0x390   :  { %v1113_v20 = vadd.f32 %v5493_v44, %v5382_v21 }
 0x391   :  { %v5497_v47 = vpop.f32.mrf.mxu1  ;;  %v4691_v48 = vpop.f32.mrf.mxu0 }
 0x392   :  { %v1303_v25 = vadd.f32 %v4691_v48, %v5510_v62  ;;  %v1293_v48 = vadd.f32 %v4688_v43, %v5510_v62  ;;  %v1288_v43 = vadd.f32 %v5495_v45, %v5510_v62  ;;  %v5580_v45 = vld [vmem:[#allocation10 + $0x308] sm:$0xff]   ;;  %v1128_v44 = vadd.f32 %v5497_v47, %v5382_v21 }
 0x393   :  { %v5499_v49 = vpop.f32.mrf.mxu1  ;;  %v1297_v50 = vpop.f32.mrf.mxu0 }
 0x394   :  { %v1298_v52 = vadd.f32 %v1297_v50, %v5510_v62 }
 0x395   :  { %v5501_v53 = vpop.f32.mrf.mxu1  ;;  %v4694_v54 = vpop.f32.mrf.mxu0 }
 0x396   :  { %v1313_v14 = vadd.f32 %v4694_v54, %v5510_v62  ;;  %v1345_v54 = vunpack.c.l.bf16 %v1344_v28 }
 0x397   :  { %v5503_v55 = vpop.f32.mrf.mxu1  ;;  %v1307_v56 = vpop.f32.mrf.mxu0 }
 0x398   :  { %v1308_v18 = vadd.f32 %v1307_v56, %v5510_v62  ;;  %v5555_v56 = vld [vmem:[#allocation10 + $0x318] sm:$0xff]  }
 0x399   :  { %v5505_v58 = vpop.f32.mrf.mxu1  ;;  %v4697_v59 = vpop.f32.mrf.mxu0 }
 0x39a   :  { %v1323_v8 = vadd.f32 %v4697_v59, %v5510_v62 }
 0x39b   :  { %v5507_v60 = vpop.f32.mrf.mxu1  ;;  %v1317_v61 = vpop.f32.mrf.mxu0 }
 0x39c   :  { %v1318_v11 = vadd.f32 %v1317_v61, %v5510_v62  ;;  %v5559_v61 = vrot.slane %v1345_v54, %v5331_v23  ;;  %v1283_v54 = vadd.f32 %v5485_v39, %v5510_v62  ;;  %v5594_v39 = vld [vmem:[#allocation10 + $0x300] sm:$0xff]   ;;  %v1143_v47 = vadd.f32 %v5507_v60, %v5382_v21 }
 0x39d   :  { %v5512_v63 = vpop.f32.mrf.mxu1  ;;  %v4700_v1 = vpop.f32.mrf.mxu0 }
 0x39e   :  { %v1333_v2 = vadd.f32 %v4700_v1, %v5510_v62 }
 0x39f   :  { %v5515_v3 = vpop.f32.mrf.mxu1  ;;  %v1327_v4 = vpop.f32.mrf.mxu0 }
 0x3a0   :  { %v1328_v5 = vadd.f32 %v1327_v4, %v5510_v62  ;;  %4733 = vmatprep.subr.msk.mxu0 %vm104_vm1, %v1333_v2  ;;  %v5565_v4 = vld [vmem:[#allocation10 + $0x310] sm:$0xff]  }
 0x3a1   :  { %v5519_v6 = vpop.f32.mrf.mxu1  ;;  %4734 = vmatpush3.xpose.msk.msra.mxu0 %vm104_vm1, %v1333_v2  ;;  %v3912_v2 = vunpack.c.h.bf16 %v5555_v56 }
 0x3a2   :  { %4735 = vmatprep.subr.msk.mxu0 %vm104_vm1, %v1328_v5 }
 0x3a3   :  { %v5523_v7 = vpop.f32.mrf.mxu1 }
 0x3a5   :  { %v5526_v9 = vpop.f32.mrf.mxu1  ;;  %4736 = vmatpush3.xpose.msk.msra.mxu0 %vm104_vm1, %v1328_v5  ;;  %v3911_v5 = vunpack.c.l.bf16 %v5555_v56 }
 0x3a6   :  { %4737 = vmatprep.subr.msk.mxu0 %vm104_vm1, %v1323_v8 }
 0x3a7   :  { %v5530_v10 = vpop.f32.mrf.mxu1 }
 0x3a9   :  { %v5533_v12 = vpop.f32.mrf.mxu1  ;;  %4738 = vmatpush3.xpose.msk.msra.mxu0 %vm104_vm1, %v1323_v8 }
 0x3aa   :  { %4739 = vmatprep.subr.msk.mxu0 %vm104_vm1, %v1318_v11 }
 0x3ab   :  { %v5537_v13 = vpop.f32.mrf.mxu1 }
 0x3ad   :  { %v5540_v15 = vpop.f32.mrf.mxu1  ;;  %4740 = vmatpush3.xpose.msk.msra.mxu0 %vm104_vm1, %v1318_v11 }
 0x3ae   :  { %4741 = vmatprep.subr.msk.mxu0 %vm104_vm1, %v1313_v14 }
 0x3af   :  { %v5544_v16 = vpop.f32.mrf.mxu1 }
 0x3b1   :  { %v4723_v19 = vpop.f32.mrf.mxu1  ;;  %4742 = vmatpush3.xpose.msk.msra.mxu0 %vm104_vm1, %v1313_v14 }
 0x3b2   :  { %4743 = vmatprep.subr.msk.mxu0 %vm104_vm1, %v1308_v18 }
 0x3b3   :  { %v1456_v24 = vpop.f32.mrf.mxu1 }
 0x3b5   :  { %v4726_v30 = vpop.f32.mrf.mxu1  ;;  %4744 = vmatpush3.xpose.msk.msra.mxu0 %vm104_vm1, %v1308_v18 }
 0x3b6   :  { %4745 = vmatprep.subr.msk.mxu0 %vm104_vm1, %v1303_v25 }
 0x3b7   :  { %v1466_v31 = vpop.f32.mrf.mxu1 }
 0x3b9   :  { %v4729_v57 = vpop.f32.mrf.mxu1  ;;  %4746 = vmatpush3.xpose.msk.msra.mxu0 %vm104_vm1, %v1303_v25  ;;  %v3908_v25 = vunpack.c.h.bf16 %v5565_v4 }
 0x3ba   :  { %4747 = vmatprep.subr.msk.mxu0 %vm104_vm1, %v1298_v52  ;;  %v1482_v11 = vadd.f32 %v4729_v57, %v5559_v61  ;;  %v3907_v57 = vunpack.c.l.bf16 %v5565_v4 }
 0x3bb   :  { %v1476_v59 = vpop.f32.mrf.mxu1 }
 0x3bc   :  { %v1477_v28 = vadd.f32 %v1476_v59, %v5559_v61  ;;  %v3904_v59 = vunpack.c.h.bf16 %v5580_v45 }
 0x3bd   :  { %v4732_v1 = vpop.f32.mrf.mxu1  ;;  %4748 = vmatpush3.xpose.msk.msra.mxu0 %vm104_vm1, %v1298_v52 }
 0x3be   :  { %v1492_v50 = vadd.f32 %v4732_v1, %v5559_v61  ;;  %4749 = vmatprep.subr.msk.mxu0 %vm104_vm1, %v1293_v48  ;;  %v1508_v1 = vmul.f32 %v3908_v25, %v1482_v11  ;;  %v3903_v11 = vunpack.c.l.bf16 %v5580_v45  ;;  %v1158_v45 = vadd.f32 %v5512_v63, %v5382_v21 }
 0x3bf   :  { %v1486_v8 = vpop.f32.mrf.mxu1 }
 0x3c0   :  { %v1510_v14 = vmul.f32 %v3912_v2, %v1492_v50  ;;  %v1487_v18 = vadd.f32 %v1486_v8, %v5559_v61  ;;  %v1467_v50 = vadd.f32 %v1466_v31, %v5559_v61  ;;  %v1507_v8 = vmul.f32 %v3907_v57, %v1477_v28 }
 0x3c1   :  { %4750 = vmatpush3.xpose.msk.msra.mxu0 %vm104_vm1, %v1293_v48  ;;  %v1472_v48 = vadd.f32 %v4726_v30, %v5559_v61  ;;  %v1278_v30 = vadd.f32 %v5489_v41, %v5510_v62  ;;  %v3900_v31 = vunpack.c.h.bf16 %v5594_v39  ;;  %v5608_v41 = vld [vmem:[#allocation10 + $0x2f8] sm:$0xff]  }
 0x3c2   :  { %v1509_v52 = vmul.f32 %v3911_v5, %v1487_v18  ;;  %4751 = vmatprep.subr.msk.mxu0 %vm104_vm1, %v1288_v43  ;;  %4789 = vmatprep.subr.mxu1 %v1510_v14  ;;  %v1457_v18 = vadd.f32 %v1456_v24, %v5559_v61  ;;  %v1505_v28 = vmul.f32 %v3903_v11, %v1467_v50  ;;  %v5624_v50 = vld [vmem:[#allocation10 + $0x2f0] sm:$0xff]  }
 0x3c3   :  { %4790 = vmatpush3.msra.mxu1 %v1510_v14  ;;  %v1506_v14 = vmul.f32 %v3904_v59, %v1472_v48  ;;  %v3896_v48 = vunpack.c.h.bf16 %v5608_v41 }
 0x3c4   :  { %4791 = vmatprep.subr.mxu1 %v1509_v52 }
 0x3c5   :  { %4752 = vmatpush3.xpose.msk.msra.mxu0 %vm104_vm1, %v1288_v43  ;;  %4792 = vmatpush3.msra.mxu1 %v1509_v52  ;;  %v1462_v43 = vadd.f32 %v4723_v19, %v5559_v61  ;;  %v1273_v19 = vadd.f32 %v5477_v35, %v5510_v62  ;;  %v3899_v52 = vunpack.c.l.bf16 %v5594_v39  ;;  %v1148_v39 = vadd.f32 %v5505_v58, %v5382_v21 }
 0x3c6   :  { %4753 = vmatprep.subr.msk.mxu0 %vm104_vm1, %v1283_v54  ;;  %4793 = vmatprep.subr.mxu1 %v1508_v1  ;;  %v1176_v58 = vmul.f32 %v3912_v2, %v1158_v45 }
 0x3c7   :  { %4794 = vmatpush3.msra.mxu1 %v1508_v1  ;;  %v1504_v24 = vmul.f32 %v3900_v31, %v1462_v43  ;;  %v1447_v1 = vadd.f32 %v5544_v16, %v5559_v61  ;;  %v1503_v35 = vmul.f32 %v3899_v52, %v1457_v18  ;;  %v3892_v43 = vunpack.c.h.bf16 %v5624_v50 }
 0x3c8   :  { %4795 = vmatprep.subr.mxu1 %v1507_v8  ;;  %v1174_v60 = vmul.f32 %v3908_v25, %v1148_v39  ;;  %v4174_v25 = vld [vmem:[#allocation10 + $0x328] sm:$0xff]  }
 0x3c9   :  { %4754 = vmatpush3.xpose.msk.msra.mxu0 %vm104_vm1, %v1283_v54  ;;  %4796 = vmatpush3.msra.mxu1 %v1507_v8  ;;  %v1452_v54 = vadd.f32 %v5540_v15, %v5559_v61  ;;  %v1268_v15 = vadd.f32 %v5481_v37, %v5510_v62  ;;  %v3895_v8 = vunpack.c.l.bf16 %v5608_v41  ;;  %v4160_v37 = vld [vmem:[#allocation10 + $0x2e8] sm:$0xff]   ;;  %v1138_v41 = vadd.f32 %v5501_v53, %v5382_v21 }
 0x3ca   :  { %4755 = vmatprep.subr.msk.mxu0 %vm104_vm1, %v1278_v30  ;;  %4797 = vmatprep.subr.mxu1 %v1506_v14  ;;  %v1153_v53 = vadd.f32 %v5515_v3, %v5382_v21  ;;  %v4173_v3 = vld [vmem:[#allocation10 + $0x320] sm:$0xff]   ;;  %v3944_v56 = vunpack.c.h.bf16 %v4174_v25 }
 0x3cb   :  { %4798 = vmatpush3.msra.mxu1 %v1506_v14  ;;  %v1502_v16 = vmul.f32 %v3896_v48, %v1452_v54  ;;  %v1437_v14 = vadd.f32 %v5537_v13, %v5559_v61  ;;  %v1501_v18 = vmul.f32 %v3895_v8, %v1447_v1  ;;  %v3888_v13 = vunpack.c.h.bf16 %v4160_v37 }
 0x3cc   :  { %4799 = vmatprep.subr.mxu1 %v1505_v28 }
 0x3cd   :  { %4756 = vmatpush3.xpose.msk.msra.mxu0 %vm104_vm1, %v1278_v30  ;;  %4800 = vmatpush3.msra.mxu1 %v1505_v28  ;;  %v1442_v30 = vadd.f32 %v5533_v12, %v5559_v61  ;;  %v1263_v12 = vadd.f32 %v5471_v32, %v5510_v62  ;;  %v3891_v28 = vunpack.c.l.bf16 %v5624_v50  ;;  %v1258_v32 = vadd.f32 %v5473_v33, %v5510_v62 }
 0x3ce   :  { %4757 = vmatprep.subr.msk.mxu0 %vm104_vm1, %v1273_v19  ;;  %4801 = vmatprep.subr.mxu1 %v1504_v24  ;;  %v1098_v62 = vadd.f32 %v5475_v34, %v5382_v21  ;;  %v1108_v34 = vadd.f32 %v5483_v38, %v5382_v21 }
 0x3cf   :  { %4802 = vmatpush3.msra.mxu1 %v1504_v24  ;;  %v1500_v54 = vmul.f32 %v3892_v43, %v1442_v30  ;;  %v1427_v24 = vadd.f32 %v5530_v10, %v5559_v61  ;;  %v1499_v1 = vmul.f32 %v3891_v28, %v1437_v14  ;;  %v1417_v10 = vadd.f32 %v5523_v7, %v5559_v61  ;;  %v4175_v14 = vld [vmem:[#allocation10 + $0x330] sm:$0xff]  }
 0x3d0   :  { %4803 = vmatprep.subr.mxu1 %v1503_v35  ;;  %v1093_v30 = vadd.f32 %v5479_v36, %v5382_v21 }
 0x3d1   :  { %4758 = vmatpush3.xpose.msk.msra.mxu0 %vm104_vm1, %v1273_v19  ;;  %4804 = vmatpush3.msra.mxu1 %v1503_v35  ;;  %v1432_v19 = vadd.f32 %v5526_v9, %v5559_v61  ;;  %v3887_v35 = vunpack.c.l.bf16 %v4160_v37  ;;  %v1422_v9 = vadd.f32 %v5519_v6, %v5559_v61  ;;  %v1495_v6 = vmul.f32 %v3883_v29, %v1417_v10 }
 0x3d2   :  { %4759 = vmatprep.subr.msk.mxu0 %vm104_vm1, %v1268_v15  ;;  %4805 = vmatprep.subr.mxu1 %v1502_v16  ;;  %v1103_v61 = vadd.f32 %v5487_v40, %v5382_v21  ;;  %v1166_v29 = vmul.f32 %v3892_v43, %v1108_v34  ;;  %v1167_v40 = vmul.f32 %v3895_v8, %v1113_v20  ;;  %v3947_v37 = vunpack.c.l.bf16 %v4175_v14 }
 0x3d3   :  { %4806 = vmatpush3.msra.mxu1 %v1502_v16  ;;  %v1498_v50 = vmul.f32 %v3888_v13, %v1432_v19  ;;  %v1496_v33 = vmul.f32 %v3884_v22, %v1422_v9  ;;  %v1163_v7 = vmul.f32 %v3887_v35, %v1093_v30  ;;  %v1164_v22 = vmul.f32 %v3888_v13, %v1098_v62  ;;  %v4176_v19 = vld [vmem:[#allocation10 + $0x338] sm:$0xff]   ;;  %v4177_v9 = vld [vmem:[#allocation10 + $0x340] sm:$0xff]  }
 0x3d4   :  { %4807 = vmatprep.subr.mxu1 %v1501_v18  ;;  %v1165_v36 = vmul.f32 %v3891_v28, %v1103_v61  ;;  %v1123_v16 = vadd.f32 %v5499_v49, %v5382_v21  ;;  %v1170_v49 = vmul.f32 %v3900_v31, %v1128_v44  ;;  %v1173_v31 = vmul.f32 %v3907_v57, %v1143_v47 }
 0x3d5   :  { %4760 = vmatpush3.xpose.msk.msra.mxu0 %vm104_vm1, %v1268_v15  ;;  %4808 = vmatpush3.msra.mxu1 %v1501_v18  ;;  %v1497_v15 = vmul.f32 %v3887_v35, %v1427_v24  ;;  %v3939_v57 = vunpack.c.l.bf16 %v4173_v3  ;;  %v3948_v13 = vunpack.c.h.bf16 %v4175_v14  ;;  %v3952_v10 = vunpack.c.h.bf16 %v4176_v19 }
 0x3d6   :  { %4761 = vmatprep.subr.msk.mxu0 %vm104_vm1, %v1263_v12  ;;  %4809 = vmatprep.subr.mxu1 %v1500_v54  ;;  %v1169_v43 = vmul.f32 %v3899_v52, %v1123_v16  ;;  %v3940_v52 = vunpack.c.h.bf16 %v4173_v3  ;;  %v3955_v30 = vunpack.c.l.bf16 %v4177_v9  ;;  %v3956_v61 = vunpack.c.h.bf16 %v4177_v9 }
 0x3d7   :  { %4810 = vmatpush3.msra.mxu1 %v1500_v54 }
 0x3d8   :  { %4811 = vmatprep.subr.mxu1 %v1499_v1 }
 0x3d9   :  { %4762 = vmatpush3.xpose.msk.msra.mxu0 %vm104_vm1, %v1263_v12  ;;  %4812 = vmatpush3.msra.mxu1 %v1499_v1  ;;  %v3951_v1 = vunpack.c.l.bf16 %v4176_v19 }
 0x3da   :  { %4763 = vmatprep.subr.msk.mxu0 %vm104_vm1, %v1258_v32  ;;  %4813 = vmatprep.subr.mxu1 %v1498_v50 }
 0x3db   :  { %4814 = vmatpush3.msra.mxu1 %v1498_v50 }
 0x3dc   :  { %4815 = vmatprep.subr.mxu1 %v1497_v15 }
 0x3dd   :  { %4764 = vmatpush3.xpose.msk.msra.mxu0 %vm104_vm1, %v1258_v32  ;;  %4816 = vmatpush3.msra.mxu1 %v1497_v15 }
 0x3de   :  { %4817 = vmatprep.subr.mxu1 %v1496_v33 }
 0x3df   :  { %4818 = vmatpush3.msra.mxu1 %v1496_v33 }
 0x3e0   :  { %4766 = vmatmul.mubr.msk.f32.vlgmr.msra.gmra.mxu0 %vm104_vm1, %v5396_v27  ;;  %4819 = vmatprep.subr.mxu1 %v1495_v6  ;;  %v1118_v27 = vadd.f32 %v5491_v42, %v5382_v21  ;;  %v1133_v42 = vadd.f32 %v5503_v55, %v5382_v21  ;;  %v1172_v55 = vmul.f32 %v3904_v59, %v1138_v41  ;;  %v3943_v21 = vunpack.c.l.bf16 %v4174_v25 }
 0x3e1   :  { %4768 = vmatprep.mubr.msk.f32.mxu0 %vm104_vm1, %v1163_v7  ;;  %4820 = vmatpush3.msra.mxu1 %v1495_v6  ;;  %v1175_v59 = vmul.f32 %v3911_v5, %v1153_v53  ;;  %v4178_v6 = vld [vmem:[#allocation10 + $0x348] sm:$0xff]  }
 0x3e2   :  { %v1168_v38 = vmul.f32 %v3896_v48, %v1118_v27  ;;  %v1171_v48 = vmul.f32 %v3903_v11, %v1133_v42  ;;  %v3959_v34 = vunpack.c.l.bf16 %v4178_v6  ;;  %v4180_v42 = vld [vmem:[#allocation10 + $0x358] sm:$0xff]  }
 0x3e3   :  { %v3967_v47 = vunpack.c.l.bf16 %v4180_v42  ;;  %v3968_v53 = vunpack.c.h.bf16 %v4180_v42 }
 0x3e4   :  { %4769 = vmatmul.mubr.msk.f32.gmra.mxu0 %vm104_vm1, %v1164_v22 }
 0x3e5   :  { %4771 = vmatprep.mubr.msk.f32.mxu0 %vm104_vm1, %v1165_v36 }
 0x3e8   :  { %4772 = vmatmul.mubr.msk.f32.gmra.mxu0 %vm104_vm1, %v1166_v29  ;;  %v4179_v29 = vld [vmem:[#allocation10 + $0x350] sm:$0xff]  }
 0x3e9   :  { %4774 = vmatprep.mubr.msk.f32.mxu0 %vm104_vm1, %v1167_v40  ;;  %v3960_v40 = vunpack.c.h.bf16 %v4178_v6  ;;  %v3964_v41 = vunpack.c.h.bf16 %v4179_v29 }
 0x3ec   :  { %4775 = vmatmul.mubr.msk.f32.gmra.mxu0 %vm104_vm1, %v1168_v38  ;;  %v3963_v38 = vunpack.c.l.bf16 %v4179_v29 }
 0x3ed   :  { %4777 = vmatprep.mubr.msk.f32.mxu0 %vm104_vm1, %v1169_v43 }
 0x3f0   :  { %4778 = vmatmul.mubr.msk.f32.gmra.mxu0 %vm104_vm1, %v1170_v49 }
 0x3f1   :  { %4780 = vmatprep.mubr.msk.f32.mxu0 %vm104_vm1, %v1171_v48 }
 0x3f4   :  { %4781 = vmatmul.mubr.msk.f32.gmra.mxu0 %vm104_vm1, %v1172_v55 }
 0x3f5   :  { %4783 = vmatprep.mubr.msk.f32.mxu0 %vm104_vm1, %v1173_v31 }
 0x3f8   :  { %4784 = vmatmul.mubr.msk.f32.gmra.mxu0 %vm104_vm1, %v1174_v60 }
 0x3f9   :  { %4786 = vmatprep.mubr.msk.f32.mxu0 %vm104_vm1, %v1175_v59 }
 0x3fc   :  { %4787 = vmatmul.mubr.msk.f32.gmra.mxu0 %vm104_vm1, %v1176_v58 }
 0x4a0   :  { %v4767_v11 = vpop.f32.mrf.mxu0 }
 0x4a1   :  { %v5725_v18 = vadd.f32 %v4767_v11, %v3940_v52 }
 0x4a2   :  { %v1705_v4 = vpop.f32.mrf.mxu0 }
 0x4a3   :  { %v5722_v8 = vadd.f32 %v3939_v57, %v1705_v4 }
 0x4a4   :  { %v4770_v63 = vpop.f32.mrf.mxu0 }
 0x4a5   :  { %1784 = vmax.xlane.f32.xlu0 %v5722_v8  ;;  %v5731_v54 = vadd.f32 %v4770_v63, %v3944_v56 }
 0x4a6   :  { %v1715_v5 = vpop.f32.mrf.mxu0 }
 0x4a7   :  { %v5727_v2 = vadd.f32 %v3943_v21, %v1715_v5 }
 0x4a8   :  { %v4773_v12 = vpop.f32.mrf.mxu0 }
 0x4a9   :  { %1788 = vmax.xlane.f32.xlu1 %v5727_v2  ;;  %1786 = vmax.xlane.f32.xlu0 %v5725_v18  ;;  %v5737_v50 = vadd.f32 %v4773_v12, %v3948_v13 }
 0x4aa   :  { %v1725_v28 = vpop.f32.mrf.mxu0 }
 0x4ab   :  { %v5733_v24 = vadd.f32 %v3947_v37, %v1725_v28 }
 0x4ac   :  { %v4776_v32 = vpop.f32.mrf.mxu0 }
 0x4ad   :  { %1790 = vmax.xlane.f32.xlu1 %v5731_v54  ;;  %1792 = vmax.xlane.f32.xlu0 %v5733_v24  ;;  %v5743_v7 = vadd.f32 %v4776_v32, %v3952_v10 }
 0x4ae   :  { %v1735_v35 = vpop.f32.mrf.mxu0 }
 0x4af   :  { %v5739_v15 = vadd.f32 %v3951_v1, %v1735_v35 }
 0x4b0   :  { %v4779_v33 = vpop.f32.mrf.mxu0 }
 0x4b1   :  { %1794 = vmax.xlane.f32.xlu1 %v5737_v50  ;;  %1796 = vmax.xlane.f32.xlu0 %v5739_v15  ;;  %v5749_v27 = vadd.f32 %v4779_v33, %v3956_v61 }
 0x4b2   :  { %v1745_v62 = vpop.f32.mrf.mxu0 }
 0x4b3   :  { %v5745_v22 = vadd.f32 %v3955_v30, %v1745_v62 }
 0x4b4   :  { %v4782_v36 = vpop.f32.mrf.mxu0 }
 0x4b5   :  { %1798 = vmax.xlane.f32.xlu1 %v5743_v7  ;;  %1800 = vmax.xlane.f32.xlu0 %v5745_v22  ;;  %v5755_v49 = vadd.f32 %v4782_v36, %v3960_v40 }
 0x4b6   :  { %v1755_v20 = vpop.f32.mrf.mxu0 }
 0x4b7   :  { %v5751_v16 = vadd.f32 %v3959_v34, %v1755_v20 }
 0x4b8   :  { %v4785_v44 = vpop.f32.mrf.mxu0 }
 0x4b9   :  { %1802 = vmax.xlane.f32.xlu1 %v5749_v27  ;;  %1804 = vmax.xlane.f32.xlu0 %v5751_v16  ;;  %v5761_v31 = vadd.f32 %v4785_v44, %v3964_v41 }
 0x4ba   :  { %v1765_v43 = vpop.f32.mrf.mxu0 }
 0x4bb   :  { %v5757_v48 = vadd.f32 %v3963_v38, %v1765_v43 }
 0x4bc   :  { %v4788_v55 = vpop.f32.mrf.mxu0 }
 0x4bd   :  { %1806 = vmax.xlane.f32.xlu1 %v5755_v49  ;;  %1808 = vmax.xlane.f32.xlu0 %v5757_v48  ;;  %v5767_v45 = vadd.f32 %v4788_v55, %v3968_v53 }
 0x4be   :  { %v1775_v39 = vpop.f32.mrf.mxu0 }
 0x4bf   :  { %v5763_v60 = vadd.f32 %v3967_v47, %v1775_v39 }
 0x4c1   :  { %1810 = vmax.xlane.f32.xlu1 %v5761_v31  ;;  %1812 = vmax.xlane.f32.xlu0 %v5763_v60 }
 0x4c5   :  { %1814 = vmax.xlane.f32.xlu1 %v5767_v45 }
 0x52e   :  { %v1785_v59 = vpop.xlane.xlu0 %1784 }
 0x52f   :  { %v1816_v58 = vsub.f32 %v5722_v8, %v1785_v59 }
 0x531   :  { %v1832_v3 = vmul.f32 1.442695, %v1816_v58 }
 0x532   :  { %v1789_v57 = vpop.xlane.xlu1 %1788  ;;  %v1787_v11 = vpop.xlane.xlu0 %1786 }
 0x533   :  { %5028 = vpow2.f32 %v1832_v3  ;;  %v1818_v4 = vsub.f32 %v5727_v2, %v1789_v57  ;;  %v1817_v25 = vsub.f32 %v5725_v18, %v1787_v11 }
 0x535   :  { %v1836_v52 = vmul.f32 1.442695, %v1818_v4  ;;  %v1834_v21 = vmul.f32 1.442695, %v1817_v25  ;;  %v5834_v25 = vld [vmem:[#allocation10 + $0x278] sm:$0xff]  }
 0x536   :  { %v1791_v63 = vpop.xlane.xlu1 %1790  ;;  %v1793_v5 = vpop.xlane.xlu0 %1792 }
 0x537   :  { %5030 = vpow2.f32 %v1836_v52  ;;  %v1819_v14 = vsub.f32 %v5731_v54, %v1791_v63  ;;  %v1820_v56 = vsub.f32 %v5733_v24, %v1793_v5  ;;  %v3976_v52 = vunpack.c.h.bf16 %v5834_v25 }
 0x538   :  { %5032 = vpow2.f32 %v1834_v21 }
 0x539   :  { %v1838_v37 = vmul.f32 1.442695, %v1819_v14  ;;  %v1840_v8 = vmul.f32 1.442695, %v1820_v56  ;;  %4845 = vmatprep.subr.mxu1 %v3976_v52 }
 0x53a   :  { %v1795_v12 = vpop.xlane.xlu1 %1794  ;;  %v1797_v28 = vpop.xlane.xlu0 %1796 }
 0x53b   :  { %5034 = vpow2.f32 %v1838_v37  ;;  %v1821_v19 = vsub.f32 %v5737_v50, %v1795_v12  ;;  %v1822_v2 = vsub.f32 %v5739_v15, %v1797_v28 }
 0x53c   :  { %5036 = vpow2.f32 %v1840_v8 }
 0x53d   :  { %v1842_v18 = vmul.f32 1.442695, %v1821_v19  ;;  %v1844_v13 = vmul.f32 1.442695, %v1822_v2 }
 0x53e   :  { %v1799_v1 = vpop.xlane.xlu1 %1798  ;;  %v1801_v32 = vpop.xlane.xlu0 %1800 }
 0x53f   :  { %5038 = vpow2.f32 %v1842_v18  ;;  %v1823_v54 = vsub.f32 %v5743_v7, %v1799_v1  ;;  %v1824_v24 = vsub.f32 %v5745_v22, %v1801_v32 }
 0x540   :  { %v5779_v35 = vpop.eup %5028  ;;  %5040 = vpow2.f32 %v1844_v13 }
 0x541   :  { %v1846_v9 = vmul.f32 1.442695, %v1823_v54  ;;  %v1848_v10 = vmul.f32 1.442695, %v1824_v24  ;;  %1864 = vadd.xlane.f32.xlu0 %v5779_v35 }
 0x542   :  { %v1803_v50 = vpop.xlane.xlu1 %1802  ;;  %v1805_v30 = vpop.xlane.xlu0 %1804 }
 0x543   :  { %5042 = vpow2.f32 %v1846_v9  ;;  %v1825_v15 = vsub.f32 %v5749_v27, %v1803_v50  ;;  %v1826_v33 = vsub.f32 %v5751_v16, %v1805_v30 }
 0x544   :  { %v5784_v62 = vpop.eup %5030  ;;  %5044 = vpow2.f32 %v1848_v10 }
 0x545   :  { %v5786_v6 = vpop.eup %5032  ;;  %v1850_v7 = vmul.f32 1.442695, %v1825_v15  ;;  %v1852_v61 = vmul.f32 1.442695, %v1826_v33  ;;  %1868 = vadd.xlane.f32.xlu0 %v5784_v62 }
 0x546   :  { %1866 = vadd.xlane.f32.xlu1 %v5786_v6  ;;  %v1807_v22 = vpop.xlane.xlu1 %1806  ;;  %v1809_v34 = vpop.xlane.xlu0 %1808 }
 0x547   :  { %5046 = vpow2.f32 %v1850_v7  ;;  %v1827_v36 = vsub.f32 %v5755_v49, %v1807_v22  ;;  %v1828_v20 = vsub.f32 %v5757_v48, %v1809_v34 }
 0x548   :  { %v5792_v29 = vpop.eup %5034  ;;  %5048 = vpow2.f32 %v1852_v61 }
 0x549   :  { %v5794_v27 = vpop.eup %5036  ;;  %v1854_v40 = vmul.f32 1.442695, %v1827_v36  ;;  %v1856_v16 = vmul.f32 1.442695, %v1828_v20 }
 0x54a   :  { %1870 = vadd.xlane.f32.xlu1 %v5792_v29  ;;  %1872 = vadd.xlane.f32.xlu0 %v5794_v27  ;;  %v1811_v38 = vpop.xlane.xlu1 %1810  ;;  %v1813_v44 = vpop.xlane.xlu0 %1812 }
 0x54b   :  { %5050 = vpow2.f32 %v1854_v40  ;;  %v1829_v43 = vsub.f32 %v5761_v31, %v1811_v38  ;;  %v1830_v42 = vsub.f32 %v5763_v60, %v1813_v44 }
 0x54c   :  { %v5800_v49 = vpop.eup %5038  ;;  %5052 = vpow2.f32 %v1856_v16 }
 0x54d   :  { %v5802_v41 = vpop.eup %5040  ;;  %v1858_v48 = vmul.f32 1.442695, %v1829_v43  ;;  %v1860_v47 = vmul.f32 1.442695, %v1830_v42 }
 0x54e   :  { %1874 = vadd.xlane.f32.xlu1 %v5800_v49  ;;  %1876 = vadd.xlane.f32.xlu0 %v5802_v41  ;;  %v1815_v55 = vpop.xlane.xlu1 %1814 }
 0x54f   :  { %5054 = vpow2.f32 %v1858_v48  ;;  %v1831_v39 = vsub.f32 %v5767_v45, %v1815_v55 }
 0x550   :  { %v5807_v53 = vpop.eup %5042  ;;  %5056 = vpow2.f32 %v1860_v47 }
 0x551   :  { %v5809_v31 = vpop.eup %5044  ;;  %v1862_v60 = vmul.f32 1.442695, %v1831_v39 }
 0x552   :  { %1878 = vadd.xlane.f32.xlu1 %v5807_v53  ;;  %1880 = vadd.xlane.f32.xlu0 %v5809_v31 }
 0x553   :  { %5058 = vpow2.f32 %v1862_v60  ;;  %v3975_v60 = vunpack.c.l.bf16 %v5834_v25 }
 0x554   :  { %v5813_v59 = vpop.eup %5046 }
 0x555   :  { %v5815_v58 = vpop.eup %5048 }
 0x556   :  { %1882 = vadd.xlane.f32.xlu1 %v5813_v59  ;;  %1884 = vadd.xlane.f32.xlu0 %v5815_v58 }
 0x558   :  { %v5819_v45 = vpop.eup %5050 }
 0x559   :  { %v5821_v3 = vpop.eup %5052 }
 0x55a   :  { %1886 = vadd.xlane.f32.xlu1 %v5819_v45  ;;  %1888 = vadd.xlane.f32.xlu0 %v5821_v3 }
 0x55c   :  { %v5825_v57 = vpop.eup %5054 }
 0x55d   :  { %v5827_v11 = vpop.eup %5056 }
 0x55e   :  { %1890 = vadd.xlane.f32.xlu1 %v5825_v57  ;;  %1892 = vadd.xlane.f32.xlu0 %v5827_v11 }
 0x560   :  { %v5831_v4 = vpop.eup %5058 }
 0x562   :  { %1894 = vadd.xlane.f32.xlu1 %v5831_v4 }
 0x5ca   :  { %v1865_v21 = vpop.xlane.xlu0 %1864 }
 0x5cb   :  { %5060 = vrcp.f32 %v1865_v21 }
 0x5ce   :  { %v1869_v63 = vpop.xlane.xlu0 %1868 }
 0x5cf   :  { %v1867_v5 = vpop.xlane.xlu1 %1866  ;;  %5062 = vrcp.f32 %v1869_v63 }
 0x5d0   :  { %5064 = vrcp.f32 %v1867_v5 }
 0x5d3   :  { %v1871_v14 = vpop.xlane.xlu1 %1870  ;;  %v1873_v56 = vpop.xlane.xlu0 %1872 }
 0x5d4   :  { %5066 = vrcp.f32 %v1871_v14 }
 0x5d5   :  { %5068 = vrcp.f32 %v1873_v56 }
 0x5d7   :  { %v1875_v37 = vpop.xlane.xlu1 %1874  ;;  %v1877_v8 = vpop.xlane.xlu0 %1876 }
 0x5d8   :  { %v5061_v12 = vpop.eup %5060  ;;  %5070 = vrcp.f32 %v1875_v37 }
 0x5d9   :  { %5072 = vrcp.f32 %v1877_v8  ;;  %v1912_v28 = vmul.f32 %v5061_v12, %v5779_v35 }
 0x5db   :  { %v1879_v19 = vpop.xlane.xlu1 %1878  ;;  %v1881_v2 = vpop.xlane.xlu0 %1880  ;;  %4821 = vmatprep.mubr.f32.mxu1 %v1912_v28 }
 0x5dc   :  { %v5063_v18 = vpop.eup %5062  ;;  %5074 = vrcp.f32 %v1879_v19 }
 0x5dd   :  { %v5065_v13 = vpop.eup %5064  ;;  %5076 = vrcp.f32 %v1881_v2  ;;  %v1914_v1 = vmul.f32 %v5063_v18, %v5784_v62 }
 0x5de   :  { %v1913_v32 = vmul.f32 %v5065_v13, %v5786_v6 }
 0x5df   :  { %v1883_v54 = vpop.xlane.xlu1 %1882  ;;  %v1885_v24 = vpop.xlane.xlu0 %1884 }
 0x5e0   :  { %5078 = vrcp.f32 %v1883_v54  ;;  %4822 = vmatmul.mubr.f32.vlgmr.msra.gmra.mxu1 %v1913_v32 }
 0x5e1   :  { %v5067_v9 = vpop.eup %5066  ;;  %5080 = vrcp.f32 %v1885_v24  ;;  %4824 = vmatprep.mubr.f32.mxu1 %v1914_v1  ;;  %4846 = vmatpush3.msra.mxu1 %v3976_v52 }
 0x5e2   :  { %v5069_v35 = vpop.eup %5068  ;;  %v1915_v10 = vmul.f32 %v5067_v9, %v5792_v29  ;;  %4847 = vmatprep.subr.mxu1 %v3975_v60 }
 0x5e3   :  { %v1887_v50 = vpop.xlane.xlu1 %1886  ;;  %v1889_v30 = vpop.xlane.xlu0 %1888  ;;  %v1916_v15 = vmul.f32 %v5069_v35, %v5794_v27  ;;  %4848 = vmatpush3.msra.mxu1 %v3975_v60 }
 0x5e4   :  { %5082 = vrcp.f32 %v1887_v50  ;;  %4825 = vmatmul.mubr.f32.gmra.mxu1 %v1915_v10 }
 0x5e5   :  { %v5071_v33 = vpop.eup %5070  ;;  %5084 = vrcp.f32 %v1889_v30  ;;  %4827 = vmatprep.mubr.f32.mxu1 %v1916_v15  ;;  %v2093_v15 = vld [vmem:[#allocation10 + $0x280] sm:$0x1] }
 0x5e6   :  { %v5073_v62 = vpop.eup %5072  ;;  %v1917_v6 = vmul.f32 %v5071_v33, %v5800_v49  ;;  %v2094_v33 = vunpack.c.l.bf16 %v2093_v15 }
 0x5e7   :  { %v1891_v7 = vpop.xlane.xlu1 %1890  ;;  %v1893_v61 = vpop.xlane.xlu0 %1892  ;;  %v1918_v22 = vmul.f32 %v5073_v62, %v5802_v41 }
 0x5e8   :  { %5086 = vrcp.f32 %v1891_v7  ;;  %4828 = vmatmul.mubr.f32.gmra.mxu1 %v1917_v6  ;;  %v2098_v62 = vrot.slane %v2094_v33, %v5331_v23 }
 0x5e9   :  { %v5075_v34 = vpop.eup %5074  ;;  %5088 = vrcp.f32 %v1893_v61  ;;  %4830 = vmatprep.mubr.f32.mxu1 %v1918_v22 }
 0x5ea   :  { %v5077_v36 = vpop.eup %5076  ;;  %v1919_v20 = vmul.f32 %v5075_v34, %v5807_v53 }
 0x5eb   :  { %v1895_v29 = vpop.xlane.xlu1 %1894  ;;  %v1920_v27 = vmul.f32 %v5077_v36, %v5809_v31 }
 0x5ec   :  { %5090 = vrcp.f32 %v1895_v29  ;;  %4831 = vmatmul.mubr.f32.gmra.mxu1 %v1919_v20 }
 0x5ed   :  { %v5079_v40 = vpop.eup %5078  ;;  %4833 = vmatprep.mubr.f32.mxu1 %v1920_v27 }
 0x5ee   :  { %v5081_v16 = vpop.eup %5080  ;;  %v1921_v38 = vmul.f32 %v5079_v40, %v5813_v59  ;;  %v4181_v59 = vld [vmem:[#allocation10 + $0x270] sm:$0xff]  }
 0x5ef   :  { %v1922_v44 = vmul.f32 %v5081_v16, %v5815_v58  ;;  %v3972_v58 = vunpack.c.h.bf16 %v4181_v59 }
 0x5f0   :  { %4834 = vmatmul.mubr.f32.gmra.mxu1 %v1921_v38 }
 0x5f1   :  { %v5083_v43 = vpop.eup %5082  ;;  %4836 = vmatprep.mubr.f32.mxu1 %v1922_v44  ;;  %4849 = vmatprep.subr.mxu1 %v3972_v58 }
 0x5f2   :  { %v5085_v42 = vpop.eup %5084  ;;  %v1923_v49 = vmul.f32 %v5083_v43, %v5819_v45  ;;  %4850 = vmatpush3.msra.mxu1 %v3972_v58  ;;  %v3971_v45 = vunpack.c.l.bf16 %v4181_v59 }
 0x5f3   :  { %v1924_v41 = vmul.f32 %v5085_v42, %v5821_v3 }
 0x5f4   :  { %4837 = vmatmul.mubr.f32.gmra.mxu1 %v1923_v49  ;;  %4851 = vmatprep.subr.mxu1 %v3971_v45 }
 0x5f5   :  { %v5087_v48 = vpop.eup %5086  ;;  %4839 = vmatprep.mubr.f32.mxu1 %v1924_v41  ;;  %4852 = vmatpush3.msra.mxu1 %v3971_v45 }
 0x5f6   :  { %v5089_v47 = vpop.eup %5088  ;;  %v1925_v55 = vmul.f32 %v5087_v48, %v5825_v57 }
 0x5f7   :  { %v1926_v39 = vmul.f32 %v5089_v47, %v5827_v11 }
 0x5f8   :  { %4840 = vmatmul.mubr.f32.gmra.mxu1 %v1925_v55 }
 0x5f9   :  { %v5091_v53 = vpop.eup %5090  ;;  %4842 = vmatprep.mubr.f32.mxu1 %v1926_v39 }
 0x5fa   :  { %v1927_v31 = vmul.f32 %v5091_v53, %v5831_v4 }
 0x5fc   :  { %4843 = vmatmul.mubr.f32.gmra.mxu1 %v1927_v31 }
 0x6a0   :  { %v4823_v3 = vpop.f32.mrf.mxu1 }
 0x6a2   :  { %v1994_v57 = vpop.f32.mrf.mxu1 }
 0x6a4   :  { %v4826_v11 = vpop.f32.mrf.mxu1 }
 0x6a6   :  { %v2004_v52 = vpop.f32.mrf.mxu1 }
 0x6a8   :  { %v4829_v21 = vpop.f32.mrf.mxu1 }
 0x6a9   :  { %v2074_v12 = vadd.f32 %v4829_v21, %v4823_v3 }
 0x6aa   :  { %v2014_v63 = vpop.f32.mrf.mxu1 }
 0x6ab   :  { %v2073_v8 = vadd.f32 %v2014_v63, %v1994_v57  ;;  %v4184_v63 = vld [vmem:[#allocation10 + $0x2a0] sm:$0xff]  }
 0x6ac   :  { %v4832_v5 = vpop.f32.mrf.mxu1 }
 0x6ad   :  { %v2076_v32 = vadd.f32 %v4832_v5, %v4826_v11  ;;  %v3984_v5 = vunpack.c.h.bf16 %v4184_v63 }
 0x6ae   :  { %v2024_v4 = vpop.f32.mrf.mxu1 }
 0x6af   :  { %v2075_v13 = vadd.f32 %v2024_v4, %v2004_v52  ;;  %4859 = vmatprep.subr.mxu1 %v3984_v5  ;;  %v3983_v4 = vunpack.c.l.bf16 %v4184_v63 }
 0x6b0   :  { %v4835_v14 = vpop.f32.mrf.mxu1 }
 0x6b1   :  { %v2078_v2 = vadd.f32 %v4835_v14, %v2074_v12  ;;  %v4183_v14 = vld [vmem:[#allocation10 + $0x298] sm:$0xff]  }
 0x6b2   :  { %v2034_v56 = vpop.f32.mrf.mxu1 }
 0x6b3   :  { %v2077_v19 = vadd.f32 %v2073_v8, %v2034_v56  ;;  %v3980_v56 = vunpack.c.h.bf16 %v4183_v14  ;;  %v4187_v8 = vld [vmem:[#allocation10 + $0x2c0] sm:$0xff]  }
 0x6b4   :  { %v4838_v25 = vpop.f32.mrf.mxu1 }
 0x6b5   :  { %v2080_v35 = vadd.f32 %v4838_v25, %v2076_v32  ;;  %v3979_v25 = vunpack.c.l.bf16 %v4183_v14 }
 0x6b6   :  { %v2044_v37 = vpop.f32.mrf.mxu1 }
 0x6b7   :  { %v2079_v9 = vadd.f32 %v2075_v13, %v2044_v37  ;;  %v4188_v37 = vld [vmem:[#allocation10 + $0x2c8] sm:$0xff]  }
 0x6b8   :  { %v4841_v28 = vpop.f32.mrf.mxu1  ;;  %v4000_v12 = vunpack.c.h.bf16 %v4188_v37 }
 0x6b9   :  { %v2082_v54 = vadd.f32 %v4841_v28, %v2078_v2  ;;  %v3999_v28 = vunpack.c.l.bf16 %v4188_v37  ;;  %v4186_v2 = vld [vmem:[#allocation10 + $0x2b8] sm:$0xff]  }
 0x6ba   :  { %v2054_v18 = vpop.f32.mrf.mxu1  ;;  %4873 = vmatprep.subr.mxu0 %v4000_v12  ;;  %v3992_v13 = vunpack.c.h.bf16 %v4186_v2  ;;  %v3991_v32 = vunpack.c.l.bf16 %v4186_v2 }
 0x6bb   :  { %v2081_v1 = vadd.f32 %v2077_v19, %v2054_v18  ;;  %v3996_v19 = vunpack.c.h.bf16 %v4187_v8  ;;  %4874 = vmatpush3.msra.mxu0 %v4000_v12  ;;  %v3995_v18 = vunpack.c.l.bf16 %v4187_v8 }
 0x6bc   :  { %v4844_v24 = vpop.f32.mrf.mxu1  ;;  %4875 = vmatprep.subr.mxu0 %v3999_v28 }
 0x6bd   :  { %4853 = vmatprep.mubr.msk.f32.mxu1 %vm104_vm1, %v2081_v1  ;;  %v2084_v30 = vadd.f32 %v4844_v24, %v2080_v35  ;;  %4876 = vmatpush3.msra.mxu0 %v3999_v28  ;;  %v4185_v1 = vld [vmem:[#allocation10 + $0x2b0] sm:$0xff]  }
 0x6be   :  { %v2064_v10 = vpop.f32.mrf.mxu1  ;;  %4854 = vmatmul.mubr.msk.f32.vlgmr.msra.gmra.mxu1 %vm104_vm1, %v2082_v54  ;;  %4877 = vmatprep.subr.mxu0 %v3996_v19  ;;  %v3988_v54 = vunpack.c.h.bf16 %v4185_v1 }
 0x6bf   :  { %v2083_v50 = vadd.f32 %v2079_v9, %v2064_v10  ;;  %4860 = vmatpush3.msra.mxu1 %v3984_v5  ;;  %4878 = vmatpush3.msra.mxu0 %v3996_v19 }
 0x6c0   :  { %4861 = vmatprep.subr.mxu1 %v3983_v4  ;;  %4879 = vmatprep.subr.mxu0 %v3995_v18 }
 0x6c1   :  { %4856 = vmatprep.mubr.msk.f32.mxu1 %vm104_vm1, %v2083_v50  ;;  %4862 = vmatpush3.msra.mxu1 %v3983_v4 }
 0x6c2   :  { %4857 = vmatmul.mubr.msk.f32.gmra.mxu1 %vm104_vm1, %v2084_v30  ;;  %4863 = vmatprep.subr.mxu1 %v3980_v56 }
 0x6c3   :  { %4864 = vmatpush3.msra.mxu1 %v3980_v56  ;;  %4880 = vmatpush3.msra.mxu0 %v3995_v18 }
 0x6c4   :  { %4865 = vmatprep.subr.mxu1 %v3979_v25  ;;  %4881 = vmatprep.subr.mxu0 %v3992_v13 }
 0x6c5   :  { %4866 = vmatpush3.msra.mxu1 %v3979_v25  ;;  %4882 = vmatpush3.msra.mxu0 %v3992_v13  ;;  %v2404_v25 = vld [vmem:[#allocation10 + $0x2d0] sm:$0x1] }
 0x6c6   :  { %4895 = vmatprep.subr.mxu1 %v5251_v0  ;;  %4883 = vmatprep.subr.mxu0 %v3991_v32  ;;  %v2405_v37 = vunpack.c.l.bf16 %v2404_v25 }
 0x6c7   :  { %4884 = vmatpush3.msra.mxu0 %v3991_v32 }
 0x6c8   :  { %4885 = vmatprep.subr.mxu0 %v3988_v54  ;;  %v2409_v8 = vrot.slane %v2405_v37, %v5331_v23 }
 0x6c9   :  { %4886 = vmatpush3.msra.mxu0 %v3988_v54 }
 0x77e   :  { %v4855_v6 = vpop.f32.mrf.mxu1 }
 0x77f   :  { %v2183_v7 = vadd.f32 %v4855_v6, %v2098_v62 }
 0x780   :  { %v2177_v61 = vpop.f32.mrf.mxu1 }
 0x781   :  { %v2178_v22 = vadd.f32 %v2177_v61, %v2098_v62  ;;  %v2197_v34 = vadd.f32 %v2183_v7, %v5341_v51 }
 0x782   :  { %v4858_v36 = vpop.f32.mrf.mxu1 }
 0x783   :  { %v2193_v20 = vadd.f32 %v4858_v36, %v2098_v62  ;;  %v2207_v29 = vsel %vm104_vm1, %v2197_v34, 0.0  ;;  %v2196_v27 = vadd.f32 %v2178_v22, %v5334_v26  ;;  %v2200_v22 = vld [vmem:[#allocation10 + $0x288] sm:$0x1]  ;;  %v2202_v36 = vld [vmem:[#allocation10 + $0x290] sm:$0x1] }
 0x784   :  { %2208 = vadd.xlane.f32.xlu1 %v2207_v29  ;;  %v2187_v40 = vpop.f32.mrf.mxu1 }
 0x785   :  { %v2188_v16 = vadd.f32 %v2187_v40, %v2098_v62  ;;  %v2204_v38 = vsel %vm104_vm1, %v2196_v27, 0.0  ;;  %v2199_v44 = vadd.f32 %v2193_v20, %v5369_v17 }
 0x786   :  { %2205 = vadd.xlane.f32.xlu0 %v2204_v38 }
 0x787   :  { %v2213_v43 = vsel %vm104_vm1, %v2199_v44, 0.0  ;;  %v2198_v42 = vadd.f32 %v2188_v16, %v5356_v46 }
 0x788   :  { %2214 = vadd.xlane.f32.xlu1 %v2213_v43 }
 0x789   :  { %v2210_v51 = vsel %vm104_vm1, %v2198_v42, 0.0 }
 0x78a   :  { %2211 = vadd.xlane.f32.xlu0 %v2210_v51 }
 0x80d   :  { %v2209_v49 = vpop.xlane.xlu1 %2208 }
 0x80e   :  { %v2218_v41 = vmul.f32 0.03125, %v2209_v49 }
 0x80f   :  { %v2206_v48 = vpop.xlane.xlu0 %2205 }
 0x810   :  { %v5867_v26 = vsub.f32 %v2197_v34, %v2218_v41  ;;  %v2217_v47 = vmul.f32 0.03125, %v2206_v48  ;;  %v2201_v34 = vunpack.c.l.bf16 %v2200_v22 }
 0x811   :  { %v2215_v55 = vpop.xlane.xlu1 %2214 }
 0x812   :  { %v5869_v39 = vsub.f32 %v2196_v27, %v2217_v47  ;;  %v2220_v53 = vmul.f32 0.03125, %v2215_v55  ;;  %v2226_v17 = vmul.f32 %v5867_v26, %v5867_v26  ;;  %v5889_v29 = vrot.slane %v2201_v34, %v5331_v23 }
 0x813   :  { %v2212_v31 = vpop.xlane.xlu0 %2211  ;;  %v2203_v27 = vunpack.c.l.bf16 %v2202_v36 }
 0x814   :  { %v5873_v60 = vsub.f32 %v2199_v44, %v2220_v53  ;;  %v2219_v46 = vmul.f32 0.03125, %v2212_v31  ;;  %v2232_v59 = vsel %vm104_vm1, %v2226_v17, 0.0  ;;  %v2225_v58 = vmul.f32 %v5869_v39, %v5869_v39 }
 0x815   :  { %2233 = vadd.xlane.f32.xlu1 %v2232_v59  ;;  %v3987_v31 = vunpack.c.l.bf16 %v4185_v1 }
 0x816   :  { %v5878_v45 = vsub.f32 %v2198_v42, %v2219_v46  ;;  %v2229_v3 = vsel %vm104_vm1, %v2225_v58, 0.0  ;;  %v2228_v57 = vmul.f32 %v5873_v60, %v5873_v60  ;;  %v5895_v42 = vrot.slane %v2203_v27, %v5331_v23 }
 0x817   :  { %2230 = vadd.xlane.f32.xlu0 %v2229_v3  ;;  %4887 = vmatprep.subr.mxu0 %v3987_v31 }
 0x818   :  { %v2238_v11 = vsel %vm104_vm1, %v2228_v57, 0.0  ;;  %v2227_v52 = vmul.f32 %v5878_v45, %v5878_v45  ;;  %4888 = vmatpush3.msra.mxu0 %v3987_v31 }
 0x819   :  { %2239 = vadd.xlane.f32.xlu1 %v2238_v11  ;;  %4906 = vmatprep.subr.mxu0 %v5251_v0 }
 0x81a   :  { %v2235_v21 = vsel %vm104_vm1, %v2227_v52, 0.0 }
 0x81b   :  { %2236 = vadd.xlane.f32.xlu0 %v2235_v21 }
 0x89e   :  { %v2234_v24 = vpop.xlane.xlu1 %2233 }
 0x89f   :  { %v2242_v9 = vmul.f32 0.03125, %v2234_v24 }
 0x8a0   :  { %v2231_v35 = vpop.xlane.xlu0 %2230 }
 0x8a1   :  { %v2246_v10 = vadd.f32 1e-05, %v2242_v9  ;;  %v2241_v50 = vmul.f32 0.03125, %v2231_v35 }
 0x8a2   :  { %v2240_v30 = vpop.xlane.xlu1 %2239 }
 0x8a3   :  { %5092 = vrsqrt.f32 %v2246_v10  ;;  %v2245_v15 = vadd.f32 1e-05, %v2241_v50  ;;  %v2244_v33 = vmul.f32 0.03125, %v2240_v30 }
 0x8a4   :  { %v2237_v62 = vpop.xlane.xlu0 %2236 }
 0x8a5   :  { %5094 = vrsqrt.f32 %v2245_v15  ;;  %v2248_v6 = vadd.f32 1e-05, %v2244_v33  ;;  %v2243_v7 = vmul.f32 0.03125, %v2237_v62 }
 0x8a7   :  { %5096 = vrsqrt.f32 %v2248_v6  ;;  %v2247_v61 = vadd.f32 1e-05, %v2243_v7 }
 0x8a9   :  { %5098 = vrsqrt.f32 %v2247_v61 }
 0x8b0   :  { %v5093_v20 = vpop.eup %5092 }
 0x8b1   :  { %v2254_v40 = vmul.f32 %v5093_v20, %v5867_v26 }
 0x8b2   :  { %v5095_v16 = vpop.eup %5094 }
 0x8b3   :  { %v2253_v38 = vmul.f32 %v5095_v16, %v5869_v39  ;;  %v2262_v43 = vmul.f32 %v5889_v29, %v2254_v40 }
 0x8b4   :  { %v5097_v44 = vpop.eup %5096 }
 0x8b5   :  { %v2261_v51 = vmul.f32 %v5889_v29, %v2253_v38  ;;  %v2256_v49 = vmul.f32 %v5097_v44, %v5873_v60  ;;  %v2270_v26 = vadd.f32 %v5895_v42, %v2262_v43  ;;  %v2281_v60 = vld [vmem:[#allocation10 + $0x2a8] sm:$0x1] }
 0x8b6   :  { %v5099_v41 = vpop.eup %5098  ;;  %v2282_v46 = vunpack.c.l.bf16 %v2281_v60 }
 0x8b7   :  { %v2269_v48 = vadd.f32 %v5895_v42, %v2261_v51  ;;  %v2255_v47 = vmul.f32 %v5099_v41, %v5878_v45  ;;  %v2264_v55 = vmul.f32 %v5889_v29, %v2256_v49 }
 0x8b8   :  { %v2286_v59 = vrot.slane %v2282_v46, %v5331_v23 }
 0x8b9   :  { %4867 = vmatprep.mubr.msk.f32.mxu1 %vm104_vm1, %v2269_v48  ;;  %v2263_v39 = vmul.f32 %v5889_v29, %v2255_v47  ;;  %v2272_v17 = vadd.f32 %v5895_v42, %v2264_v55 }
 0x8ba   :  { %4868 = vmatmul.mubr.msk.f32.vlgmr.msra.gmra.mxu1 %vm104_vm1, %v2270_v26 }
 0x8bb   :  { %v2271_v53 = vadd.f32 %v5895_v42, %v2263_v39 }
 0x8bd   :  { %4870 = vmatprep.mubr.msk.f32.mxu1 %vm104_vm1, %v2271_v53 }
 0x8be   :  { %4871 = vmatmul.mubr.msk.f32.gmra.mxu1 %vm104_vm1, %v2272_v17 }
 0x8bf   :  { %4903 = vmatprep.mubr.msk.f32.mxu1 %vm5252_vm0, %v5251_v0 }
 0x97a   :  { %v4869_v58 = vpop.f32.mrf.mxu1 }
 0x97b   :  { %v2371_v45 = vadd.f32 %v4869_v58, %v2286_v59 }
 0x97c   :  { %v2365_v3 = vpop.f32.mrf.mxu1 }
 0x97d   :  { %v2366_v57 = vadd.f32 %v2365_v3, %v2286_v59  ;;  %v2385_v21 = vmax.f32 %v2371_v45, 0.0 }
 0x97e   :  { %v4872_v11 = vpop.f32.mrf.mxu1 }
 0x97f   :  { %v2384_v52 = vmax.f32 %v2366_v57, 0.0  ;;  %v2381_v63 = vadd.f32 %v4872_v11, %v2286_v59 }
 0x980   :  { %v2375_v5 = vpop.f32.mrf.mxu1 }
 0x981   :  { %v2376_v4 = vadd.f32 %v2375_v5, %v2286_v59  ;;  %4889 = vmatprep.mubr.msk.f32.mxu0 %vm380_vm3, %v2384_v52  ;;  %v2387_v56 = vmax.f32 %v2381_v63, 0.0 }
 0x982   :  { %4890 = vmatmul.mubr.msk.f32.vlgmr.msra.gmra.mxu0 %vm380_vm3, %v2385_v21 }
 0x983   :  { %v2386_v14 = vmax.f32 %v2376_v4, 0.0 }
 0x985   :  { %4892 = vmatprep.mubr.msk.f32.mxu0 %vm380_vm3, %v2386_v14 }
 0x986   :  { %4893 = vmatmul.mubr.msk.f32.gmra.mxu0 %vm380_vm3, %v2387_v56 }
 0x987   :  { %4914 = vmatprep.mubr.msk.f32.mxu0 %vm5252_vm0, %v5251_v0 }
 0xa42   :  { %v4891_v12 = vpop.f32.mrf.mxu0 }
 0xa43   :  { %v2494_v28 = vadd.f32 %v4891_v12, %v2409_v8 }
 0xa44   :  { %v2488_v19 = vpop.f32.mrf.mxu0 }
 0xa45   :  { %v2489_v2 = vadd.f32 %v2488_v19, %v2409_v8  ;;  %v2508_v18 = vadd.f32 %v2494_v28, %v2270_v26  ;;  %v4190_v26 = vld [vmem:[#allocation10 + $0x368] sm:$0xff]  }
 0xa46   :  { %v4894_v13 = vpop.f32.mrf.mxu0  ;;  %v4008_v55 = vunpack.c.h.bf16 %v4190_v26  ;;  %v4007_v39 = vunpack.c.l.bf16 %v4190_v26  ;;  %v4195_v26 = vld [vmem:[#allocation10 + $0x3b0] sm:$0xff]  }
 0xa47   :  { %v2504_v1 = vadd.f32 %v4894_v13, %v2409_v8  ;;  %v2514_v32 = vsel %vm104_vm1, %v2508_v18, 0.0  ;;  %v2507_v54 = vadd.f32 %v2489_v2, %v2269_v48  ;;  %v2575_v13 = vld [vmem:[#allocation10 + $0x2d8] sm:$0x1] }
 0xa48   :  { %2515 = vadd.xlane.f32.xlu1 %v2514_v32  ;;  %v2498_v24 = vpop.f32.mrf.mxu0  ;;  %4896 = vmatpush3.msra.mxu1 %v4008_v55 }
 0xa49   :  { %v2499_v9 = vadd.f32 %v2498_v24, %v2409_v8  ;;  %v2511_v35 = vsel %vm104_vm1, %v2507_v54, 0.0  ;;  %v2510_v10 = vadd.f32 %v2504_v1, %v2272_v17  ;;  %4897 = vmatprep.subr.mxu1 %v5251_v0 }
 0xa4a   :  { %2512 = vadd.xlane.f32.xlu0 %v2511_v35  ;;  %4898 = vmatpush3.msra.mxu1 %v4007_v39  ;;  %v2576_v35 = vunpack.c.l.bf16 %v2575_v13 }
 0xa4b   :  { %v2520_v50 = vsel %vm104_vm1, %v2510_v10, 0.0  ;;  %v2509_v30 = vadd.f32 %v2499_v9, %v2271_v53  ;;  %v4189_v53 = vld [vmem:[#allocation10 + $0x360] sm:$0xff]   ;;  %4899 = vmatprep.subr.mxu1 %v5251_v0 }
 0xa4c   :  { %2521 = vadd.xlane.f32.xlu1 %v2520_v50  ;;  %v4004_v17 = vunpack.c.h.bf16 %v4189_v53  ;;  %v4003_v31 = vunpack.c.l.bf16 %v4189_v53  ;;  %v4028_v53 = vunpack.c.h.bf16 %v4195_v26 }
 0xa4d   :  { %v2517_v15 = vsel %vm104_vm1, %v2509_v30, 0.0 }
 0xa4e   :  { %2518 = vadd.xlane.f32.xlu0 %v2517_v15  ;;  %4900 = vmatpush3.msra.mxu1 %v4004_v17  ;;  %v2580_v15 = vrot.slane %v2576_v35, %v5331_v23  ;;  %v4194_v17 = vld [vmem:[#allocation10 + $0x3a8] sm:$0xff]  }
 0xa4f   :  { %4901 = vmatprep.subr.mxu1 %v5251_v0 }
 0xa50   :  { %4902 = vmatpush3.msra.mxu1 %v4003_v31  ;;  %v4027_v31 = vunpack.c.l.bf16 %v4195_v26 }
 0xa51   :  { %4917 = vmatprep.subr.mxu1 %v5251_v0 }
 0xad1   :  { %v2516_v33 = vpop.xlane.xlu1 %2515 }
 0xad2   :  { %v2524_v62 = vmul.f32 0.03125, %v2516_v33 }
 0xad3   :  { %v2513_v6 = vpop.xlane.xlu0 %2512 }
 0xad4   :  { %v2528_v7 = vsub.f32 %v2508_v18, %v2524_v62  ;;  %v2523_v61 = vmul.f32 0.03125, %v2513_v6  ;;  %v2590_v6 = vld [vmem:[#allocation10 + $0x370] sm:$0x1] }
 0xad5   :  { %v2522_v22 = vpop.xlane.xlu1 %2521 }
 0xad6   :  { %v2527_v34 = vsub.f32 %v2507_v54, %v2523_v61  ;;  %v2526_v36 = vmul.f32 0.03125, %v2522_v22  ;;  %v2532_v20 = vmul.f32 %v2528_v7, %v2528_v7 }
 0xad7   :  { %v2519_v27 = vpop.xlane.xlu0 %2518 }
 0xad8   :  { %v2530_v40 = vsub.f32 %v2510_v10, %v2526_v36  ;;  %v2525_v16 = vmul.f32 0.03125, %v2519_v27  ;;  %v2538_v38 = vsel %vm104_vm1, %v2532_v20, 0.0  ;;  %v2531_v44 = vmul.f32 %v2527_v34, %v2527_v34 }
 0xad9   :  { %2539 = vadd.xlane.f32.xlu1 %v2538_v38 }
 0xada   :  { %v2529_v43 = vsub.f32 %v2509_v30, %v2525_v16  ;;  %v2535_v51 = vsel %vm104_vm1, %v2531_v44, 0.0  ;;  %v2534_v49 = vmul.f32 %v2530_v40, %v2530_v40  ;;  %v4192_v44 = vld [vmem:[#allocation10 + $0x390] sm:$0xff]  }
 0xadb   :  { %2536 = vadd.xlane.f32.xlu0 %v2535_v51  ;;  %v4015_v51 = vunpack.c.l.bf16 %v4192_v44 }
 0xadc   :  { %v2544_v41 = vsel %vm104_vm1, %v2534_v49, 0.0  ;;  %v2533_v48 = vmul.f32 %v2529_v43, %v2529_v43  ;;  %v4191_v49 = vld [vmem:[#allocation10 + $0x388] sm:$0xff]  }
 0xadd   :  { %2545 = vadd.xlane.f32.xlu1 %v2544_v41  ;;  %v4012_v41 = vunpack.c.h.bf16 %v4191_v49 }
 0xade   :  { %v2541_v47 = vsel %vm104_vm1, %v2533_v48, 0.0  ;;  %v4011_v48 = vunpack.c.l.bf16 %v4191_v49 }
 0xadf   :  { %2542 = vadd.xlane.f32.xlu0 %v2541_v47  ;;  %v4196_v47 = vld [vmem:[#allocation10 + $0x3b8] sm:$0xff]  }
 0xae0   :  { %v4032_v55 = vunpack.c.h.bf16 %v4196_v47  ;;  %v4031_v39 = vunpack.c.l.bf16 %v4196_v47 }
 0xb62   :  { %v2540_v60 = vpop.xlane.xlu1 %2539 }
 0xb63   :  { %v2548_v46 = vmul.f32 0.03125, %v2540_v60  ;;  %v4024_v60 = vunpack.c.h.bf16 %v4194_v17 }
 0xb64   :  { %v2537_v59 = vpop.xlane.xlu0 %2536 }
 0xb65   :  { %v2552_v58 = vadd.f32 1e-05, %v2548_v46  ;;  %v2547_v45 = vmul.f32 0.03125, %v2537_v59 }
 0xb66   :  { %v2546_v3 = vpop.xlane.xlu1 %2545 }
 0xb67   :  { %5100 = vrsqrt.f32 %v2552_v58  ;;  %v2551_v57 = vadd.f32 1e-05, %v2547_v45  ;;  %v2550_v11 = vmul.f32 0.03125, %v2546_v3  ;;  %v2670_v45 = vld [vmem:[#allocation10 + $0x378] sm:$0x1] }
 0xb68   :  { %v2543_v52 = vpop.xlane.xlu0 %2542  ;;  %v2672_v3 = vld [vmem:[#allocation10 + $0x380] sm:$0x1] }
 0xb69   :  { %5102 = vrsqrt.f32 %v2551_v57  ;;  %v2554_v21 = vadd.f32 1e-05, %v2550_v11  ;;  %v2549_v63 = vmul.f32 0.03125, %v2543_v52  ;;  %v2671_v57 = vunpack.c.l.bf16 %v2670_v45 }
 0xb6a   :  { %v2673_v11 = vunpack.c.l.bf16 %v2672_v3 }
 0xb6b   :  { %5104 = vrsqrt.f32 %v2554_v21  ;;  %v2553_v5 = vadd.f32 1e-05, %v2549_v63  ;;  %v2690_v52 = vrot.slane %v2671_v57, %v5331_v23 }
 0xb6d   :  { %5106 = vrsqrt.f32 %v2553_v5  ;;  %v2695_v5 = vrot.slane %v2673_v11, %v5331_v23 }
 0xb74   :  { %v5101_v4 = vpop.eup %5100 }
 0xb75   :  { %v2560_v14 = vmul.f32 %v5101_v4, %v2528_v7  ;;  %v2591_v7 = vunpack.c.l.bf16 %v2590_v6 }
 0xb76   :  { %v5103_v56 = vpop.eup %5102 }
 0xb77   :  { %v2559_v25 = vmul.f32 %v5103_v56, %v2527_v34  ;;  %v2564_v8 = vmul.f32 %v2560_v14, %v5889_v29  ;;  %v4023_v56 = vunpack.c.l.bf16 %v4194_v17 }
 0xb78   :  { %v5105_v37 = vpop.eup %5104 }
 0xb79   :  { %v2563_v12 = vmul.f32 %v2559_v25, %v5889_v29  ;;  %v2562_v28 = vmul.f32 %v5105_v37, %v2530_v40  ;;  %v2568_v1 = vadd.f32 %v2564_v8, %v5895_v42  ;;  %v4193_v25 = vld [vmem:[#allocation10 + $0x3a0] sm:$0xff]  }
 0xb7a   :  { %v5107_v19 = vpop.eup %5106  ;;  %v4020_v37 = vunpack.c.h.bf16 %v4193_v25  ;;  %v4019_v8 = vunpack.c.l.bf16 %v4193_v25  ;;  %v4203_v25 = vld [vmem:[#allocation10 + $0x428] sm:$0xff]  }
 0xb7b   :  { %v2567_v2 = vadd.f32 %v2563_v12, %v5895_v42  ;;  %v2561_v18 = vmul.f32 %v5107_v19, %v2529_v43  ;;  %v2566_v32 = vmul.f32 %v2562_v28, %v5889_v29  ;;  %v4016_v43 = vunpack.c.h.bf16 %v4192_v44  ;;  %v2705_v12 = vld [vmem:[#allocation10 + $0x398] sm:$0x1] }
 0xb7c   :  { %v2706_v28 = vunpack.c.l.bf16 %v2705_v12  ;;  %v4060_v12 = vunpack.c.h.bf16 %v4203_v25 }
 0xb7d   :  { %v2565_v54 = vmul.f32 %v2561_v18, %v5889_v29  ;;  %v2571_v24 = vadd.f32 %v2568_v1, %v2567_v2  ;;  %v2570_v10 = vadd.f32 %v2566_v32, %v5895_v42  ;;  %v2595_v29 = vrot.slane %v2591_v7, %v5331_v23  ;;  %4907 = vmatpush3.msra.mxu0 %v4016_v43  ;;  %v2801_v32 = vld [vmem:[#allocation10 + $0x3c0] sm:$0x1] }
 0xb7e   :  { %4908 = vmatprep.subr.mxu0 %v5251_v0  ;;  %v2710_v19 = vrot.slane %v2706_v28, %v5331_v23  ;;  %v4202_v28 = vld [vmem:[#allocation10 + $0x420] sm:$0xff]  }
 0xb7f   :  { %v2569_v9 = vadd.f32 %v2565_v54, %v5895_v42  ;;  %4909 = vmatpush3.msra.mxu0 %v4015_v51  ;;  %v2802_v54 = vunpack.c.l.bf16 %v2801_v32  ;;  %v2996_v32 = vld [vmem:[#allocation10 + $0x3f0] sm:$0x1] }
 0xb80   :  { %4910 = vmatprep.subr.mxu0 %v5251_v0 }
 0xb81   :  { %v2572_v50 = vadd.f32 %v2571_v24, %v2569_v9  ;;  %4911 = vmatpush3.msra.mxu0 %v4012_v41  ;;  %v2806_v24 = vrot.slane %v2802_v54, %v5331_v23  ;;  %v2998_v54 = vld [vmem:[#allocation10 + $0x3f8] sm:$0x1] }
 0xb82   :  { %4912 = vmatprep.subr.mxu0 %v5251_v0 }
 0xb83   :  { %v2573_v30 = vadd.f32 %v2572_v50, %v2570_v10  ;;  %4913 = vmatpush3.msra.mxu0 %v4011_v48 }
 0xb84   :  { %4936 = vmatprep.subr.mxu0 %v5251_v0 }
 0xb85   :  { %v2574_v33 = vmul.f32 0.25, %v2573_v30 }
 0xb87   :  { %v2581_v62 = vadd.f32 %v2580_v15, %v2574_v33 }
 0xb89   :  { %4904 = vmatmul.mubr.msk.f32.vlgmr.msra.gmra.mxu1 %vm104_vm1, %v2581_v62 }
 0xb8a   :  { %4933 = vmatprep.mubr.msk.f32.mxu1 %vm5252_vm0, %v5251_v0  ;;  %4918 = vmatpush3.msra.mxu1 %v4032_v55  ;;  %v2916_v55 = vld [vmem:[#allocation10 + $0x3e8] sm:$0x1] }
 0xb8b   :  { %4919 = vmatprep.subr.mxu1 %v5251_v0 }
 0xb8c   :  { %4920 = vmatpush3.msra.mxu1 %v4031_v39  ;;  %v2917_v39 = vunpack.c.l.bf16 %v2916_v55 }
 0xb8d   :  { %4921 = vmatprep.subr.mxu1 %v5251_v0 }
 0xb8e   :  { %4922 = vmatpush3.msra.mxu1 %v4028_v53  ;;  %v2921_v53 = vrot.slane %v2917_v39, %v5331_v23 }
 0xb8f   :  { %4923 = vmatprep.subr.mxu1 %v5251_v0 }
 0xb90   :  { %4924 = vmatpush3.msra.mxu1 %v4027_v31 }
 0xb91   :  { %4925 = vmatprep.subr.mxu1 %v5251_v0 }
 0xb92   :  { %4926 = vmatpush3.msra.mxu1 %v4024_v60 }
 0xb93   :  { %4927 = vmatprep.subr.mxu1 %v5251_v0 }
 0xb94   :  { %4928 = vmatpush3.msra.mxu1 %v4023_v56  ;;  %v4204_v56 = vld [vmem:[#allocation10 + $0x430] sm:$0xff]  }
 0xb95   :  { %4929 = vmatprep.subr.mxu1 %v5251_v0 }
 0xb96   :  { %4930 = vmatpush3.msra.mxu1 %v4020_v37  ;;  %v4064_v37 = vunpack.c.h.bf16 %v4204_v56 }
 0xb97   :  { %4931 = vmatprep.subr.mxu1 %v5251_v0 }
 0xb98   :  { %4932 = vmatpush3.msra.mxu1 %v4019_v8  ;;  %v4063_v8 = vunpack.c.l.bf16 %v4204_v56  ;;  %v4210_v56 = vld [vmem:[#allocation10 + $0x480] sm:$0xff]  }
 0xb99   :  { %4958 = vmatprep.subr.mxu1 %v5251_v0 }
 0xc49   :  { %v2665_v61 = vpop.f32.mrf.mxu1 }
 0xc4a   :  { %v2666_v22 = vadd.f32 %v2665_v61, %v2595_v29  ;;  %v4198_v29 = vld [vmem:[#allocation10 + $0x3e0] sm:$0xff]  }
 0xc4b   :  { %v4905_v34 = vpop.f32.mrf.mxu1  ;;  %v4040_v61 = vunpack.c.h.bf16 %v4198_v29 }
 0xc4c   :  { %v2669_v36 = vadd.f32 %v2666_v22, %v2581_v62  ;;  %v4039_v22 = vunpack.c.l.bf16 %v4198_v29  ;;  %v4197_v34 = vld [vmem:[#allocation10 + $0x3d8] sm:$0xff]  }
 0xc4e   :  { %v2674_v42 = vsel %vm104_vm1, %v2669_v36, 0.0 }
 0xc4f   :  { %2675 = vadd.xlane.f32.xlu0 %v2674_v42  ;;  %v4035_v42 = vunpack.c.l.bf16 %v4197_v34 }
 0xcd8   :  { %v2676_v20 = vpop.xlane.xlu0 %2675 }
 0xcd9   :  { %v2677_v27 = vmul.f32 0.03125, %v2676_v20 }
 0xcdb   :  { %v2678_v40 = vsub.f32 %v2669_v36, %v2677_v27  ;;  %v4036_v36 = vunpack.c.h.bf16 %v4197_v34 }
 0xcdd   :  { %v2679_v16 = vmul.f32 %v2678_v40, %v2678_v40 }
 0xcdf   :  { %v2680_v38 = vsel %vm104_vm1, %v2679_v16, 0.0  ;;  %v2881_v16 = vld [vmem:[#allocation10 + $0x3c8] sm:$0x1] }
 0xce0   :  { %2681 = vadd.xlane.f32.xlu1 %v2680_v38  ;;  %v2883_v38 = vld [vmem:[#allocation10 + $0x3d0] sm:$0x1]  ;;  %v2882_v44 = vunpack.c.l.bf16 %v2881_v16 }
 0xce1   :  { %v2884_v43 = vunpack.c.l.bf16 %v2883_v38 }
 0xce2   :  { %v2901_v51 = vrot.slane %v2882_v44, %v5331_v23 }
 0xce3   :  { %v2906_v48 = vrot.slane %v2884_v43, %v5331_v23 }
 0xd69   :  { %v2682_v46 = vpop.xlane.xlu1 %2681 }
 0xd6a   :  { %v2683_v59 = vmul.f32 0.03125, %v2682_v46 }
 0xd6c   :  { %v2684_v58 = vadd.f32 1e-05, %v2683_v59 }
 0xd6e   :  { %5108 = vrsqrt.f32 %v2684_v58 }
 0xd7b   :  { %v5109_v21 = vpop.eup %5108 }
 0xd7c   :  { %v2686_v63 = vmul.f32 %v5109_v21, %v2678_v40 }
 0xd7e   :  { %v2691_v4 = vmul.f32 %v2690_v52, %v2686_v63  ;;  %v4200_v52 = vld [vmem:[#allocation10 + $0x408] sm:$0xff]  }
 0xd7f   :  { %v4048_v21 = vunpack.c.h.bf16 %v4200_v52  ;;  %v4047_v63 = vunpack.c.l.bf16 %v4200_v52 }
 0xd80   :  { %v2696_v14 = vadd.f32 %v2695_v5, %v2691_v4  ;;  %v4199_v5 = vld [vmem:[#allocation10 + $0x400] sm:$0xff]  }
 0xd81   :  { %v4044_v4 = vunpack.c.h.bf16 %v4199_v5 }
 0xd82   :  { %4915 = vmatmul.mubr.msk.f32.vlgmr.msra.gmra.mxu0 %vm104_vm1, %v2696_v14 }
 0xd83   :  { %4944 = vmatprep.mubr.msk.f32.mxu0 %vm5252_vm0, %v5251_v0  ;;  %4937 = vmatpush3.msra.mxu0 %v4040_v61  ;;  %v3031_v61 = vld [vmem:[#allocation10 + $0x410] sm:$0x1] }
 0xd84   :  { %4938 = vmatprep.subr.mxu0 %v5251_v0 }
 0xd85   :  { %4939 = vmatpush3.msra.mxu0 %v4039_v22  ;;  %v3032_v22 = vunpack.c.l.bf16 %v3031_v61 }
 0xd86   :  { %4940 = vmatprep.subr.mxu0 %v5251_v0 }
 0xd87   :  { %4941 = vmatpush3.msra.mxu0 %v4036_v36  ;;  %v3036_v34 = vrot.slane %v3032_v22, %v5331_v23 }
 0xd88   :  { %4942 = vmatprep.subr.mxu0 %v5251_v0 }
 0xd89   :  { %4943 = vmatpush3.msra.mxu0 %v4035_v42 }
 0xd8a   :  { %4947 = vmatprep.subr.mxu0 %v5251_v0 }
 0xe42   :  { %v2780_v2 = vpop.f32.mrf.mxu0 }
 0xe43   :  { %v2781_v18 = vadd.f32 %v2780_v2, %v2710_v19  ;;  %v4059_v19 = vunpack.c.l.bf16 %v4203_v25  ;;  %v4056_v2 = vunpack.c.h.bf16 %v4202_v28 }
 0xe44   :  { %v4916_v13 = vpop.f32.mrf.mxu0 }
 0xe45   :  { %v2784_v1 = vmax.f32 %v2781_v18, 0.0 }
 0xe47   :  { %4934 = vmatmul.mubr.msk.f32.vlgmr.msra.gmra.mxu1 %vm380_vm3, %v2784_v1 }
 0xe48   :  { %4974 = vmatprep.mubr.msk.f32.mxu1 %vm5252_vm0, %v5251_v0  ;;  %4959 = vmatpush3.msra.mxu1 %v4064_v37  ;;  %v4088_v37 = vunpack.c.h.bf16 %v4210_v56 }
 0xe49   :  { %4960 = vmatprep.subr.mxu1 %v5251_v0 }
 0xe4a   :  { %4961 = vmatpush3.msra.mxu1 %v4063_v8 }
 0xe4b   :  { %4962 = vmatprep.subr.mxu1 %v5251_v0 }
 0xe4c   :  { %4963 = vmatpush3.msra.mxu1 %v4060_v12  ;;  %v4209_v12 = vld [vmem:[#allocation10 + $0x478] sm:$0xff]  }
 0xe4d   :  { %4964 = vmatprep.subr.mxu1 %v5251_v0 }
 0xe4e   :  { %4965 = vmatpush3.msra.mxu1 %v4059_v19  ;;  %v4084_v19 = vunpack.c.h.bf16 %v4209_v12 }
 0xe4f   :  { %4966 = vmatprep.subr.mxu1 %v5251_v0 }
 0xe50   :  { %4967 = vmatpush3.msra.mxu1 %v4056_v2  ;;  %v4208_v2 = vld [vmem:[#allocation10 + $0x470] sm:$0xff]  }
 0xe51   :  { %4968 = vmatprep.subr.mxu1 %v5251_v0 }
 0xf07   :  { %v2876_v9 = vpop.f32.mrf.mxu1 }
 0xf08   :  { %v2877_v35 = vadd.f32 %v2876_v9, %v2806_v24  ;;  %v2997_v24 = vunpack.c.l.bf16 %v2996_v32  ;;  %v2999_v9 = vunpack.c.l.bf16 %v2998_v54  ;;  %v4207_v32 = vld [vmem:[#allocation10 + $0x468] sm:$0xff]  }
 0xf09   :  { %v4935_v10 = vpop.f32.mrf.mxu1  ;;  %v4076_v54 = vunpack.c.h.bf16 %v4207_v32 }
 0xf0a   :  { %v2880_v50 = vadd.f32 %v2877_v35, %v2696_v14  ;;  %v4043_v14 = vunpack.c.l.bf16 %v4199_v5  ;;  %v3016_v35 = vrot.slane %v2997_v24, %v5331_v23  ;;  %v4075_v24 = vunpack.c.l.bf16 %v4207_v32 }
 0xf0c   :  { %v2885_v30 = vsel %vm104_vm1, %v2880_v50, 0.0 }
 0xf0d   :  { %2886 = vadd.xlane.f32.xlu0 %v2885_v30  ;;  %v3021_v30 = vrot.slane %v2999_v9, %v5331_v23  ;;  %v4212_v9 = vld [vmem:[#allocation10 + $0x498] sm:$0xff]  }
 0xf96   :  { %v2887_v15 = vpop.xlane.xlu0 %2886 }
 0xf97   :  { %v2888_v33 = vmul.f32 0.03125, %v2887_v15 }
 0xf99   :  { %v2889_v62 = vsub.f32 %v2880_v50, %v2888_v33 }
 0xf9b   :  { %v2890_v6 = vmul.f32 %v2889_v62, %v2889_v62 }
 0xf9d   :  { %v2891_v7 = vsel %vm104_vm1, %v2890_v6, 0.0  ;;  %v4201_v6 = vld [vmem:[#allocation10 + $0x418] sm:$0xff]  }
 0xf9e   :  { %2892 = vadd.xlane.f32.xlu1 %v2891_v7  ;;  %v4052_v7 = vunpack.c.h.bf16 %v4201_v6  ;;  %v4051_v29 = vunpack.c.l.bf16 %v4201_v6 }
0x1027   :  { %v2893_v20 = vpop.xlane.xlu1 %2892 }
0x1028   :  { %v2894_v27 = vmul.f32 0.03125, %v2893_v20 }
0x102a   :  { %v2895_v40 = vadd.f32 1e-05, %v2894_v27 }
0x102c   :  { %5110 = vrsqrt.f32 %v2895_v40  ;;  %v3127_v40 = vld [vmem:[#allocation10 + $0x438] sm:$0x1] }
0x102d   :  { %v3128_v16 = vunpack.c.l.bf16 %v3127_v40 }
0x102f   :  { %v3132_v38 = vrot.slane %v3128_v16, %v5331_v23 }
0x1039   :  { %v5111_v49 = vpop.eup %5110 }
0x103a   :  { %v2897_v41 = vmul.f32 %v5111_v49, %v2889_v62  ;;  %v4055_v62 = vunpack.c.l.bf16 %v4202_v28  ;;  %v4087_v28 = vunpack.c.l.bf16 %v4210_v56 }
0x103c   :  { %v2902_v47 = vmul.f32 %v2901_v51, %v2897_v41  ;;  %4969 = vmatpush3.msra.mxu1 %v4055_v62 }
0x103d   :  { %4970 = vmatprep.subr.mxu1 %v5251_v0 }
0x103e   :  { %v2907_v26 = vadd.f32 %v2906_v48, %v2902_v47  ;;  %4971 = vmatpush3.msra.mxu1 %v4052_v7  ;;  %v4095_v7 = vunpack.c.l.bf16 %v4212_v9 }
0x103f   :  { %4972 = vmatprep.subr.mxu1 %v5251_v0 }
0x1040   :  { %4945 = vmatmul.mubr.msk.f32.vlgmr.msra.gmra.mxu0 %vm104_vm1, %v2907_v26  ;;  %4973 = vmatpush3.msra.mxu1 %v4051_v29  ;;  %v4211_v29 = vld [vmem:[#allocation10 + $0x490] sm:$0xff]  }
0x1041   :  { %4955 = vmatprep.mubr.msk.f32.mxu0 %vm5252_vm0, %v5251_v0  ;;  %4948 = vmatpush3.msra.mxu0 %v4048_v21  ;;  %v4092_v61 = vunpack.c.h.bf16 %v4211_v29  ;;  %v4091_v22 = vunpack.c.l.bf16 %v4211_v29 }
0x1042   :  { %4949 = vmatprep.subr.mxu0 %v5251_v0  ;;  %5007 = vmatprep.subr.mxu1 %v5251_v0 }
0x1043   :  { %4950 = vmatpush3.msra.mxu0 %v4047_v63 }
0x1044   :  { %4951 = vmatprep.subr.mxu0 %v5251_v0 }
0x1045   :  { %4952 = vmatpush3.msra.mxu0 %v4044_v4 }
0x1046   :  { %4953 = vmatprep.subr.mxu0 %v5251_v0 }
0x1047   :  { %4954 = vmatpush3.msra.mxu0 %v4043_v14 }
0x1048   :  { %4977 = vmatprep.subr.mxu0 %v5251_v0 }
0x1100   :  { %v2991_v17 = vpop.f32.mrf.mxu0 }
0x1101   :  { %v2992_v31 = vadd.f32 %v2991_v17, %v2921_v53  ;;  %v4206_v53 = vld [vmem:[#allocation10 + $0x458] sm:$0xff]  }
0x1102   :  { %v4946_v60 = vpop.f32.mrf.mxu0  ;;  %v4072_v17 = vunpack.c.h.bf16 %v4206_v53 }
0x1103   :  { %v2995_v46 = vadd.f32 %v2992_v31, %v2907_v26  ;;  %v4071_v31 = vunpack.c.l.bf16 %v4206_v53  ;;  %v4205_v60 = vld [vmem:[#allocation10 + $0x450] sm:$0xff]  }
0x1105   :  { %v3000_v59 = vsel %vm104_vm1, %v2995_v46, 0.0 }
0x1106   :  { %3001 = vadd.xlane.f32.xlu0 %v3000_v59  ;;  %v4067_v59 = vunpack.c.l.bf16 %v4205_v60 }
0x118f   :  { %v3002_v58 = vpop.xlane.xlu0 %3001 }
0x1190   :  { %v3003_v45 = vmul.f32 0.03125, %v3002_v58 }
0x1192   :  { %v3004_v3 = vsub.f32 %v2995_v46, %v3003_v45  ;;  %v4068_v46 = vunpack.c.h.bf16 %v4205_v60 }
0x1194   :  { %v3005_v57 = vmul.f32 %v3004_v3, %v3004_v3 }
0x1196   :  { %v3006_v11 = vsel %vm104_vm1, %v3005_v57, 0.0  ;;  %v3207_v57 = vld [vmem:[#allocation10 + $0x440] sm:$0x1] }
0x1197   :  { %3007 = vadd.xlane.f32.xlu1 %v3006_v11  ;;  %v3209_v11 = vld [vmem:[#allocation10 + $0x448] sm:$0x1]  ;;  %v3208_v52 = vunpack.c.l.bf16 %v3207_v57 }
0x1198   :  { %v3210_v21 = vunpack.c.l.bf16 %v3209_v11 }
0x1199   :  { %v3227_v63 = vrot.slane %v3208_v52, %v5331_v23 }
0x119a   :  { %v3232_v14 = vrot.slane %v3210_v21, %v5331_v23 }
0x1220   :  { %v3008_v18 = vpop.xlane.xlu1 %3007 }
0x1221   :  { %v3009_v13 = vmul.f32 0.03125, %v3008_v18  ;;  %v4083_v18 = vunpack.c.l.bf16 %v4209_v12 }
0x1223   :  { %v3010_v1 = vadd.f32 1e-05, %v3009_v13  ;;  %v4080_v13 = vunpack.c.h.bf16 %v4208_v2 }
0x1225   :  { %5112 = vrsqrt.f32 %v3010_v1  ;;  %v4079_v1 = vunpack.c.l.bf16 %v4208_v2 }
0x1232   :  { %v5113_v10 = vpop.eup %5112 }
0x1233   :  { %v3012_v50 = vmul.f32 %v5113_v10, %v3004_v3  ;;  %v3242_v10 = vld [vmem:[#allocation10 + $0x460] sm:$0x1] }
0x1235   :  { %v3017_v15 = vmul.f32 %v3016_v35, %v3012_v50  ;;  %v4096_v35 = vunpack.c.h.bf16 %v4212_v9  ;;  %v3243_v50 = vunpack.c.l.bf16 %v3242_v10 }
0x1237   :  { %v3022_v33 = vadd.f32 %v3021_v30, %v3017_v15  ;;  %v3247_v30 = vrot.slane %v3243_v50, %v5331_v23 }
0x1239   :  { %4956 = vmatmul.mubr.msk.f32.vlgmr.msra.gmra.mxu0 %vm104_vm1, %v3022_v33 }
0x123a   :  { %4985 = vmatprep.mubr.msk.f32.mxu0 %vm5252_vm0, %v5251_v0  ;;  %4978 = vmatpush3.msra.mxu0 %v4072_v17 }
0x123b   :  { %4979 = vmatprep.subr.mxu0 %v5251_v0 }
0x123c   :  { %4980 = vmatpush3.msra.mxu0 %v4071_v31 }
0x123d   :  { %4981 = vmatprep.subr.mxu0 %v5251_v0 }
0x123e   :  { %4982 = vmatpush3.msra.mxu0 %v4068_v46 }
0x123f   :  { %4983 = vmatprep.subr.mxu0 %v5251_v0 }
0x1240   :  { %4984 = vmatpush3.msra.mxu0 %v4067_v59 }
0x1241   :  { %4988 = vmatprep.subr.mxu0 %v5251_v0 }
0x12f9   :  { %v3106_v36 = vpop.f32.mrf.mxu0 }
0x12fa   :  { %v3107_v42 = vadd.f32 %v3106_v36, %v3036_v34  ;;  %v3338_v34 = vld [vmem:[#allocation10 + $0x488] sm:$0x1] }
0x12fb   :  { %v4957_v20 = vpop.f32.mrf.mxu0  ;;  %v3339_v36 = vunpack.c.l.bf16 %v3338_v34 }
0x12fc   :  { %v3110_v27 = vmax.f32 %v3107_v42, 0.0 }
0x12fd   :  { %v3343_v42 = vrot.slane %v3339_v36, %v5331_v23 }
0x12fe   :  { %4975 = vmatmul.mubr.msk.f32.vlgmr.msra.gmra.mxu1 %vm380_vm3, %v3110_v27 }
0x12ff   :  { %5015 = vmatprep.mubr.msk.f32.mxu1 %vm5252_vm0, %v5251_v0  ;;  %5008 = vmatpush3.msra.mxu1 %v4096_v35 }
0x1300   :  { %5009 = vmatprep.subr.mxu1 %v5251_v0 }
0x1301   :  { %5010 = vmatpush3.msra.mxu1 %v4095_v7 }
0x1302   :  { %5011 = vmatprep.subr.mxu1 %v5251_v0 }
0x1303   :  { %5012 = vmatpush3.msra.mxu1 %v4092_v61 }
0x1304   :  { %5013 = vmatprep.subr.mxu1 %v5251_v0 }
0x1305   :  { %5014 = vmatpush3.msra.mxu1 %v4091_v22 }
0x13be   :  { %v3202_v44 = vpop.f32.mrf.mxu1 }
0x13bf   :  { %v3203_v43 = vadd.f32 %v3202_v44, %v3132_v38  ;;  %v3426_v38 = vld [vmem:[#allocation10 + $0x4a0] sm:$0x1] }
0x13c0   :  { %v4976_v51 = vpop.f32.mrf.mxu1  ;;  %v3427_v44 = vunpack.c.l.bf16 %v3426_v38 }
0x13c1   :  { %v3206_v49 = vadd.f32 %v3203_v43, %v3022_v33 }
0x13c2   :  { %v3431_v43 = vrot.slane %v3427_v44, %v5331_v23 }
0x13c3   :  { %v3211_v41 = vsel %vm104_vm1, %v3206_v49, 0.0 }
0x13c4   :  { %3212 = vadd.xlane.f32.xlu0 %v3211_v41 }
0x144d   :  { %v3213_v48 = vpop.xlane.xlu0 %3212 }
0x144e   :  { %v3214_v47 = vmul.f32 0.03125, %v3213_v48 }
0x1450   :  { %v3215_v26 = vsub.f32 %v3206_v49, %v3214_v47 }
0x1452   :  { %v3216_v55 = vmul.f32 %v3215_v26, %v3215_v26 }
0x1454   :  { %v3217_v39 = vsel %vm104_vm1, %v3216_v55, 0.0 }
0x1455   :  { %3218 = vadd.xlane.f32.xlu1 %v3217_v39 }
0x14de   :  { %v3219_v58 = vpop.xlane.xlu1 %3218 }
0x14df   :  { %v3220_v45 = vmul.f32 0.03125, %v3219_v58 }
0x14e1   :  { %v3221_v3 = vadd.f32 1e-05, %v3220_v45 }
0x14e3   :  { %5114 = vrsqrt.f32 %v3221_v3 }
0x14f0   :  { %v5115_v5 = vpop.eup %5114 }
0x14f1   :  { %v3223_v4 = vmul.f32 %v5115_v5, %v3215_v26 }
0x14f3   :  { %v3228_v25 = vmul.f32 %v3227_v63, %v3223_v4 }
0x14f5   :  { %v3233_v8 = vadd.f32 %v3232_v14, %v3228_v25 }
0x14f7   :  { %4986 = vmatmul.mubr.msk.f32.vlgmr.msra.gmra.mxu0 %vm104_vm1, %v3233_v8 }
0x14f8   :  { %4989 = vmatpush3.msra.mxu0 %v4088_v37  ;;  %5004 = vmatprep.mubr.msk.f32.mxu0 %vm5252_vm0, %v5251_v0 }
0x14f9   :  { %4990 = vmatprep.subr.mxu0 %v5251_v0 }
0x14fa   :  { %4991 = vmatpush3.msra.mxu0 %v4087_v28 }
0x14fb   :  { %4992 = vmatprep.subr.mxu0 %v5251_v0 }
0x14fc   :  { %4993 = vmatpush3.msra.mxu0 %v4084_v19 }
0x14fd   :  { %4994 = vmatprep.subr.mxu0 %v5251_v0 }
0x14fe   :  { %4995 = vmatpush3.msra.mxu0 %v4083_v18 }
0x14ff   :  { %4996 = vmatprep.subr.mxu0 %v5251_v0 }
0x1500   :  { %4997 = vmatpush3.msra.mxu0 %v4080_v13 }
0x1501   :  { %4998 = vmatprep.subr.mxu0 %v5251_v0 }
0x1502   :  { %4999 = vmatpush3.msra.mxu0 %v4079_v1 }
0x1503   :  { %5000 = vmatprep.subr.mxu0 %v5251_v0 }
0x1504   :  { %5001 = vmatpush3.msra.mxu0 %v4076_v54 }
0x1505   :  { %5002 = vmatprep.subr.mxu0 %v5251_v0 }
0x1506   :  { %5003 = vmatpush3.msra.mxu0 %v4075_v24 }
0x15b7   :  { %v3317_v15 = vpop.f32.mrf.mxu0 }
0x15b8   :  { %v3318_v33 = vadd.f32 %v3317_v15, %v3247_v30 }
0x15b9   :  { %v4987_v62 = vpop.f32.mrf.mxu0 }
0x15ba   :  { %v3321_v6 = vmax.f32 %v3318_v33, 0.0 }
0x15bc   :  { %5005 = vmatmul.mubr.msk.f32.vlgmr.msra.gmra.mxu0 %vm380_vm3, %v3321_v6 }
0x167c   :  { %v3413_v20 = vpop.f32.mrf.mxu0 }
0x167d   :  { %v3414_v27 = vadd.f32 %v3413_v20, %v3343_v42 }
0x167e   :  { %v5006_v40 = vpop.f32.mrf.mxu0 }
0x167f   :  { %v3417_v16 = vmax.f32 %v3414_v27, 0.0 }
0x1681   :  { %5016 = vmatmul.mubr.msk.f32.vlgmr.msra.gmra.mxu1 %vm104_vm1, %v3417_v16 }
0x1741   :  { %v3501_v51 = vpop.f32.mrf.mxu1 }
0x1742   :  { %v3502_v49 = vadd.f32 %v3501_v51, %v3431_v43 }
0x1743   :  { %v5017_v0 = vpop.f32.mrf.mxu1 }
0x1744   :  { %3505 = vst [vmem:[#allocation11] sm:$0xff] %v3502_v49 }
0x1745   :  { %5227 = shalt.err (!%p5224_p1)
}
0x1746   :  { %3515 = dma.vmem_to_hbm [thread:$0]  %s3513_s4, 128, %s6040_s5, [#allocation4]  }
0x1747   :  { %5242 = dma.done.wait [#allocation4], 128  }
0x1748   :  { %5243 = vsyncadd [#allocation4], 4294967168 }
0x1749   :  { %3519 = vsyncpa [#allocation3], 1 }
0x174a   :  { %3520 = vsyncpa [#allocation6], 1 }
0x174b   :  { %3521 = vsyncpa [#allocation9], 1 }
0x174c   :  { %3522 = vsyncpa [#allocation4], 1 }

</bundles_post_ra>
